<compile_context>
chip_gen: v7x
topology: tpu7x:2x2x1
jax: 0.10.0
libtpu: 0.0.40
codegen_flags: <defaults>
</compile_context>

<pallas_src>
import functools
import math

import jax
import jax.numpy as jnp
from jax import lax
from jax.experimental import pallas as pl
from jax.experimental.pallas import tpu as pltpu


EMBED = 64
HIDDEN = 64
DENSE_TK = 512           # K-tile of the streamed dense2 weight
DENSE_TN = 512           # N-tile (output-lane dense)


# ----------------------------------------------------------------------------
# Small fused linear kernel: y = x @ w + b, optional PReLU / BN-affine / gate
# (whole operands live in VMEM, grid=() — these matmuls are tiny)
# ----------------------------------------------------------------------------
def _fused_linear_kernel(*refs, prelu, affine, gate):
    x_ref, w_ref, b_ref = refs[0], refs[1], refs[2]
    o_ref = refs[-1]
    idx = 3
    y = jnp.dot(x_ref[...], w_ref[...],
                preferred_element_type=jnp.float32) + b_ref[...]
    if prelu:
        a = refs[idx][...]
        idx += 1
        y = jnp.where(y >= 0, y, y * a)
    if affine:
        y = y * refs[idx][...] + refs[idx + 1][...]
        idx += 2
    if gate:
        y = y * refs[idx][...]
        idx += 1
    o_ref[...] = y


def fused_linear(x, wT, b, *, alpha=None, scale=None, shift=None, gate=None):
    """act(x @ wT + b) with optional fused PReLU / BN-affine / element gate."""
    inputs = [x, wT, b.reshape(1, -1)]
    if alpha is not None:
        inputs.append(alpha)
    if scale is not None:
        inputs += [scale, shift]
    if gate is not None:
        inputs.append(gate)
    M, N = x.shape[0], wT.shape[1]
    kern = functools.partial(_fused_linear_kernel,
                             prelu=alpha is not None,
                             affine=scale is not None,
                             gate=gate is not None)
    return pl.pallas_call(
        kern, out_shape=jax.ShapeDtypeStruct((M, N), jnp.float32))(*inputs)


# ----------------------------------------------------------------------------
# Tiny channel-affine kernel (BatchNorm after MaxPool for the pooled blocks)
# ----------------------------------------------------------------------------
def _affine_kernel(x_ref, s_ref, t_ref, o_ref):
    o_ref[...] = x_ref[...] * s_ref[...] + t_ref[...]


def pallas_affine(x2d, scale, shift):
    return pl.pallas_call(
        _affine_kernel,
        out_shape=jax.ShapeDtypeStruct(x2d.shape, x2d.dtype))(x2d, scale, shift)


# ----------------------------------------------------------------------------
# Conv1d via im2col (JAX glue) + fused linear kernel
# ----------------------------------------------------------------------------
def _im2col(x_blc, ksize, padding):
    B, L, Cin = x_blc.shape
    xp = jnp.pad(x_blc, ((0, 0), (padding, padding), (0, 0)))
    Lout = L + 2 * padding - ksize + 1
    cols = jnp.stack([xp[:, kk:kk + Lout, :] for kk in range(ksize)], axis=-1)
    return cols.reshape(B * Lout, Cin * ksize), Lout


def conv1d_forward(x_blc, wT, b, *, ksize, padding):
    B = x_blc.shape[0]
    pmat, Lout = _im2col(x_blc, ksize, padding)
    y = fused_linear(pmat, wT, b)
    return y.reshape(B, Lout, wT.shape[1])


def conv_block_forward(x_blc, p, *, ksize, padding, pool):
    """Conv -> PReLU -> Dropout(eval: id) -> MaxPool1d(pool) -> BatchNorm."""
    B = x_blc.shape[0]
    pmat, Lout = _im2col(x_blc, ksize, padding)
    Cout = p["wT"].shape[1]
    if pool == 1:  # MaxPool1d(1) is identity -> fold everything into one kernel
        y = fused_linear(pmat, p["wT"], p["b"], alpha=p["alpha"],
                         scale=p["scale"], shift=p["shift"])
        return y.reshape(B, Lout, Cout)
    # Conv + PReLU fused; pool over the tiny length axis as glue; BN affine kernel.
    y = fused_linear(pmat, p["wT"], p["b"], alpha=p["alpha"])
    y = y.reshape(B, Lout, Cout)
    L2 = Lout // pool
    y = y[:, :L2 * pool].reshape(B, L2, pool, Cout).max(axis=2)
    y = pallas_affine(y.reshape(B * L2, Cout), p["scale"], p["shift"])
    return y.reshape(B, L2, Cout)


# ----------------------------------------------------------------------------
# Multi-head attention core (nn.MultiheadAttention math, no dropout)
# ----------------------------------------------------------------------------
def _mha_kernel(q_ref, k_ref, v_ref, o_ref, *, scale, lk):
    s = jnp.einsum("bqd,bkd->bqk", q_ref[...] * scale, k_ref[...],
                   preferred_element_type=jnp.float32)
    kidx = lax.broadcasted_iota(jnp.int32, s.shape, 2)
    s = jnp.where(kidx < lk, s, -1e30)          # mask padded key positions
    s = s - jnp.max(s, axis=-1, keepdims=True)
    p = jnp.exp(s)
    p = p / jnp.sum(p, axis=-1, keepdims=True)
    o_ref[...] = jnp.einsum("bqk,bkd->bqd", p, v_ref[...],
                            preferred_element_type=jnp.float32)


def _round_up(x, m):
    return (x + m - 1) // m * m


def mha_core(q, k, v, scale):
    """q: [BH, Lq, Dh], k/v: [BH, Lk, Dh] -> [BH, Lq, Dh] (tiny, single call)."""
    BH, Lq, Dh = q.shape
    Lk = k.shape[1]
    Lqp, Lkp, Dp = _round_up(Lq, 8), _round_up(Lk, 8), _round_up(Dh, 128)
    qp = jnp.pad(q, ((0, 0), (0, Lqp - Lq), (0, Dp - Dh)))
    kp = jnp.pad(k, ((0, 0), (0, Lkp - Lk), (0, Dp - Dh)))
    vp = jnp.pad(v, ((0, 0), (0, Lkp - Lk), (0, Dp - Dh)))
    out = pl.pallas_call(
        functools.partial(_mha_kernel, scale=float(scale), lk=Lk),
        out_shape=jax.ShapeDtypeStruct((BH, Lqp, Dp), jnp.float32),
    )(qp, kp, vp)
    return out[:, :Lq, :Dh]


def mha_attend(query_lbe, kv_lbe, p, heads):
    """Q/K/V projections + attention; returns heads-merged [Lq, B, E]
    (the output projection is fused with the gating multiply by the caller)."""
    Lq, B, E = query_lbe.shape
    Lk = kv_lbe.shape[0]
    Dh = E // heads
    q = fused_linear(query_lbe.reshape(Lq * B, E), p["wqT"], p["bq"])
    kv = fused_linear(kv_lbe.reshape(Lk * B, E), p["wkvT"], p["bkv"])
    k, v = kv[:, :E], kv[:, E:]

    def split_heads(t, Lt):
        return (t.reshape(Lt, B, heads, Dh)
                 .transpose(1, 2, 0, 3).reshape(B * heads, Lt, Dh))

    attn = mha_core(split_heads(q, Lq), split_heads(k, Lk), split_heads(v, Lk),
                    scale=1.0 / math.sqrt(Dh))                  # [B*H, Lq, Dh]
    return (attn.reshape(B, heads, Lq, Dh)
                .transpose(2, 0, 1, 3).reshape(Lq, B, E))


# ----------------------------------------------------------------------------
# Both LSTM layers in ONE kernel (forward direction only; backward half of the
# bidirectional LSTM is discarded by the reference).  Returns h2 at t = T-1.
# ----------------------------------------------------------------------------
def _lstm_stack_kernel(x_ref, wih1, whh1, b1, wih2, whh2, b2, o_ref, *, hidden):
    T, B = x_ref.shape[0], x_ref.shape[1]

    def cell(x_t, h, c, wih, whh, b):
        g = (jnp.dot(x_t, wih[...], preferred_element_type=jnp.float32)
             + jnp.dot(h, whh[...], preferred_element_type=jnp.float32)
             + b[...])
        i = jax.nn.sigmoid(g[:, 0 * hidden:1 * hidden])
        f = jax.nn.sigmoid(g[:, 1 * hidden:2 * hidden])
        gg = jnp.tanh(g[:, 2 * hidden:3 * hidden])
        o = jax.nn.sigmoid(g[:, 3 * hidden:4 * hidden])
        c_new = f * c + i * gg
        h_new = o * jnp.tanh(c_new)
        return h_new, c_new

    def step(t, carry):
        h1, c1, h2, c2 = carry
        x_t = x_ref[t]
        h1, c1 = cell(x_t, h1, c1, wih1, whh1, b1)
        h2, c2 = cell(h1, h2, c2, wih2, whh2, b2)
        return (h1, c1, h2, c2)

    z = jnp.zeros((B, hidden), jnp.float32)
    _, _, h2, _ = lax.fori_loop(0, T, step, (z, z, z, z), unroll=True)
    o_ref[...] = h2


def lstm_stack(x_tbe, p1, p2):
    T, B, _ = x_tbe.shape
    H = p1["whh"].shape[0]
    return pl.pallas_call(
        functools.partial(_lstm_stack_kernel, hidden=H),
        out_shape=jax.ShapeDtypeStruct((B, H), jnp.float32),
    )(x_tbe, p1["wih"], p1["whh"], p1["b"], p2["wih"], p2["whh"], p2["b"])


# ----------------------------------------------------------------------------
# Fused dense1 + dense2 + sigmoid: streams the bf16 dense2 weight in
# tile-major contiguous blocks; the dense1 slice is recomputed per K-step.
# ----------------------------------------------------------------------------
def _dense_kernel(feat_ref, w1_ref, b1_ref, w2_ref, b2_ref, o_ref, acc_ref):
    k = pl.program_id(1)

    @pl.when(k == 0)
    def _init():
        acc_ref[...] = jnp.zeros_like(acc_ref)

    # dense1 slice for this K block (tiny: [8,64] @ [64,tk]).
    z = jnp.dot(feat_ref[...], w1_ref[...],
                preferred_element_type=jnp.float32) + b1_ref[...]
    acc_ref[...] += jnp.dot(z.astype(jnp.bfloat16), w2_ref[0],
                            preferred_element_type=jnp.float32)

    @pl.when(k == pl.num_programs(1) - 1)
    def _fin():
        o_ref[...] = jax.nn.sigmoid(acc_ref[...] + b2_ref[...])


def fused_dense(feat, p, out_dim):
    Bf, Kin = feat.shape
    w1, b1, w2t, b2 = p["w1"], p["b1"], p["w2t"], p["b2"]
    Nb, Kp, tn = w2t.shape
    tk = DENSE_TK
    Kb = Kp // tk
    Mp = 8
    featp = jnp.pad(feat, ((0, Mp - Bf), (0, 0))).astype(jnp.bfloat16)
    out = pl.pallas_call(
        _dense_kernel,
        out_shape=jax.ShapeDtypeStruct((Mp, Nb * tn), jnp.float32),
        grid=(Nb, Kb),
        in_specs=[
            pl.BlockSpec((Mp, Kin), lambda n, k: (0, 0)),       # feat resident
            pl.BlockSpec((Kin, tk), lambda n, k: (0, k)),       # dense1 W slice
            pl.BlockSpec((1, tk), lambda n, k: (0, k)),         # dense1 b slice
            pl.BlockSpec((1, tk, tn), lambda n, k: (n, k, 0)),  # dense2 tile (contig)
            pl.BlockSpec((1, tn), lambda n, k: (0, n)),         # dense2 b slice
        ],
        out_specs=pl.BlockSpec((Mp, tn), lambda n, k: (0, n)),
        scratch_shapes=[pltpu.VMEM((Mp, tn), jnp.float32)],
        compiler_params=pltpu.CompilerParams(
            dimension_semantics=("parallel", "arbitrary"),
            vmem_limit_bytes=32 * 1024 * 1024),
    )(featp, w1, b1, w2t, b2)
    return out[:Bf, :out_dim]


# ----------------------------------------------------------------------------
# Full CBLANE forward (jit this)
# ----------------------------------------------------------------------------
def cblane_forward(params, x, *, heads, out_dim):
    B = x.shape[0]
    # nn.ZeroPad2d((3,3,0,0)) pads the length axis by 3 on each side.
    x = jnp.pad(x, ((0, 0), (3, 3), (0, 0)))
    x = conv_block_forward(x, params["cb0"], ksize=8, padding=0, pool=1)
    x = conv_block_forward(x, params["cb1"], ksize=4, padding=2, pool=1)
    x = conv_block_forward(x, params["cb2"], ksize=2, padding=1, pool=2)
    x = conv_block_forward(x, params["cb3"], ksize=2, padding=1, pool=2)  # [B,Lx,64]

    q = conv1d_forward(x, params["qconv"]["wT"], params["qconv"]["b"],
                       ksize=8, padding=4)                                # [B,Lq,64]
    Lq, Lx = q.shape[1], x.shape[1]
    query = q.transpose(1, 0, 2)                                          # [Lq,B,64]
    key_value = x.transpose(1, 0, 2)                                      # [Lx,B,64]
    attn = mha_attend(query, key_value, params["mha"], heads)             # [Lq,B,64]

    # out-projection fused with the `attn * x` gate, truncated to min_len.
    T = min(Lq, Lx)
    attn_flat = attn[:T].reshape(T * B, EMBED)
    x_flat = x[:, :T].transpose(1, 0, 2).reshape(T * B, EMBED)
    gated = fused_linear(attn_flat, params["mha"]["woT"], params["mha"]["bo"],
                         gate=x_flat).reshape(T, B, EMBED)                # [T,B,64]

    feat = lstm_stack(gated, params["lstm1"], params["lstm2"])            # [B,64]
    return fused_dense(feat, params["dense"], out_dim)                    # [B,out_dim]


# ----------------------------------------------------------------------------
# Deterministic synthetic parameters, pre-packed for the kernels (done once)
# ----------------------------------------------------------------------------
def init_params(key, out_dim):
    keys = iter(jax.random.split(key, 64))
    nxt = lambda: next(keys)

    def conv_block_params(cin, cout, k):
        w = 0.1 * jax.random.normal(nxt(), (cout, cin, k), jnp.float32)
        b = 0.1 * jax.random.normal(nxt(), (cout,), jnp.float32)
        gamma = jax.random.uniform(nxt(), (cout,), jnp.float32,
                                   minval=0.5, maxval=1.5)
        beta = 0.1 * jax.random.normal(nxt(), (cout,), jnp.float32)
        mean = 0.1 * jax.random.normal(nxt(), (cout,), jnp.float32)
        var = jax.random.uniform(nxt(), (cout,), jnp.float32,
                                 minval=0.5, maxval=1.5)
        scale = gamma / jnp.sqrt(var + 1e-5)          # eval-mode BN affine
        shift = beta - mean * scale
        return dict(wT=w.reshape(cout, cin * k).T,    # [Cin*K, Cout] for x @ w
                    b=b,
                    alpha=jnp.full((1, 1), 0.25, jnp.float32),  # nn.PReLU default
                    scale=scale.reshape(1, cout),
                    shift=shift.reshape(1, cout))

    def lstm_params(in_dim, hid):
        w_ih = 0.1 * jax.random.normal(nxt(), (4 * hid, in_dim), jnp.float32)
        w_hh = 0.1 * jax.random.normal(nxt(), (4 * hid, hid), jnp.float32)
        b_ih = 0.1 * jax.random.normal(nxt(), (4 * hid,), jnp.float32)
        b_hh = 0.1 * jax.random.normal(nxt(), (4 * hid,), jnp.float32)
        return dict(wih=w_ih.T, whh=w_hh.T, b=(b_ih + b_hh).reshape(1, 4 * hid))

    E = EMBED
    wq = 0.1 * jax.random.normal(nxt(), (E, E), jnp.float32)
    wk = 0.1 * jax.random.normal(nxt(), (E, E), jnp.float32)
    wv = 0.1 * jax.random.normal(nxt(), (E, E), jnp.float32)
    bq = 0.1 * jax.random.normal(nxt(), (E,), jnp.float32)
    bk = 0.1 * jax.random.normal(nxt(), (E,), jnp.float32)
    bv = 0.1 * jax.random.normal(nxt(), (E,), jnp.float32)
    wo = 0.1 * jax.random.normal(nxt(), (E, E), jnp.float32)
    bo = 0.1 * jax.random.normal(nxt(), (E,), jnp.float32)
    mha = dict(wqT=wq.T, bq=bq,
               wkvT=jnp.concatenate([wk.T, wv.T], axis=1),   # packed K|V proj
               bkv=jnp.concatenate([bk, bv]),
               woT=wo.T, bo=bo)

    qw = 0.1 * jax.random.normal(nxt(), (E, E, 8), jnp.float32)
    qb = 0.1 * jax.random.normal(nxt(), (E,), jnp.float32)

    # --- dense layers: packed ONCE, bf16, dense2 weight in tile-major layout ---
    tk, tn = DENSE_TK, DENSE_TN
    Kp = -(-out_dim // tk) * tk
    Nb = -(-out_dim // tn)
    Np = Nb * tn
    w1 = 0.05 * jax.random.normal(nxt(), (E, out_dim), jnp.float32)
    b1 = 0.05 * jax.random.normal(nxt(), (out_dim,), jnp.float32)
    # zero-pad dense1's extra output columns so the padded K rows of dense2
    # never contribute to the real outputs.
    w1p = jnp.pad(w1, ((0, 0), (0, Kp - out_dim))).astype(jnp.bfloat16)
    b1p = jnp.pad(b1, (0, Kp - out_dim)).reshape(1, Kp)
    # dense2 weight packed once into tile-major layout [Nb, Kp, tn]:
    # logical W2[k, n] == w2t[n // tn, k, n % tn]; each grid block is one
    # contiguous bf16 slab (with real PyTorch weights this repack is a
    # one-time operation at load).
    w2 = 0.02 * jax.random.normal(nxt(), (out_dim, out_dim), jnp.float32)
    w2p = jnp.pad(w2, ((0, Kp - out_dim), (0, Np - out_dim))).astype(jnp.bfloat16)
    w2t = w2p.reshape(Kp, Nb, tn).transpose(1, 0, 2)
    b2 = 0.05 * jax.random.normal(nxt(), (out_dim,), jnp.float32)
    b2p = jnp.pad(b2, (0, Np - out_dim)).reshape(1, Np)

    return dict(
        cb0=conv_block_params(4, 256, 8),
        cb1=conv_block_params(256, 128, 4),
        cb2=conv_block_params(128, 64, 2),
        cb3=conv_block_params(64, 64, 2),
        qconv=dict(wT=qw.reshape(E, E * 8).T, b=qb),
        mha=mha,
        lstm1=lstm_params(E, HIDDEN),
        lstm2=lstm_params(HIDDEN, HIDDEN),
        dense=dict(w1=w1p, b1=b1p, w2t=w2t, b2=b2p),
    )


if __name__ == "__main__":
    # Small demo shapes (the module's original dense layers are 21907-wide;
    # here out_dim is scaled down to 1907 so the whole demo — weights, RNG
    # temporaries and TPU runtime — stays far below the 8 GB sandbox limit.
    # The streamed dense kernel is size-agnostic and handles 21907 unchanged.)
    B, L, HEADS, OUT_DIM = 2, 16, 4, 1907
    key = jax.random.PRNGKey(0)
    pkey, xkey = jax.random.split(key)
    params = init_params(pkey, OUT_DIM)
    x = jax.random.normal(xkey, (B, L, 4), jnp.float32)   # [batch, seq, 4 channels]

    fwd = jax.jit(functools.partial(cblane_forward, heads=HEADS, out_dim=OUT_DIM))
    out = jax.block_until_ready(fwd(params, x))

    assert out.shape == (B, OUT_DIM), out.shape
    assert bool(jnp.isfinite(out).all())
    assert bool((out >= 0).all() and (out <= 1).all())     # sigmoid output
    print("KERNEL_OK")
</pallas_src>

<mosaic_0001>
module attributes {stable_mosaic.version = 11 : i64} {
  func.func @_fused_linear_kernel(%arg0: memref<32x1024xf32, #tpu.memory_space<vmem>>, %arg1: memref<1024x128xf32, #tpu.memory_space<vmem>>, %arg2: memref<1x128xf32, #tpu.memory_space<vmem>>, %arg3: memref<1x1xf32, #tpu.memory_space<vmem>>, %arg4: memref<1x128xf32, #tpu.memory_space<vmem>>, %arg5: memref<1x128xf32, #tpu.memory_space<vmem>>, %arg6: memref<32x128xf32, #tpu.memory_space<vmem>>) attributes {dimension_semantics = [], scalar_prefetch = 0 : i64, scratch_operands = 0 : i64, tpu.core_type = #tpu.core_type<tc>} {
    %c0 = arith.constant 0 : index
    %c0_0 = arith.constant 0 : index
    %0 = vector.load %arg0[%c0, %c0_0] : memref<32x1024xf32, #tpu.memory_space<vmem>>, vector<32x1024xf32>
    %c0_1 = arith.constant 0 : index
    %c0_2 = arith.constant 0 : index
    %1 = vector.load %arg1[%c0_1, %c0_2] : memref<1024x128xf32, #tpu.memory_space<vmem>>, vector<1024x128xf32>
    %cst = arith.constant dense<0.000000e+00> : vector<32x128xf32>
    %2 = tpu.matmul %0, %1, %cst {dimension_numbers = #tpu.dot_dimension_numbers<[1], [0], [0], [1], [0, 0, 1, 1], [], []>} : vector<32x1024xf32>, vector<1024x128xf32>, vector<32x128xf32> -> vector<32x128xf32>
    %c0_3 = arith.constant 0 : index
    %c0_4 = arith.constant 0 : index
    %3 = vector.load %arg2[%c0_3, %c0_4] : memref<1x128xf32, #tpu.memory_space<vmem>>, vector<1x128xf32>
    %4 = vector.broadcast %3 : vector<1x128xf32> to vector<32x128xf32>
    %5 = arith.addf %2, %4 : vector<32x128xf32>
    %c0_5 = arith.constant 0 : index
    %c0_6 = arith.constant 0 : index
    %6 = vector.load %arg3[%c0_5, %c0_6] : memref<1x1xf32, #tpu.memory_space<vmem>>, vector<1x1xf32>
    %cst_7 = arith.constant 0.000000e+00 : f32
    %7 = vector.broadcast %cst_7 : f32 to vector<32x128xf32>
    %8 = arith.cmpf oge, %5, %7 : vector<32x128xf32>
    %9 = vector.broadcast %6 : vector<1x1xf32> to vector<32x128xf32>
    %10 = arith.mulf %5, %9 : vector<32x128xf32>
    %11 = arith.select %8, %5, %10 : vector<32x128xi1>, vector<32x128xf32>
    %c0_8 = arith.constant 0 : index
    %c0_9 = arith.constant 0 : index
    %12 = vector.load %arg4[%c0_8, %c0_9] : memref<1x128xf32, #tpu.memory_space<vmem>>, vector<1x128xf32>
    %13 = vector.broadcast %12 : vector<1x128xf32> to vector<32x128xf32>
    %14 = arith.mulf %11, %13 : vector<32x128xf32>
    %c0_10 = arith.constant 0 : index
    %c0_11 = arith.constant 0 : index
    %15 = vector.load %arg5[%c0_10, %c0_11] : memref<1x128xf32, #tpu.memory_space<vmem>>, vector<1x128xf32>
    %16 = vector.broadcast %15 : vector<1x128xf32> to vector<32x128xf32>
    %17 = arith.addf %14, %16 : vector<32x128xf32>
    %c0_12 = arith.constant 0 : index
    %c0_13 = arith.constant 0 : index
    %18 = vector.load %arg6[%c0_12, %c0_13] : memref<32x128xf32, #tpu.memory_space<vmem>>, vector<32x128xf32>
    tpu.vector_store %arg6[%c0_12, %c0_13], %17 {strides = array<i32>} : memref<32x128xf32, #tpu.memory_space<vmem>>, vector<32x128xf32>,
    return
  }
}

module attributes {stable_mosaic.version = 11 : i64} {
  func.func @_fused_linear_kernel(%arg0: memref<30x32xf32, #tpu.memory_space<vmem>>, %arg1: memref<32x256xf32, #tpu.memory_space<vmem>>, %arg2: memref<1x256xf32, #tpu.memory_space<vmem>>, %arg3: memref<1x1xf32, #tpu.memory_space<vmem>>, %arg4: memref<1x256xf32, #tpu.memory_space<vmem>>, %arg5: memref<1x256xf32, #tpu.memory_space<vmem>>, %arg6: memref<30x256xf32, #tpu.memory_space<vmem>>) attributes {dimension_semantics = [], scalar_prefetch = 0 : i64, scratch_operands = 0 : i64, tpu.core_type = #tpu.core_type<tc>} {
    %c0 = arith.constant 0 : index
    %c0_0 = arith.constant 0 : index
    %0 = vector.load %arg0[%c0, %c0_0] : memref<30x32xf32, #tpu.memory_space<vmem>>, vector<30x32xf32>
    %c0_1 = arith.constant 0 : index
    %c0_2 = arith.constant 0 : index
    %1 = vector.load %arg1[%c0_1, %c0_2] : memref<32x256xf32, #tpu.memory_space<vmem>>, vector<32x256xf32>
    %cst = arith.constant dense<0.000000e+00> : vector<30x256xf32>
    %2 = tpu.matmul %0, %1, %cst {dimension_numbers = #tpu.dot_dimension_numbers<[1], [0], [0], [1], [0, 0, 1, 1], [], []>} : vector<30x32xf32>, vector<32x256xf32>, vector<30x256xf32> -> vector<30x256xf32>
    %c0_3 = arith.constant 0 : index
    %c0_4 = arith.constant 0 : index
    %3 = vector.load %arg2[%c0_3, %c0_4] : memref<1x256xf32, #tpu.memory_space<vmem>>, vector<1x256xf32>
    %4 = vector.broadcast %3 : vector<1x256xf32> to vector<30x256xf32>
    %5 = arith.addf %2, %4 : vector<30x256xf32>
    %c0_5 = arith.constant 0 : index
    %c0_6 = arith.constant 0 : index
    %6 = vector.load %arg3[%c0_5, %c0_6] : memref<1x1xf32, #tpu.memory_space<vmem>>, vector<1x1xf32>
    %cst_7 = arith.constant 0.000000e+00 : f32
    %7 = vector.broadcast %cst_7 : f32 to vector<30x256xf32>
    %8 = arith.cmpf oge, %5, %7 : vector<30x256xf32>
    %9 = vector.broadcast %6 : vector<1x1xf32> to vector<30x256xf32>
    %10 = arith.mulf %5, %9 : vector<30x256xf32>
    %11 = arith.select %8, %5, %10 : vector<30x256xi1>, vector<30x256xf32>
    %c0_8 = arith.constant 0 : index
    %c0_9 = arith.constant 0 : index
    %12 = vector.load %arg4[%c0_8, %c0_9] : memref<1x256xf32, #tpu.memory_space<vmem>>, vector<1x256xf32>
    %13 = vector.broadcast %12 : vector<1x256xf32> to vector<30x256xf32>
    %14 = arith.mulf %11, %13 : vector<30x256xf32>
    %c0_10 = arith.constant 0 : index
    %c0_11 = arith.constant 0 : index
    %15 = vector.load %arg5[%c0_10, %c0_11] : memref<1x256xf32, #tpu.memory_space<vmem>>, vector<1x256xf32>
    %16 = vector.broadcast %15 : vector<1x256xf32> to vector<30x256xf32>
    %17 = arith.addf %14, %16 : vector<30x256xf32>
    %c0_12 = arith.constant 0 : index
    %c0_13 = arith.constant 0 : index
    %18 = vector.load %arg6[%c0_12, %c0_13] : memref<30x256xf32, #tpu.memory_space<vmem>>, vector<30x256xf32>
    tpu.vector_store %arg6[%c0_12, %c0_13], %17 {strides = array<i32>} : memref<30x256xf32, #tpu.memory_space<vmem>>, vector<30x256xf32>,
    return
  }
}

module attributes {stable_mosaic.version = 11 : i64} {
  func.func @_fused_linear_kernel(%arg0: memref<34x256xf32, #tpu.memory_space<vmem>>, %arg1: memref<256x64xf32, #tpu.memory_space<vmem>>, %arg2: memref<1x64xf32, #tpu.memory_space<vmem>>, %arg3: memref<1x1xf32, #tpu.memory_space<vmem>>, %arg4: memref<34x64xf32, #tpu.memory_space<vmem>>) attributes {dimension_semantics = [], scalar_prefetch = 0 : i64, scratch_operands = 0 : i64, tpu.core_type = #tpu.core_type<tc>} {
    %c0 = arith.constant 0 : index
    %c0_0 = arith.constant 0 : index
    %0 = vector.load %arg0[%c0, %c0_0] : memref<34x256xf32, #tpu.memory_space<vmem>>, vector<34x256xf32>
    %c0_1 = arith.constant 0 : index
    %c0_2 = arith.constant 0 : index
    %1 = vector.load %arg1[%c0_1, %c0_2] : memref<256x64xf32, #tpu.memory_space<vmem>>, vector<256x64xf32>
    %cst = arith.constant dense<0.000000e+00> : vector<34x64xf32>
    %2 = tpu.matmul %0, %1, %cst {dimension_numbers = #tpu.dot_dimension_numbers<[1], [0], [0], [1], [0, 0, 1, 1], [], []>} : vector<34x256xf32>, vector<256x64xf32>, vector<34x64xf32> -> vector<34x64xf32>
    %c0_3 = arith.constant 0 : index
    %c0_4 = arith.constant 0 : index
    %3 = vector.load %arg2[%c0_3, %c0_4] : memref<1x64xf32, #tpu.memory_space<vmem>>, vector<1x64xf32>
    %4 = vector.broadcast %3 : vector<1x64xf32> to vector<34x64xf32>
    %5 = arith.addf %2, %4 : vector<34x64xf32>
    %c0_5 = arith.constant 0 : index
    %c0_6 = arith.constant 0 : index
    %6 = vector.load %arg3[%c0_5, %c0_6] : memref<1x1xf32, #tpu.memory_space<vmem>>, vector<1x1xf32>
    %cst_7 = arith.constant 0.000000e+00 : f32
    %7 = vector.broadcast %cst_7 : f32 to vector<34x64xf32>
    %8 = arith.cmpf oge, %5, %7 : vector<34x64xf32>
    %9 = vector.broadcast %6 : vector<1x1xf32> to vector<34x64xf32>
    %10 = arith.mulf %5, %9 : vector<34x64xf32>
    %11 = arith.select %8, %5, %10 : vector<34x64xi1>, vector<34x64xf32>
    %c0_8 = arith.constant 0 : index
    %c0_9 = arith.constant 0 : index
    %12 = vector.load %arg4[%c0_8, %c0_9] : memref<34x64xf32, #tpu.memory_space<vmem>>, vector<34x64xf32>
    tpu.vector_store %arg4[%c0_8, %c0_9], %11 {strides = array<i32>} : memref<34x64xf32, #tpu.memory_space<vmem>>, vector<34x64xf32>,
    return
  }
}

module attributes {stable_mosaic.version = 11 : i64} {
  func.func @_affine_kernel(%arg0: memref<16x64xf32, #tpu.memory_space<vmem>>, %arg1: memref<1x64xf32, #tpu.memory_space<vmem>>, %arg2: memref<1x64xf32, #tpu.memory_space<vmem>>, %arg3: memref<16x64xf32, #tpu.memory_space<vmem>>) attributes {dimension_semantics = [], scalar_prefetch = 0 : i64, scratch_operands = 0 : i64, tpu.core_type = #tpu.core_type<tc>} {
    %c0 = arith.constant 0 : index
    %c0_0 = arith.constant 0 : index
    %0 = vector.load %arg0[%c0, %c0_0] : memref<16x64xf32, #tpu.memory_space<vmem>>, vector<16x64xf32>
    %c0_1 = arith.constant 0 : index
    %c0_2 = arith.constant 0 : index
    %1 = vector.load %arg1[%c0_1, %c0_2] : memref<1x64xf32, #tpu.memory_space<vmem>>, vector<1x64xf32>
    %2 = vector.broadcast %1 : vector<1x64xf32> to vector<16x64xf32>
    %3 = arith.mulf %0, %2 : vector<16x64xf32>
    %c0_3 = arith.constant 0 : index
    %c0_4 = arith.constant 0 : index
    %4 = vector.load %arg2[%c0_3, %c0_4] : memref<1x64xf32, #tpu.memory_space<vmem>>, vector<1x64xf32>
    %5 = vector.broadcast %4 : vector<1x64xf32> to vector<16x64xf32>
    %6 = arith.addf %3, %5 : vector<16x64xf32>
    %c0_5 = arith.constant 0 : index
    %c0_6 = arith.constant 0 : index
    %7 = vector.load %arg3[%c0_5, %c0_6] : memref<16x64xf32, #tpu.memory_space<vmem>>, vector<16x64xf32>
    tpu.vector_store %arg3[%c0_5, %c0_6], %6 {strides = array<i32>} : memref<16x64xf32, #tpu.memory_space<vmem>>, vector<16x64xf32>,
    return
  }
}

module attributes {stable_mosaic.version = 11 : i64} {
  func.func @_fused_linear_kernel(%arg0: memref<18x128xf32, #tpu.memory_space<vmem>>, %arg1: memref<128x64xf32, #tpu.memory_space<vmem>>, %arg2: memref<1x64xf32, #tpu.memory_space<vmem>>, %arg3: memref<1x1xf32, #tpu.memory_space<vmem>>, %arg4: memref<18x64xf32, #tpu.memory_space<vmem>>) attributes {dimension_semantics = [], scalar_prefetch = 0 : i64, scratch_operands = 0 : i64, tpu.core_type = #tpu.core_type<tc>} {
    %c0 = arith.constant 0 : index
    %c0_0 = arith.constant 0 : index
    %0 = vector.load %arg0[%c0, %c0_0] : memref<18x128xf32, #tpu.memory_space<vmem>>, vector<18x128xf32>
    %c0_1 = arith.constant 0 : index
    %c0_2 = arith.constant 0 : index
    %1 = vector.load %arg1[%c0_1, %c0_2] : memref<128x64xf32, #tpu.memory_space<vmem>>, vector<128x64xf32>
    %cst = arith.constant dense<0.000000e+00> : vector<18x64xf32>
    %2 = tpu.matmul %0, %1, %cst {dimension_numbers = #tpu.dot_dimension_numbers<[1], [0], [0], [1], [0, 0, 1, 1], [], []>} : vector<18x128xf32>, vector<128x64xf32>, vector<18x64xf32> -> vector<18x64xf32>
    %c0_3 = arith.constant 0 : index
    %c0_4 = arith.constant 0 : index
    %3 = vector.load %arg2[%c0_3, %c0_4] : memref<1x64xf32, #tpu.memory_space<vmem>>, vector<1x64xf32>
    %4 = vector.broadcast %3 : vector<1x64xf32> to vector<18x64xf32>
    %5 = arith.addf %2, %4 : vector<18x64xf32>
    %c0_5 = arith.constant 0 : index
    %c0_6 = arith.constant 0 : index
    %6 = vector.load %arg3[%c0_5, %c0_6] : memref<1x1xf32, #tpu.memory_space<vmem>>, vector<1x1xf32>
    %cst_7 = arith.constant 0.000000e+00 : f32
    %7 = vector.broadcast %cst_7 : f32 to vector<18x64xf32>
    %8 = arith.cmpf oge, %5, %7 : vector<18x64xf32>
    %9 = vector.broadcast %6 : vector<1x1xf32> to vector<18x64xf32>
    %10 = arith.mulf %5, %9 : vector<18x64xf32>
    %11 = arith.select %8, %5, %10 : vector<18x64xi1>, vector<18x64xf32>
    %c0_8 = arith.constant 0 : index
    %c0_9 = arith.constant 0 : index
    %12 = vector.load %arg4[%c0_8, %c0_9] : memref<18x64xf32, #tpu.memory_space<vmem>>, vector<18x64xf32>
    tpu.vector_store %arg4[%c0_8, %c0_9], %11 {strides = array<i32>} : memref<18x64xf32, #tpu.memory_space<vmem>>, vector<18x64xf32>,
    return
  }
}

module attributes {stable_mosaic.version = 11 : i64} {
  func.func @_affine_kernel(%arg0: memref<8x64xf32, #tpu.memory_space<vmem>>, %arg1: memref<1x64xf32, #tpu.memory_space<vmem>>, %arg2: memref<1x64xf32, #tpu.memory_space<vmem>>, %arg3: memref<8x64xf32, #tpu.memory_space<vmem>>) attributes {dimension_semantics = [], scalar_prefetch = 0 : i64, scratch_operands = 0 : i64, tpu.core_type = #tpu.core_type<tc>} {
    %c0 = arith.constant 0 : index
    %c0_0 = arith.constant 0 : index
    %0 = vector.load %arg0[%c0, %c0_0] : memref<8x64xf32, #tpu.memory_space<vmem>>, vector<8x64xf32>
    %c0_1 = arith.constant 0 : index
    %c0_2 = arith.constant 0 : index
    %1 = vector.load %arg1[%c0_1, %c0_2] : memref<1x64xf32, #tpu.memory_space<vmem>>, vector<1x64xf32>
    %2 = vector.broadcast %1 : vector<1x64xf32> to vector<8x64xf32>
    %3 = arith.mulf %0, %2 : vector<8x64xf32>
    %c0_3 = arith.constant 0 : index
    %c0_4 = arith.constant 0 : index
    %4 = vector.load %arg2[%c0_3, %c0_4] : memref<1x64xf32, #tpu.memory_space<vmem>>, vector<1x64xf32>
    %5 = vector.broadcast %4 : vector<1x64xf32> to vector<8x64xf32>
    %6 = arith.addf %3, %5 : vector<8x64xf32>
    %c0_5 = arith.constant 0 : index
    %c0_6 = arith.constant 0 : index
    %7 = vector.load %arg3[%c0_5, %c0_6] : memref<8x64xf32, #tpu.memory_space<vmem>>, vector<8x64xf32>
    tpu.vector_store %arg3[%c0_5, %c0_6], %6 {strides = array<i32>} : memref<8x64xf32, #tpu.memory_space<vmem>>, vector<8x64xf32>,
    return
  }
}

module attributes {stable_mosaic.version = 11 : i64} {
  func.func @_fused_linear_kernel(%arg0: memref<10x512xf32, #tpu.memory_space<vmem>>, %arg1: memref<512x64xf32, #tpu.memory_space<vmem>>, %arg2: memref<1x64xf32, #tpu.memory_space<vmem>>, %arg3: memref<10x64xf32, #tpu.memory_space<vmem>>) attributes {dimension_semantics = [], scalar_prefetch = 0 : i64, scratch_operands = 0 : i64, tpu.core_type = #tpu.core_type<tc>} {
    %c0 = arith.constant 0 : index
    %c0_0 = arith.constant 0 : index
    %0 = vector.load %arg0[%c0, %c0_0] : memref<10x512xf32, #tpu.memory_space<vmem>>, vector<10x512xf32>
    %c0_1 = arith.constant 0 : index
    %c0_2 = arith.constant 0 : index
    %1 = vector.load %arg1[%c0_1, %c0_2] : memref<512x64xf32, #tpu.memory_space<vmem>>, vector<512x64xf32>
    %cst = arith.constant dense<0.000000e+00> : vector<10x64xf32>
    %2 = tpu.matmul %0, %1, %cst {dimension_numbers = #tpu.dot_dimension_numbers<[1], [0], [0], [1], [0, 0, 1, 1], [], []>} : vector<10x512xf32>, vector<512x64xf32>, vector<10x64xf32> -> vector<10x64xf32>
    %c0_3 = arith.constant 0 : index
    %c0_4 = arith.constant 0 : index
    %3 = vector.load %arg2[%c0_3, %c0_4] : memref<1x64xf32, #tpu.memory_space<vmem>>, vector<1x64xf32>
    %4 = vector.broadcast %3 : vector<1x64xf32> to vector<10x64xf32>
    %5 = arith.addf %2, %4 : vector<10x64xf32>
    %c0_5 = arith.constant 0 : index
    %c0_6 = arith.constant 0 : index
    %6 = vector.load %arg3[%c0_5, %c0_6] : memref<10x64xf32, #tpu.memory_space<vmem>>, vector<10x64xf32>
    tpu.vector_store %arg3[%c0_5, %c0_6], %5 {strides = array<i32>} : memref<10x64xf32, #tpu.memory_space<vmem>>, vector<10x64xf32>,
    return
  }
}

module attributes {stable_mosaic.version = 11 : i64} {
  func.func @_fused_linear_kernel(%arg0: memref<8x64xf32, #tpu.memory_space<vmem>>, %arg1: memref<64x128xf32, #tpu.memory_space<vmem>>, %arg2: memref<1x128xf32, #tpu.memory_space<vmem>>, %arg3: memref<8x128xf32, #tpu.memory_space<vmem>>) attributes {dimension_semantics = [], scalar_prefetch = 0 : i64, scratch_operands = 0 : i64, tpu.core_type = #tpu.core_type<tc>} {
    %c0 = arith.constant 0 : index
    %c0_0 = arith.constant 0 : index
    %0 = vector.load %arg0[%c0, %c0_0] : memref<8x64xf32, #tpu.memory_space<vmem>>, vector<8x64xf32>
    %c0_1 = arith.constant 0 : index
    %c0_2 = arith.constant 0 : index
    %1 = vector.load %arg1[%c0_1, %c0_2] : memref<64x128xf32, #tpu.memory_space<vmem>>, vector<64x128xf32>
    %cst = arith.constant dense<0.000000e+00> : vector<8x128xf32>
    %2 = tpu.matmul %0, %1, %cst {dimension_numbers = #tpu.dot_dimension_numbers<[1], [0], [0], [1], [0, 0, 1, 1], [], []>} : vector<8x64xf32>, vector<64x128xf32>, vector<8x128xf32> -> vector<8x128xf32>
    %c0_3 = arith.constant 0 : index
    %c0_4 = arith.constant 0 : index
    %3 = vector.load %arg2[%c0_3, %c0_4] : memref<1x128xf32, #tpu.memory_space<vmem>>, vector<1x128xf32>
    %4 = vector.broadcast %3 : vector<1x128xf32> to vector<8x128xf32>
    %5 = arith.addf %2, %4 : vector<8x128xf32>
    %c0_5 = arith.constant 0 : index
    %c0_6 = arith.constant 0 : index
    %6 = vector.load %arg3[%c0_5, %c0_6] : memref<8x128xf32, #tpu.memory_space<vmem>>, vector<8x128xf32>
    tpu.vector_store %arg3[%c0_5, %c0_6], %5 {strides = array<i32>} : memref<8x128xf32, #tpu.memory_space<vmem>>, vector<8x128xf32>,
    return
  }
}

module attributes {stable_mosaic.version = 11 : i64} {
  func.func @_fused_linear_kernel(%arg0: memref<10x64xf32, #tpu.memory_space<vmem>>, %arg1: memref<64x64xf32, #tpu.memory_space<vmem>>, %arg2: memref<1x64xf32, #tpu.memory_space<vmem>>, %arg3: memref<10x64xf32, #tpu.memory_space<vmem>>) attributes {dimension_semantics = [], scalar_prefetch = 0 : i64, scratch_operands = 0 : i64, tpu.core_type = #tpu.core_type<tc>} {
    %c0 = arith.constant 0 : index
    %c0_0 = arith.constant 0 : index
    %0 = vector.load %arg0[%c0, %c0_0] : memref<10x64xf32, #tpu.memory_space<vmem>>, vector<10x64xf32>
    %c0_1 = arith.constant 0 : index
    %c0_2 = arith.constant 0 : index
    %1 = vector.load %arg1[%c0_1, %c0_2] : memref<64x64xf32, #tpu.memory_space<vmem>>, vector<64x64xf32>
    %cst = arith.constant dense<0.000000e+00> : vector<10x64xf32>
    %2 = tpu.matmul %0, %1, %cst {dimension_numbers = #tpu.dot_dimension_numbers<[1], [0], [0], [1], [0, 0, 1, 1], [], []>} : vector<10x64xf32>, vector<64x64xf32>, vector<10x64xf32> -> vector<10x64xf32>
    %c0_3 = arith.constant 0 : index
    %c0_4 = arith.constant 0 : index
    %3 = vector.load %arg2[%c0_3, %c0_4] : memref<1x64xf32, #tpu.memory_space<vmem>>, vector<1x64xf32>
    %4 = vector.broadcast %3 : vector<1x64xf32> to vector<10x64xf32>
    %5 = arith.addf %2, %4 : vector<10x64xf32>
    %c0_5 = arith.constant 0 : index
    %c0_6 = arith.constant 0 : index
    %6 = vector.load %arg3[%c0_5, %c0_6] : memref<10x64xf32, #tpu.memory_space<vmem>>, vector<10x64xf32>
    tpu.vector_store %arg3[%c0_5, %c0_6], %5 {strides = array<i32>} : memref<10x64xf32, #tpu.memory_space<vmem>>, vector<10x64xf32>,
    return
  }
}

module attributes {stable_mosaic.version = 11 : i64} {
  func.func @_mha_kernel(%arg0: memref<8x8x128xf32, #tpu.memory_space<vmem>>, %arg1: memref<8x8x128xf32, #tpu.memory_space<vmem>>, %arg2: memref<8x8x128xf32, #tpu.memory_space<vmem>>, %arg3: memref<8x8x128xf32, #tpu.memory_space<vmem>>) attributes {dimension_semantics = [], scalar_prefetch = 0 : i64, scratch_operands = 0 : i64, tpu.core_type = #tpu.core_type<tc>} {
    %c0 = arith.constant 0 : index
    %c0_0 = arith.constant 0 : index
    %c0_1 = arith.constant 0 : index
    %0 = vector.load %arg0[%c0, %c0_0, %c0_1] : memref<8x8x128xf32, #tpu.memory_space<vmem>>, vector<8x8x128xf32>
    %cst = arith.constant 2.500000e-01 : f32
    %1 = vector.broadcast %cst : f32 to vector<8x8x128xf32>
    %2 = arith.mulf %0, %1 : vector<8x8x128xf32>
    %c0_2 = arith.constant 0 : index
    %c0_3 = arith.constant 0 : index
    %c0_4 = arith.constant 0 : index
    %3 = vector.load %arg1[%c0_2, %c0_3, %c0_4] : memref<8x8x128xf32, #tpu.memory_space<vmem>>, vector<8x8x128xf32>
    "tpu.trace_start"() <{level = 10 : i32, message = "bqd,bkd->bqk"}> : () -> ()
    %cst_5 = arith.constant dense<0.000000e+00> : vector<8x8x8xf32>
    %4 = tpu.matmul %2, %3, %cst_5 {dimension_numbers = #tpu.dot_dimension_numbers<[2], [2], [1], [1], [0, 0, 0, 1, 1, 1], [0], [0]>} : vector<8x8x128xf32>, vector<8x8x128xf32>, vector<8x8x8xf32> -> vector<8x8x8xf32>
    "tpu.trace_stop"() : () -> ()
    %5 = tpu.iota {dimensions = array<i32: 2>} : vector<8x8x8xi32>
    %c4_i32 = arith.constant 4 : i32
    %6 = vector.broadcast %c4_i32 : i32 to vector<8x8x8xi32>
    %7 = arith.cmpi slt, %5, %6 : vector<8x8x8xi32>
    %cst_6 = arith.constant -1.000000e+30 : f32
    %8 = vector.broadcast %cst_6 : f32 to vector<8x8x8xf32>
    %9 = arith.select %7, %4, %8 : vector<8x8x8xi1>, vector<8x8x8xf32>
    %cst_7 = arith.constant dense<0xFF800000> : vector<8x8xf32>
    %10 = vector.multi_reduction <maximumf>, %9, %cst_7 [2] : vector<8x8x8xf32> to vector<8x8xf32>
    %11 = vector.shape_cast %10 : vector<8x8xf32> to vector<8x8x1xf32>
    %12 = vector.broadcast %11 : vector<8x8x1xf32> to vector<8x8x8xf32>
    %13 = arith.subf %9, %12 : vector<8x8x8xf32>
    %14 = math.exp %13 : vector<8x8x8xf32>
    %cst_8 = arith.constant dense<0.000000e+00> : vector<8x8xf32>
    %15 = vector.multi_reduction <add>, %14, %cst_8 [2] : vector<8x8x8xf32> to vector<8x8xf32>
    %16 = vector.shape_cast %15 : vector<8x8xf32> to vector<8x8x1xf32>
    %17 = vector.broadcast %16 : vector<8x8x1xf32> to vector<8x8x8xf32>
    %18 = arith.divf %14, %17 : vector<8x8x8xf32>
    %c0_9 = arith.constant 0 : index
    %c0_10 = arith.constant 0 : index
    %c0_11 = arith.constant 0 : index
    %19 = vector.load %arg2[%c0_9, %c0_10, %c0_11] : memref<8x8x128xf32, #tpu.memory_space<vmem>>, vector<8x8x128xf32>
    "tpu.trace_start"() <{level = 10 : i32, message = "bqk,bkd->bqd"}> : () -> ()
    %cst_12 = arith.constant dense<0.000000e+00> : vector<8x8x128xf32>
    %20 = tpu.matmul %18, %19, %cst_12 {dimension_numbers = #tpu.dot_dimension_numbers<[2], [1], [1], [2], [0, 0, 0, 1, 1, 2], [0], [0]>} : vector<8x8x8xf32>, vector<8x8x128xf32>, vector<8x8x128xf32> -> vector<8x8x128xf32>
    "tpu.trace_stop"() : () -> ()
    %c0_13 = arith.constant 0 : index
    %c0_14 = arith.constant 0 : index
    %c0_15 = arith.constant 0 : index
    %21 = vector.load %arg3[%c0_13, %c0_14, %c0_15] : memref<8x8x128xf32, #tpu.memory_space<vmem>>, vector<8x8x128xf32>
    tpu.vector_store %arg3[%c0_13, %c0_14, %c0_15], %20 {strides = array<i32>} : memref<8x8x128xf32, #tpu.memory_space<vmem>>, vector<8x8x128xf32>,
    return
  }
}

module attributes {stable_mosaic.version = 11 : i64} {
  func.func @_fused_linear_kernel(%arg0: memref<8x64xf32, #tpu.memory_space<vmem>>, %arg1: memref<64x64xf32, #tpu.memory_space<vmem>>, %arg2: memref<1x64xf32, #tpu.memory_space<vmem>>, %arg3: memref<8x64xf32, #tpu.memory_space<vmem>>, %arg4: memref<8x64xf32, #tpu.memory_space<vmem>>) attributes {dimension_semantics = [], scalar_prefetch = 0 : i64, scratch_operands = 0 : i64, tpu.core_type = #tpu.core_type<tc>} {
    %c0 = arith.constant 0 : index
    %c0_0 = arith.constant 0 : index
    %0 = vector.load %arg0[%c0, %c0_0] : memref<8x64xf32, #tpu.memory_space<vmem>>, vector<8x64xf32>
    %c0_1 = arith.constant 0 : index
    %c0_2 = arith.constant 0 : index
    %1 = vector.load %arg1[%c0_1, %c0_2] : memref<64x64xf32, #tpu.memory_space<vmem>>, vector<64x64xf32>
    %cst = arith.constant dense<0.000000e+00> : vector<8x64xf32>
    %2 = tpu.matmul %0, %1, %cst {dimension_numbers = #tpu.dot_dimension_numbers<[1], [0], [0], [1], [0, 0, 1, 1], [], []>} : vector<8x64xf32>, vector<64x64xf32>, vector<8x64xf32> -> vector<8x64xf32>
    %c0_3 = arith.constant 0 : index
    %c0_4 = arith.constant 0 : index
    %3 = vector.load %arg2[%c0_3, %c0_4] : memref<1x64xf32, #tpu.memory_space<vmem>>, vector<1x64xf32>
    %4 = vector.broadcast %3 : vector<1x64xf32> to vector<8x64xf32>
    %5 = arith.addf %2, %4 : vector<8x64xf32>
    %c0_5 = arith.constant 0 : index
    %c0_6 = arith.constant 0 : index
    %6 = vector.load %arg3[%c0_5, %c0_6] : memref<8x64xf32, #tpu.memory_space<vmem>>, vector<8x64xf32>
    %7 = arith.mulf %5, %6 : vector<8x64xf32>
    %c0_7 = arith.constant 0 : index
    %c0_8 = arith.constant 0 : index
    %8 = vector.load %arg4[%c0_7, %c0_8] : memref<8x64xf32, #tpu.memory_space<vmem>>, vector<8x64xf32>
    tpu.vector_store %arg4[%c0_7, %c0_8], %7 {strides = array<i32>} : memref<8x64xf32, #tpu.memory_space<vmem>>, vector<8x64xf32>,
    return
  }
}

module attributes {stable_mosaic.version = 11 : i64} {
  func.func @_lstm_stack_kernel(%arg0: memref<4x2x64xf32, #tpu.memory_space<vmem>>, %arg1: memref<64x256xf32, #tpu.memory_space<vmem>>, %arg2: memref<64x256xf32, #tpu.memory_space<vmem>>, %arg3: memref<1x256xf32, #tpu.memory_space<vmem>>, %arg4: memref<64x256xf32, #tpu.memory_space<vmem>>, %arg5: memref<64x256xf32, #tpu.memory_space<vmem>>, %arg6: memref<1x256xf32, #tpu.memory_space<vmem>>, %arg7: memref<2x64xf32, #tpu.memory_space<vmem>>) attributes {dimension_semantics = [], scalar_prefetch = 0 : i64, scratch_operands = 0 : i64, tpu.core_type = #tpu.core_type<tc>} {
    %cst = arith.constant 0.000000e+00 : f32
    %0 = vector.broadcast %cst : f32 to vector<2x64xf32>
    %c0_i32 = arith.constant 0 : i32
    %1 = arith.index_cast %c0_i32 : i32 to index
    %c0 = arith.constant 0 : index
    %c0_0 = arith.constant 0 : index
    %2 = vector.load %arg0[%1, %c0, %c0_0] : memref<4x2x64xf32, #tpu.memory_space<vmem>>, vector<1x2x64xf32>
    %3 = vector.shape_cast %2 : vector<1x2x64xf32> to vector<2x64xf32>
    %c0_1 = arith.constant 0 : index
    %c0_2 = arith.constant 0 : index
    %4 = vector.load %arg1[%c0_1, %c0_2] : memref<64x256xf32, #tpu.memory_space<vmem>>, vector<64x256xf32>
    %cst_3 = arith.constant dense<0.000000e+00> : vector<2x256xf32>
    %5 = tpu.matmul %3, %4, %cst_3 {dimension_numbers = #tpu.dot_dimension_numbers<[1], [0], [0], [1], [0, 0, 1, 1], [], []>} : vector<2x64xf32>, vector<64x256xf32>, vector<2x256xf32> -> vector<2x256xf32>
    %c0_4 = arith.constant 0 : index
    %c0_5 = arith.constant 0 : index
    %6 = vector.load %arg2[%c0_4, %c0_5] : memref<64x256xf32, #tpu.memory_space<vmem>>, vector<64x256xf32>
    %cst_6 = arith.constant dense<0.000000e+00> : vector<2x256xf32>
    %7 = tpu.matmul %0, %6, %cst_6 {dimension_numbers = #tpu.dot_dimension_numbers<[1], [0], [0], [1], [0, 0, 1, 1], [], []>} : vector<2x64xf32>, vector<64x256xf32>, vector<2x256xf32> -> vector<2x256xf32>
    %8 = arith.addf %5, %7 : vector<2x256xf32>
    %c0_7 = arith.constant 0 : index
    %c0_8 = arith.constant 0 : index
    %9 = vector.load %arg3[%c0_7, %c0_8] : memref<1x256xf32, #tpu.memory_space<vmem>>, vector<1x256xf32>
    %10 = vector.broadcast %9 : vector<1x256xf32> to vector<2x256xf32>
    %11 = arith.addf %8, %10 : vector<2x256xf32>
    %12 = vector.extract_strided_slice %11 {offsets = [0, 0], sizes = [2, 64], strides = [1, 1]} : vector<2x256xf32> to vector<2x64xf32>
    %13 = arith.negf %12 : vector<2x64xf32>
    %14 = math.exp %13 : vector<2x64xf32>
    %cst_9 = arith.constant 1.000000e+00 : f32
    %15 = vector.broadcast %cst_9 : f32 to vector<2x64xf32>
    %16 = arith.addf %15, %14 : vector<2x64xf32>
    %17 = arith.divf %15, %16 : vector<2x64xf32>
    %18 = vector.extract_strided_slice %11 {offsets = [0, 64], sizes = [2, 64], strides = [1, 1]} : vector<2x256xf32> to vector<2x64xf32>
    %19 = arith.negf %18 : vector<2x64xf32>
    %20 = math.exp %19 : vector<2x64xf32>
    %cst_10 = arith.constant 1.000000e+00 : f32
    %21 = vector.broadcast %cst_10 : f32 to vector<2x64xf32>
    %22 = arith.addf %21, %20 : vector<2x64xf32>
    %23 = arith.divf %21, %22 : vector<2x64xf32>
    %24 = vector.extract_strided_slice %11 {offsets = [0, 128], sizes = [2, 64], strides = [1, 1]} : vector<2x256xf32> to vector<2x64xf32>
    %25 = math.tanh %24 : vector<2x64xf32>
    %26 = vector.extract_strided_slice %11 {offsets = [0, 192], sizes = [2, 64], strides = [1, 1]} : vector<2x256xf32> to vector<2x64xf32>
    %27 = arith.negf %26 : vector<2x64xf32>
    %28 = math.exp %27 : vector<2x64xf32>
    %cst_11 = arith.constant 1.000000e+00 : f32
    %29 = vector.broadcast %cst_11 : f32 to vector<2x64xf32>
    %30 = arith.addf %29, %28 : vector<2x64xf32>
    %31 = arith.divf %29, %30 : vector<2x64xf32>
    %32 = arith.mulf %23, %0 : vector<2x64xf32>
    %33 = arith.mulf %17, %25 : vector<2x64xf32>
    %34 = arith.addf %32, %33 : vector<2x64xf32>
    %35 = math.tanh %34 : vector<2x64xf32>
    %36 = arith.mulf %31, %35 : vector<2x64xf32>
    %c0_12 = arith.constant 0 : index
    %c0_13 = arith.constant 0 : index
    %37 = vector.load %arg4[%c0_12, %c0_13] : memref<64x256xf32, #tpu.memory_space<vmem>>, vector<64x256xf32>
    %cst_14 = arith.constant dense<0.000000e+00> : vector<2x256xf32>
    %38 = tpu.matmul %36, %37, %cst_14 {dimension_numbers = #tpu.dot_dimension_numbers<[1], [0], [0], [1], [0, 0, 1, 1], [], []>} : vector<2x64xf32>, vector<64x256xf32>, vector<2x256xf32> -> vector<2x256xf32>
    %c0_15 = arith.constant 0 : index
    %c0_16 = arith.constant 0 : index
    %39 = vector.load %arg5[%c0_15, %c0_16] : memref<64x256xf32, #tpu.memory_space<vmem>>, vector<64x256xf32>
    %cst_17 = arith.constant dense<0.000000e+00> : vector<2x256xf32>
    %40 = tpu.matmul %0, %39, %cst_17 {dimension_numbers = #tpu.dot_dimension_numbers<[1], [0], [0], [1], [0, 0, 1, 1], [], []>} : vector<2x64xf32>, vector<64x256xf32>, vector<2x256xf32> -> vector<2x256xf32>
    %41 = arith.addf %38, %40 : vector<2x256xf32>
    %c0_18 = arith.constant 0 : index
    %c0_19 = arith.constant 0 : index
    %42 = vector.load %arg6[%c0_18, %c0_19] : memref<1x256xf32, #tpu.memory_space<vmem>>, vector<1x256xf32>
    %43 = vector.broadcast %42 : vector<1x256xf32> to vector<2x256xf32>
    %44 = arith.addf %41, %43 : vector<2x256xf32>
    %45 = vector.extract_strided_slice %44 {offsets = [0, 0], sizes = [2, 64], strides = [1, 1]} : vector<2x256xf32> to vector<2x64xf32>
    %46 = arith.negf %45 : vector<2x64xf32>
    %47 = math.exp %46 : vector<2x64xf32>
    %cst_20 = arith.constant 1.000000e+00 : f32
    %48 = vector.broadcast %cst_20 : f32 to vector<2x64xf32>
    %49 = arith.addf %48, %47 : vector<2x64xf32>
    %50 = arith.divf %48, %49 : vector<2x64xf32>
    %51 = vector.extract_strided_slice %44 {offsets = [0, 64], sizes = [2, 64], strides = [1, 1]} : vector<2x256xf32> to vector<2x64xf32>
    %52 = arith.negf %51 : vector<2x64xf32>
    %53 = math.exp %52 : vector<2x64xf32>
    %cst_21 = arith.constant 1.000000e+00 : f32
    %54 = vector.broadcast %cst_21 : f32 to vector<2x64xf32>
    %55 = arith.addf %54, %53 : vector<2x64xf32>
    %56 = arith.divf %54, %55 : vector<2x64xf32>
    %57 = vector.extract_strided_slice %44 {offsets = [0, 128], sizes = [2, 64], strides = [1, 1]} : vector<2x256xf32> to vector<2x64xf32>
    %58 = math.tanh %57 : vector<2x64xf32>
    %59 = vector.extract_strided_slice %44 {offsets = [0, 192], sizes = [2, 64], strides = [1, 1]} : vector<2x256xf32> to vector<2x64xf32>
    %60 = arith.negf %59 : vector<2x64xf32>
    %61 = math.exp %60 : vector<2x64xf32>
    %cst_22 = arith.constant 1.000000e+00 : f32
    %62 = vector.broadcast %cst_22 : f32 to vector<2x64xf32>
    %63 = arith.addf %62, %61 : vector<2x64xf32>
    %64 = arith.divf %62, %63 : vector<2x64xf32>
    %65 = arith.mulf %56, %0 : vector<2x64xf32>
    %66 = arith.mulf %50, %58 : vector<2x64xf32>
    %67 = arith.addf %65, %66 : vector<2x64xf32>
    %68 = math.tanh %67 : vector<2x64xf32>
    %69 = arith.mulf %64, %68 : vector<2x64xf32>
    %c1_i32 = arith.constant 1 : i32
    %70 = arith.index_cast %c1_i32 : i32 to index
    %c0_23 = arith.constant 0 : index
    %c0_24 = arith.constant 0 : index
    %71 = vector.load %arg0[%70, %c0_23, %c0_24] : memref<4x2x64xf32, #tpu.memory_space<vmem>>, vector<1x2x64xf32>
    %72 = vector.shape_cast %71 : vector<1x2x64xf32> to vector<2x64xf32>
    %c0_25 = arith.constant 0 : index
    %c0_26 = arith.constant 0 : index
    %73 = vector.load %arg1[%c0_25, %c0_26] : memref<64x256xf32, #tpu.memory_space<vmem>>, vector<64x256xf32>
    %cst_27 = arith.constant dense<0.000000e+00> : vector<2x256xf32>
    %74 = tpu.matmul %72, %73, %cst_27 {dimension_numbers = #tpu.dot_dimension_numbers<[1], [0], [0], [1], [0, 0, 1, 1], [], []>} : vector<2x64xf32>, vector<64x256xf32>, vector<2x256xf32> -> vector<2x256xf32>
    %c0_28 = arith.constant 0 : index
    %c0_29 = arith.constant 0 : index
    %75 = vector.load %arg2[%c0_28, %c0_29] : memref<64x256xf32, #tpu.memory_space<vmem>>, vector<64x256xf32>
    %cst_30 = arith.constant dense<0.000000e+00> : vector<2x256xf32>
    %76 = tpu.matmul %36, %75, %cst_30 {dimension_numbers = #tpu.dot_dimension_numbers<[1], [0], [0], [1], [0, 0, 1, 1], [], []>} : vector<2x64xf32>, vector<64x256xf32>, vector<2x256xf32> -> vector<2x256xf32>
    %77 = arith.addf %74, %76 : vector<2x256xf32>
    %c0_31 = arith.constant 0 : index
    %c0_32 = arith.constant 0 : index
    %78 = vector.load %arg3[%c0_31, %c0_32] : memref<1x256xf32, #tpu.memory_space<vmem>>, vector<1x256xf32>
    %79 = vector.broadcast %78 : vector<1x256xf32> to vector<2x256xf32>
    %80 = arith.addf %77, %79 : vector<2x256xf32>
    %81 = vector.extract_strided_slice %80 {offsets = [0, 0], sizes = [2, 64], strides = [1, 1]} : vector<2x256xf32> to vector<2x64xf32>
    %82 = arith.negf %81 : vector<2x64xf32>
    %83 = math.exp %82 : vector<2x64xf32>
    %cst_33 = arith.constant 1.000000e+00 : f32
    %84 = vector.broadcast %cst_33 : f32 to vector<2x64xf32>
    %85 = arith.addf %84, %83 : vector<2x64xf32>
    %86 = arith.divf %84, %85 : vector<2x64xf32>
    %87 = vector.extract_strided_slice %80 {offsets = [0, 64], sizes = [2, 64], strides = [1, 1]} : vector<2x256xf32> to vector<2x64xf32>
    %88 = arith.negf %87 : vector<2x64xf32>
    %89 = math.exp %88 : vector<2x64xf32>
    %cst_34 = arith.constant 1.000000e+00 : f32
    %90 = vector.broadcast %cst_34 : f32 to vector<2x64xf32>
    %91 = arith.addf %90, %89 : vector<2x64xf32>
    %92 = arith.divf %90, %91 : vector<2x64xf32>
    %93 = vector.extract_strided_slice %80 {offsets = [0, 128], sizes = [2, 64], strides = [1, 1]} : vector<2x256xf32> to vector<2x64xf32>
    %94 = math.tanh %93 : vector<2x64xf32>
    %95 = vector.extract_strided_slice %80 {offsets = [0, 192], sizes = [2, 64], strides = [1, 1]} : vector<2x256xf32> to vector<2x64xf32>
    %96 = arith.negf %95 : vector<2x64xf32>
    %97 = math.exp %96 : vector<2x64xf32>
    %cst_35 = arith.constant 1.000000e+00 : f32
    %98 = vector.broadcast %cst_35 : f32 to vector<2x64xf32>
    %99 = arith.addf %98, %97 : vector<2x64xf32>
    %100 = arith.divf %98, %99 : vector<2x64xf32>
    %101 = arith.mulf %92, %34 : vector<2x64xf32>
    %102 = arith.mulf %86, %94 : vector<2x64xf32>
    %103 = arith.addf %101, %102 : vector<2x64xf32>
    %104 = math.tanh %103 : vector<2x64xf32>
    %105 = arith.mulf %100, %104 : vector<2x64xf32>
    %c0_36 = arith.constant 0 : index
    %c0_37 = arith.constant 0 : index
    %106 = vector.load %arg4[%c0_36, %c0_37] : memref<64x256xf32, #tpu.memory_space<vmem>>, vector<64x256xf32>
    %cst_38 = arith.constant dense<0.000000e+00> : vector<2x256xf32>
    %107 = tpu.matmul %105, %106, %cst_38 {dimension_numbers = #tpu.dot_dimension_numbers<[1], [0], [0], [1], [0, 0, 1, 1], [], []>} : vector<2x64xf32>, vector<64x256xf32>, vector<2x256xf32> -> vector<2x256xf32>
    %c0_39 = arith.constant 0 : index
    %c0_40 = arith.constant 0 : index
    %108 = vector.load %arg5[%c0_39, %c0_40] : memref<64x256xf32, #tpu.memory_space<vmem>>, vector<64x256xf32>
    %cst_41 = arith.constant dense<0.000000e+00> : vector<2x256xf32>
    %109 = tpu.matmul %69, %108, %cst_41 {dimension_numbers = #tpu.dot_dimension_numbers<[1], [0], [0], [1], [0, 0, 1, 1], [], []>} : vector<2x64xf32>, vector<64x256xf32>, vector<2x256xf32> -> vector<2x256xf32>
    %110 = arith.addf %107, %109 : vector<2x256xf32>
    %c0_42 = arith.constant 0 : index
    %c0_43 = arith.constant 0 : index
    %111 = vector.load %arg6[%c0_42, %c0_43] : memref<1x256xf32, #tpu.memory_space<vmem>>, vector<1x256xf32>
    %112 = vector.broadcast %111 : vector<1x256xf32> to vector<2x256xf32>
    %113 = arith.addf %110, %112 : vector<2x256xf32>
    %114 = vector.extract_strided_slice %113 {offsets = [0, 0], sizes = [2, 64], strides = [1, 1]} : vector<2x256xf32> to vector<2x64xf32>
    %115 = arith.negf %114 : vector<2x64xf32>
    %116 = math.exp %115 : vector<2x64xf32>
    %cst_44 = arith.constant 1.000000e+00 : f32
    %117 = vector.broadcast %cst_44 : f32 to vector<2x64xf32>
    %118 = arith.addf %117, %116 : vector<2x64xf32>
    %119 = arith.divf %117, %118 : vector<2x64xf32>
    %120 = vector.extract_strided_slice %113 {offsets = [0, 64], sizes = [2, 64], strides = [1, 1]} : vector<2x256xf32> to vector<2x64xf32>
    %121 = arith.negf %120 : vector<2x64xf32>
    %122 = math.exp %121 : vector<2x64xf32>
    %cst_45 = arith.constant 1.000000e+00 : f32
    %123 = vector.broadcast %cst_45 : f32 to vector<2x64xf32>
    %124 = arith.addf %123, %122 : vector<2x64xf32>
    %125 = arith.divf %123, %124 : vector<2x64xf32>
    %126 = vector.extract_strided_slice %113 {offsets = [0, 128], sizes = [2, 64], strides = [1, 1]} : vector<2x256xf32> to vector<2x64xf32>
    %127 = math.tanh %126 : vector<2x64xf32>
    %128 = vector.extract_strided_slice %113 {offsets = [0, 192], sizes = [2, 64], strides = [1, 1]} : vector<2x256xf32> to vector<2x64xf32>
    %129 = arith.negf %128 : vector<2x64xf32>
    %130 = math.exp %129 : vector<2x64xf32>
    %cst_46 = arith.constant 1.000000e+00 : f32
    %131 = vector.broadcast %cst_46 : f32 to vector<2x64xf32>
    %132 = arith.addf %131, %130 : vector<2x64xf32>
    %133 = arith.divf %131, %132 : vector<2x64xf32>
    %134 = arith.mulf %125, %67 : vector<2x64xf32>
    %135 = arith.mulf %119, %127 : vector<2x64xf32>
    %136 = arith.addf %134, %135 : vector<2x64xf32>
    %137 = math.tanh %136 : vector<2x64xf32>
    %138 = arith.mulf %133, %137 : vector<2x64xf32>
    %c2_i32 = arith.constant 2 : i32
    %139 = arith.index_cast %c2_i32 : i32 to index
    %c0_47 = arith.constant 0 : index
    %c0_48 = arith.constant 0 : index
    %140 = vector.load %arg0[%139, %c0_47, %c0_48] : memref<4x2x64xf32, #tpu.memory_space<vmem>>, vector<1x2x64xf32>
    %141 = vector.shape_cast %140 : vector<1x2x64xf32> to vector<2x64xf32>
    %c0_49 = arith.constant 0 : index
    %c0_50 = arith.constant 0 : index
    %142 = vector.load %arg1[%c0_49, %c0_50] : memref<64x256xf32, #tpu.memory_space<vmem>>, vector<64x256xf32>
    %cst_51 = arith.constant dense<0.000000e+00> : vector<2x256xf32>
    %143 = tpu.matmul %141, %142, %cst_51 {dimension_numbers = #tpu.dot_dimension_numbers<[1], [0], [0], [1], [0, 0, 1, 1], [], []>} : vector<2x64xf32>, vector<64x256xf32>, vector<2x256xf32> -> vector<2x256xf32>
    %c0_52 = arith.constant 0 : index
    %c0_53 = arith.constant 0 : index
    %144 = vector.load %arg2[%c0_52, %c0_53] : memref<64x256xf32, #tpu.memory_space<vmem>>, vector<64x256xf32>
    %cst_54 = arith.constant dense<0.000000e+00> : vector<2x256xf32>
    %145 = tpu.matmul %105, %144, %cst_54 {dimension_numbers = #tpu.dot_dimension_numbers<[1], [0], [0], [1], [0, 0, 1, 1], [], []>} : vector<2x64xf32>, vector<64x256xf32>, vector<2x256xf32> -> vector<2x256xf32>
    %146 = arith.addf %143, %145 : vector<2x256xf32>
    %c0_55 = arith.constant 0 : index
    %c0_56 = arith.constant 0 : index
    %147 = vector.load %arg3[%c0_55, %c0_56] : memref<1x256xf32, #tpu.memory_space<vmem>>, vector<1x256xf32>
    %148 = vector.broadcast %147 : vector<1x256xf32> to vector<2x256xf32>
    %149 = arith.addf %146, %148 : vector<2x256xf32>
    %150 = vector.extract_strided_slice %149 {offsets = [0, 0], sizes = [2, 64], strides = [1, 1]} : vector<2x256xf32> to vector<2x64xf32>
    %151 = arith.negf %150 : vector<2x64xf32>
    %152 = math.exp %151 : vector<2x64xf32>
    %cst_57 = arith.constant 1.000000e+00 : f32
    %153 = vector.broadcast %cst_57 : f32 to vector<2x64xf32>
    %154 = arith.addf %153, %152 : vector<2x64xf32>
    %155 = arith.divf %153, %154 : vector<2x64xf32>
    %156 = vector.extract_strided_slice %149 {offsets = [0, 64], sizes = [2, 64], strides = [1, 1]} : vector<2x256xf32> to vector<2x64xf32>
    %157 = arith.negf %156 : vector<2x64xf32>
    %158 = math.exp %157 : vector<2x64xf32>
    %cst_58 = arith.constant 1.000000e+00 : f32
    %159 = vector.broadcast %cst_58 : f32 to vector<2x64xf32>
    %160 = arith.addf %159, %158 : vector<2x64xf32>
    %161 = arith.divf %159, %160 : vector<2x64xf32>
    %162 = vector.extract_strided_slice %149 {offsets = [0, 128], sizes = [2, 64], strides = [1, 1]} : vector<2x256xf32> to vector<2x64xf32>
    %163 = math.tanh %162 : vector<2x64xf32>
    %164 = vector.extract_strided_slice %149 {offsets = [0, 192], sizes = [2, 64], strides = [1, 1]} : vector<2x256xf32> to vector<2x64xf32>
    %165 = arith.negf %164 : vector<2x64xf32>
    %166 = math.exp %165 : vector<2x64xf32>
    %cst_59 = arith.constant 1.000000e+00 : f32
    %167 = vector.broadcast %cst_59 : f32 to vector<2x64xf32>
    %168 = arith.addf %167, %166 : vector<2x64xf32>
    %169 = arith.divf %167, %168 : vector<2x64xf32>
    %170 = arith.mulf %161, %103 : vector<2x64xf32>
    %171 = arith.mulf %155, %163 : vector<2x64xf32>
    %172 = arith.addf %170, %171 : vector<2x64xf32>
    %173 = math.tanh %172 : vector<2x64xf32>
    %174 = arith.mulf %169, %173 : vector<2x64xf32>
    %c0_60 = arith.constant 0 : index
    %c0_61 = arith.constant 0 : index
    %175 = vector.load %arg4[%c0_60, %c0_61] : memref<64x256xf32, #tpu.memory_space<vmem>>, vector<64x256xf32>
    %cst_62 = arith.constant dense<0.000000e+00> : vector<2x256xf32>
    %176 = tpu.matmul %174, %175, %cst_62 {dimension_numbers = #tpu.dot_dimension_numbers<[1], [0], [0], [1], [0, 0, 1, 1], [], []>} : vector<2x64xf32>, vector<64x256xf32>, vector<2x256xf32> -> vector<2x256xf32>
    %c0_63 = arith.constant 0 : index
    %c0_64 = arith.constant 0 : index
    %177 = vector.load %arg5[%c0_63, %c0_64] : memref<64x256xf32, #tpu.memory_space<vmem>>, vector<64x256xf32>
    %cst_65 = arith.constant dense<0.000000e+00> : vector<2x256xf32>
    %178 = tpu.matmul %138, %177, %cst_65 {dimension_numbers = #tpu.dot_dimension_numbers<[1], [0], [0], [1], [0, 0, 1, 1], [], []>} : vector<2x64xf32>, vector<64x256xf32>, vector<2x256xf32> -> vector<2x256xf32>
    %179 = arith.addf %176, %178 : vector<2x256xf32>
    %c0_66 = arith.constant 0 : index
    %c0_67 = arith.constant 0 : index
    %180 = vector.load %arg6[%c0_66, %c0_67] : memref<1x256xf32, #tpu.memory_space<vmem>>, vector<1x256xf32>
    %181 = vector.broadcast %180 : vector<1x256xf32> to vector<2x256xf32>
    %182 = arith.addf %179, %181 : vector<2x256xf32>
    %183 = vector.extract_strided_slice %182 {offsets = [0, 0], sizes = [2, 64], strides = [1, 1]} : vector<2x256xf32> to vector<2x64xf32>
    %184 = arith.negf %183 : vector<2x64xf32>
    %185 = math.exp %184 : vector<2x64xf32>
    %cst_68 = arith.constant 1.000000e+00 : f32
    %186 = vector.broadcast %cst_68 : f32 to vector<2x64xf32>
    %187 = arith.addf %186, %185 : vector<2x64xf32>
    %188 = arith.divf %186, %187 : vector<2x64xf32>
    %189 = vector.extract_strided_slice %182 {offsets = [0, 64], sizes = [2, 64], strides = [1, 1]} : vector<2x256xf32> to vector<2x64xf32>
    %190 = arith.negf %189 : vector<2x64xf32>
    %191 = math.exp %190 : vector<2x64xf32>
    %cst_69 = arith.constant 1.000000e+00 : f32
    %192 = vector.broadcast %cst_69 : f32 to vector<2x64xf32>
    %193 = arith.addf %192, %191 : vector<2x64xf32>
    %194 = arith.divf %192, %193 : vector<2x64xf32>
    %195 = vector.extract_strided_slice %182 {offsets = [0, 128], sizes = [2, 64], strides = [1, 1]} : vector<2x256xf32> to vector<2x64xf32>
    %196 = math.tanh %195 : vector<2x64xf32>
    %197 = vector.extract_strided_slice %182 {offsets = [0, 192], sizes = [2, 64], strides = [1, 1]} : vector<2x256xf32> to vector<2x64xf32>
    %198 = arith.negf %197 : vector<2x64xf32>
    %199 = math.exp %198 : vector<2x64xf32>
    %cst_70 = arith.constant 1.000000e+00 : f32
    %200 = vector.broadcast %cst_70 : f32 to vector<2x64xf32>
    %201 = arith.addf %200, %199 : vector<2x64xf32>
    %202 = arith.divf %200, %201 : vector<2x64xf32>
    %203 = arith.mulf %194, %136 : vector<2x64xf32>
    %204 = arith.mulf %188, %196 : vector<2x64xf32>
    %205 = arith.addf %203, %204 : vector<2x64xf32>
    %206 = math.tanh %205 : vector<2x64xf32>
    %207 = arith.mulf %202, %206 : vector<2x64xf32>
    %c3_i32 = arith.constant 3 : i32
    %208 = arith.index_cast %c3_i32 : i32 to index
    %c0_71 = arith.constant 0 : index
    %c0_72 = arith.constant 0 : index
    %209 = vector.load %arg0[%208, %c0_71, %c0_72] : memref<4x2x64xf32, #tpu.memory_space<vmem>>, vector<1x2x64xf32>
    %210 = vector.shape_cast %209 : vector<1x2x64xf32> to vector<2x64xf32>
    %c0_73 = arith.constant 0 : index
    %c0_74 = arith.constant 0 : index
    %211 = vector.load %arg1[%c0_73, %c0_74] : memref<64x256xf32, #tpu.memory_space<vmem>>, vector<64x256xf32>
    %cst_75 = arith.constant dense<0.000000e+00> : vector<2x256xf32>
    %212 = tpu.matmul %210, %211, %cst_75 {dimension_numbers = #tpu.dot_dimension_numbers<[1], [0], [0], [1], [0, 0, 1, 1], [], []>} : vector<2x64xf32>, vector<64x256xf32>, vector<2x256xf32> -> vector<2x256xf32>
    %c0_76 = arith.constant 0 : index
    %c0_77 = arith.constant 0 : index
    %213 = vector.load %arg2[%c0_76, %c0_77] : memref<64x256xf32, #tpu.memory_space<vmem>>, vector<64x256xf32>
    %cst_78 = arith.constant dense<0.000000e+00> : vector<2x256xf32>
    %214 = tpu.matmul %174, %213, %cst_78 {dimension_numbers = #tpu.dot_dimension_numbers<[1], [0], [0], [1], [0, 0, 1, 1], [], []>} : vector<2x64xf32>, vector<64x256xf32>, vector<2x256xf32> -> vector<2x256xf32>
    %215 = arith.addf %212, %214 : vector<2x256xf32>
    %c0_79 = arith.constant 0 : index
    %c0_80 = arith.constant 0 : index
    %216 = vector.load %arg3[%c0_79, %c0_80] : memref<1x256xf32, #tpu.memory_space<vmem>>, vector<1x256xf32>
    %217 = vector.broadcast %216 : vector<1x256xf32> to vector<2x256xf32>
    %218 = arith.addf %215, %217 : vector<2x256xf32>
    %219 = vector.extract_strided_slice %218 {offsets = [0, 0], sizes = [2, 64], strides = [1, 1]} : vector<2x256xf32> to vector<2x64xf32>
    %220 = arith.negf %219 : vector<2x64xf32>
    %221 = math.exp %220 : vector<2x64xf32>
    %cst_81 = arith.constant 1.000000e+00 : f32
    %222 = vector.broadcast %cst_81 : f32 to vector<2x64xf32>
    %223 = arith.addf %222, %221 : vector<2x64xf32>
    %224 = arith.divf %222, %223 : vector<2x64xf32>
    %225 = vector.extract_strided_slice %218 {offsets = [0, 64], sizes = [2, 64], strides = [1, 1]} : vector<2x256xf32> to vector<2x64xf32>
    %226 = arith.negf %225 : vector<2x64xf32>
    %227 = math.exp %226 : vector<2x64xf32>
    %cst_82 = arith.constant 1.000000e+00 : f32
    %228 = vector.broadcast %cst_82 : f32 to vector<2x64xf32>
    %229 = arith.addf %228, %227 : vector<2x64xf32>
    %230 = arith.divf %228, %229 : vector<2x64xf32>
    %231 = vector.extract_strided_slice %218 {offsets = [0, 128], sizes = [2, 64], strides = [1, 1]} : vector<2x256xf32> to vector<2x64xf32>
    %232 = math.tanh %231 : vector<2x64xf32>
    %233 = vector.extract_strided_slice %218 {offsets = [0, 192], sizes = [2, 64], strides = [1, 1]} : vector<2x256xf32> to vector<2x64xf32>
    %234 = arith.negf %233 : vector<2x64xf32>
    %235 = math.exp %234 : vector<2x64xf32>
    %cst_83 = arith.constant 1.000000e+00 : f32
    %236 = vector.broadcast %cst_83 : f32 to vector<2x64xf32>
    %237 = arith.addf %236, %235 : vector<2x64xf32>
    %238 = arith.divf %236, %237 : vector<2x64xf32>
    %239 = arith.mulf %230, %172 : vector<2x64xf32>
    %240 = arith.mulf %224, %232 : vector<2x64xf32>
    %241 = arith.addf %239, %240 : vector<2x64xf32>
    %242 = math.tanh %241 : vector<2x64xf32>
    %243 = arith.mulf %238, %242 : vector<2x64xf32>
    %c0_84 = arith.constant 0 : index
    %c0_85 = arith.constant 0 : index
    %244 = vector.load %arg4[%c0_84, %c0_85] : memref<64x256xf32, #tpu.memory_space<vmem>>, vector<64x256xf32>
    %cst_86 = arith.constant dense<0.000000e+00> : vector<2x256xf32>
    %245 = tpu.matmul %243, %244, %cst_86 {dimension_numbers = #tpu.dot_dimension_numbers<[1], [0], [0], [1], [0, 0, 1, 1], [], []>} : vector<2x64xf32>, vector<64x256xf32>, vector<2x256xf32> -> vector<2x256xf32>
    %c0_87 = arith.constant 0 : index
    %c0_88 = arith.constant 0 : index
    %246 = vector.load %arg5[%c0_87, %c0_88] : memref<64x256xf32, #tpu.memory_space<vmem>>, vector<64x256xf32>
    %cst_89 = arith.constant dense<0.000000e+00> : vector<2x256xf32>
    %247 = tpu.matmul %207, %246, %cst_89 {dimension_numbers = #tpu.dot_dimension_numbers<[1], [0], [0], [1], [0, 0, 1, 1], [], []>} : vector<2x64xf32>, vector<64x256xf32>, vector<2x256xf32> -> vector<2x256xf32>
    %248 = arith.addf %245, %247 : vector<2x256xf32>
    %c0_90 = arith.constant 0 : index
    %c0_91 = arith.constant 0 : index
    %249 = vector.load %arg6[%c0_90, %c0_91] : memref<1x256xf32, #tpu.memory_space<vmem>>, vector<1x256xf32>
    %250 = vector.broadcast %249 : vector<1x256xf32> to vector<2x256xf32>
    %251 = arith.addf %248, %250 : vector<2x256xf32>
    %252 = vector.extract_strided_slice %251 {offsets = [0, 0], sizes = [2, 64], strides = [1, 1]} : vector<2x256xf32> to vector<2x64xf32>
    %253 = arith.negf %252 : vector<2x64xf32>
    %254 = math.exp %253 : vector<2x64xf32>
    %cst_92 = arith.constant 1.000000e+00 : f32
    %255 = vector.broadcast %cst_92 : f32 to vector<2x64xf32>
    %256 = arith.addf %255, %254 : vector<2x64xf32>
    %257 = arith.divf %255, %256 : vector<2x64xf32>
    %258 = vector.extract_strided_slice %251 {offsets = [0, 64], sizes = [2, 64], strides = [1, 1]} : vector<2x256xf32> to vector<2x64xf32>
    %259 = arith.negf %258 : vector<2x64xf32>
    %260 = math.exp %259 : vector<2x64xf32>
    %cst_93 = arith.constant 1.000000e+00 : f32
    %261 = vector.broadcast %cst_93 : f32 to vector<2x64xf32>
    %262 = arith.addf %261, %260 : vector<2x64xf32>
    %263 = arith.divf %261, %262 : vector<2x64xf32>
    %264 = vector.extract_strided_slice %251 {offsets = [0, 128], sizes = [2, 64], strides = [1, 1]} : vector<2x256xf32> to vector<2x64xf32>
    %265 = math.tanh %264 : vector<2x64xf32>
    %266 = vector.extract_strided_slice %251 {offsets = [0, 192], sizes = [2, 64], strides = [1, 1]} : vector<2x256xf32> to vector<2x64xf32>
    %267 = arith.negf %266 : vector<2x64xf32>
    %268 = math.exp %267 : vector<2x64xf32>
    %cst_94 = arith.constant 1.000000e+00 : f32
    %269 = vector.broadcast %cst_94 : f32 to vector<2x64xf32>
    %270 = arith.addf %269, %268 : vector<2x64xf32>
    %271 = arith.divf %269, %270 : vector<2x64xf32>
    %272 = arith.mulf %263, %205 : vector<2x64xf32>
    %273 = arith.mulf %257, %265 : vector<2x64xf32>
    %274 = arith.addf %272, %273 : vector<2x64xf32>
    %275 = math.tanh %274 : vector<2x64xf32>
    %276 = arith.mulf %271, %275 : vector<2x64xf32>
    %c4_i32 = arith.constant 4 : i32
    %c0_95 = arith.constant 0 : index
    %c0_96 = arith.constant 0 : index
    %277 = vector.load %arg7[%c0_95, %c0_96] : memref<2x64xf32, #tpu.memory_space<vmem>>, vector<2x64xf32>
    tpu.vector_store %arg7[%c0_95, %c0_96], %276 {strides = array<i32>} : memref<2x64xf32, #tpu.memory_space<vmem>>, vector<2x64xf32>,
    return
  }
}

module attributes {stable_mosaic.version = 11 : i64} {
  func.func @_dense_kernel(%arg0: i32, %arg1: i32, %arg2: memref<8x64xbf16, #tpu.memory_space<vmem>>, %arg3: memref<64x512xbf16, #tpu.memory_space<vmem>>, %arg4: memref<1x512xf32, #tpu.memory_space<vmem>>, %arg5: memref<1x512x512xbf16, #tpu.memory_space<vmem>>, %arg6: memref<1x512xf32, #tpu.memory_space<vmem>>, %arg7: memref<8x512xf32, #tpu.memory_space<vmem>>, %arg8: memref<8x512xf32, #tpu.memory_space<vmem>>) attributes {dimension_semantics = [#tpu.dimension_semantics<parallel>, #tpu.dimension_semantics<arbitrary>], iteration_bounds = array<i64: 4, 4>, scalar_prefetch = 0 : i64, scratch_operands = 1 : i64, tpu.core_type = #tpu.core_type<tc>, window_params = [{pipeline_mode = #tpu.pipeline_mode<synchronous>, transform_indices = @transform_0, window_bounds = array<i64: 8, 64>}, {transform_indices = @transform_1, window_bounds = array<i64: 64, 512>}, {transform_indices = @transform_2, window_bounds = array<i64: 1, 512>}, {transform_indices = @transform_3, window_bounds = array<i64: 1, 512, 512>}, {transform_indices = @transform_4, window_bounds = array<i64: 1, 512>}, {transform_indices = @transform_5, window_bounds = array<i64: 8, 512>}]} {
    %c0_i32 = arith.constant 0 : i32
    %0 = arith.cmpi eq, %arg1, %c0_i32 : i32
    %1 = arith.extui %0 : i1 to i32
    %c0_i32_0 = arith.constant 0 : i32
    %2 = arith.cmpi ne, %1, %c0_i32_0 : i32
    scf.if %2 {
      %cst_15 = arith.constant 0.000000e+00 : f32
      %19 = vector.broadcast %cst_15 : f32 to vector<8x512xf32>
      %c0_16 = arith.constant 0 : index
      %c0_17 = arith.constant 0 : index
      %20 = vector.load %arg8[%c0_16, %c0_17] : memref<8x512xf32, #tpu.memory_space<vmem>>, vector<8x512xf32>
      tpu.vector_store %arg8[%c0_16, %c0_17], %19 {strides = array<i32>} : memref<8x512xf32, #tpu.memory_space<vmem>>, vector<8x512xf32>,
    } else {
    }
    %c0 = arith.constant 0 : index
    %c0_1 = arith.constant 0 : index
    %3 = vector.load %arg2[%c0, %c0_1] : memref<8x64xbf16, #tpu.memory_space<vmem>>, vector<8x64xbf16>
    %c0_2 = arith.constant 0 : index
    %c0_3 = arith.constant 0 : index
    %4 = vector.load %arg3[%c0_2, %c0_3] : memref<64x512xbf16, #tpu.memory_space<vmem>>, vector<64x512xbf16>
    %cst = arith.constant dense<0.000000e+00> : vector<8x512xf32>
    %5 = tpu.matmul %3, %4, %cst {dimension_numbers = #tpu.dot_dimension_numbers<[1], [0], [0], [1], [0, 0, 1, 1], [], []>} : vector<8x64xbf16>, vector<64x512xbf16>, vector<8x512xf32> -> vector<8x512xf32>
    %c0_4 = arith.constant 0 : index
    %c0_5 = arith.constant 0 : index
    %6 = vector.load %arg4[%c0_4, %c0_5] : memref<1x512xf32, #tpu.memory_space<vmem>>, vector<1x512xf32>
    %7 = vector.broadcast %6 : vector<1x512xf32> to vector<8x512xf32>
    %8 = arith.addf %5, %7 : vector<8x512xf32>
    %c0_6 = arith.constant 0 : index
    %c0_7 = arith.constant 0 : index
    %9 = vector.load %arg8[%c0_6, %c0_7] : memref<8x512xf32, #tpu.memory_space<vmem>>, vector<8x512xf32>
    %10 = arith.truncf %8 : vector<8x512xf32> to vector<8x512xbf16>
    %c0_8 = arith.constant 0 : index
    %c0_9 = arith.constant 0 : index
    %c0_10 = arith.constant 0 : index
    %11 = vector.load %arg5[%c0_8, %c0_9, %c0_10] : memref<1x512x512xbf16, #tpu.memory_space<vmem>>, vector<1x512x512xbf16>
    %12 = vector.shape_cast %11 : vector<1x512x512xbf16> to vector<512x512xbf16>
    %cst_11 = arith.constant dense<0.000000e+00> : vector<8x512xf32>
    %13 = tpu.matmul %10, %12, %cst_11 {dimension_numbers = #tpu.dot_dimension_numbers<[1], [0], [0], [1], [0, 0, 1, 1], [], []>} : vector<8x512xbf16>, vector<512x512xbf16>, vector<8x512xf32> -> vector<8x512xf32>
    %14 = arith.addf %9, %13 : vector<8x512xf32>
    %c0_12 = arith.constant 0 : index
    %c0_13 = arith.constant 0 : index
    %15 = vector.load %arg8[%c0_12, %c0_13] : memref<8x512xf32, #tpu.memory_space<vmem>>, vector<8x512xf32>
    tpu.vector_store %arg8[%c0_12, %c0_13], %14 {strides = array<i32>} : memref<8x512xf32, #tpu.memory_space<vmem>>, vector<8x512xf32>,
    %c3_i32 = arith.constant 3 : i32
    %16 = arith.cmpi eq, %arg1, %c3_i32 : i32
    %17 = arith.extui %16 : i1 to i32
    %c0_i32_14 = arith.constant 0 : i32
    %18 = arith.cmpi ne, %17, %c0_i32_14 : i32
    scf.if %18 {
      %c0_15 = arith.constant 0 : index
      %c0_16 = arith.constant 0 : index
      %19 = vector.load %arg8[%c0_15, %c0_16] : memref<8x512xf32, #tpu.memory_space<vmem>>, vector<8x512xf32>
      %c0_17 = arith.constant 0 : index
      %c0_18 = arith.constant 0 : index
      %20 = vector.load %arg6[%c0_17, %c0_18] : memref<1x512xf32, #tpu.memory_space<vmem>>, vector<1x512xf32>
      %21 = vector.broadcast %20 : vector<1x512xf32> to vector<8x512xf32>
      %22 = arith.addf %19, %21 : vector<8x512xf32>
      %23 = arith.negf %22 : vector<8x512xf32>
      %24 = math.exp %23 : vector<8x512xf32>
      %cst_19 = arith.constant 1.000000e+00 : f32
      %25 = vector.broadcast %cst_19 : f32 to vector<8x512xf32>
      %26 = arith.addf %25, %24 : vector<8x512xf32>
      %27 = arith.divf %25, %26 : vector<8x512xf32>
      %c0_20 = arith.constant 0 : index
      %c0_21 = arith.constant 0 : index
      %28 = vector.load %arg7[%c0_20, %c0_21] : memref<8x512xf32, #tpu.memory_space<vmem>>, vector<8x512xf32>
      tpu.vector_store %arg7[%c0_20, %c0_21], %27 {strides = array<i32>} : memref<8x512xf32, #tpu.memory_space<vmem>>, vector<8x512xf32>,
    } else {
    }
    return
  }
  func.func @transform_0(%arg0: i32, %arg1: i32) -> (i32, i32) {
    %c0_i32 = arith.constant 0 : i32
    %c0_i32_0 = arith.constant 0 : i32
    %c0_i32_1 = arith.constant 0 : i32
    return %c0_i32, %c0_i32_0 : i32, i32
  }
  func.func @transform_1(%arg0: i32, %arg1: i32) -> (i32, i32) {
    %c0_i32 = arith.constant 0 : i32
    %c0_i32_0 = arith.constant 0 : i32
    return %c0_i32, %arg1 : i32, i32
  }
  func.func @transform_2(%arg0: i32, %arg1: i32) -> (i32, i32) {
    %c0_i32 = arith.constant 0 : i32
    %c0_i32_0 = arith.constant 0 : i32
    return %c0_i32, %arg1 : i32, i32
  }
  func.func @transform_3(%arg0: i32, %arg1: i32) -> (i32, i32, i32) {
    %c0_i32 = arith.constant 0 : i32
    %c0_i32_0 = arith.constant 0 : i32
    return %arg0, %arg1, %c0_i32 : i32, i32, i32
  }
  func.func @transform_4(%arg0: i32, %arg1: i32) -> (i32, i32) {
    %c0_i32 = arith.constant 0 : i32
    %c0_i32_0 = arith.constant 0 : i32
    return %c0_i32, %arg0 : i32, i32
  }
  func.func @transform_5(%arg0: i32, %arg1: i32) -> (i32, i32) {
    %c0_i32 = arith.constant 0 : i32
    %c0_i32_0 = arith.constant 0 : i32
    return %c0_i32, %arg0 : i32, i32
  }
}

</mosaic_0001>

<bundles_post_ra>
// kernel: cblane_forward.14
= control target key start
LH: loop header
LB: loop body
LE: loop exit
PB: predicated region body
PF: predicated region fallthrough
CT: control target
= control target key end

     0   :  { %s1254_s0 = inlined_call_operand.vmem [shape: f32[32,1024], index: 0, kind: input, shape index: {}]   ;;  %s1255_s1 = inlined_call_operand.hbm [shape: f32[1024,128], index: 1, kind: input, shape index: {}]   ;;  %s1256_s2 = inlined_call_operand.hbm [shape: f32[1,128], index: 2, kind: input, shape index: {}]   ;;  %s1257_s3 = inlined_call_operand.<no memory space> [shape: f32[1,1], index: 3, kind: input, shape index: {}]   ;;  %s1258_s4 = inlined_call_operand.hbm [shape: f32[1,128], index: 4, kind: input, shape index: {}]   ;;  %s1259_s5 = inlined_call_operand.hbm [shape: f32[1,128], index: 5, kind: input, shape index: {}]   ;;  %s1260_s6 = inlined_call_operand.vmem [shape: f32[32,128], index: 6, kind: output, shape index: {}]  }
   0x1   :  { %v11_v0 = vstv %s1257_s3 }
   0x2   :  { %12 = vst [vmem:[#allocation2] sm:$0x1] %v11_v0 }
   0x3   :  { %13 = vsyncpa [#allocation4], 0 }
   0x4   :  { %14 = vsyncpa [#allocation6], 0 }
   0x5   :  { %15 = vsyncpa [#allocation9], 0  ;;  %s1046_s23 = smov [#allocation5]   ;;  %s1047_s25 = smov [#allocation3]  }
   0x6   :  { %s36_s24 = sshll.u32 %s1046_s23, 4  ;;  %s23_s26 = sshll.u32 %s1047_s25, 4  ;;  %s37_s24 = int_to_ptr.vmem [resolvable:$true] %s36_s24  ;;  %s1091_s26 = int_to_ptr.vmem [resolvable:$true] %s23_s26 }
   0x7   :  { %s952_s29 = scalar_lea.hbm %s1256_s2, 16 }
   0x8   :  { %p953_p0 = scmp.ne.s32.totalorder %s1256_s2, %s952_s29  ;;  %p956_p1 = scmp.lt.u32.totalorder %s952_s29, %s1256_s2 }
   0xa   :  { %p958_p2 = pnand %p956_p1, %p953_p0 }
   0xc   :  { %961 = shalt.err (!%p958_p2)
}
   0xd   :  { %s962_s9 = scalar_lea.vmem %s37_s24, 16  ;;  %s966_s10 = scalar_lea.vmem %s37_s24, 32 }
   0xe   :  { %p963_p3 = scmp.ne.s32.totalorder %s37_s24, %s962_s9  ;;  %p967_p4 = scmp.lt.s32.totalorder %s37_s24, %s37_s24 }
   0xf   :  { %p968_p5 = scmp.lt.s32.totalorder %s966_s10, %s962_s9 }
  0x11   :  { %p969_p6 = por %p968_p5, %p967_p4 }
  0x13   :  { %p970_p7 = pnand %p969_p6, %p963_p3 }
  0x15   :  { %973 = shalt.err (!%p970_p7)
}
  0x16   :  { %39 = dma.hbm_to_vmem [thread:$0]  %s1256_s2, 16, %s37_s24, [#allocation6]  }
  0x17   :  { %s974_s15 = scalar_lea.hbm %s1255_s1, 16384 }
  0x18   :  { %p975_p8 = scmp.ne.s32.totalorder %s1255_s1, %s974_s15  ;;  %p978_p9 = scmp.lt.u32.totalorder %s974_s15, %s1255_s1 }
  0x1a   :  { %p980_p10 = pnand %p978_p9, %p975_p8 }
  0x1c   :  { %983 = shalt.err (!%p980_p10)
}
  0x1d   :  { %s984_s20 = scalar_lea.vmem %s1091_s26, 16384  ;;  %p989_p12 = scmp.lt.s32.totalorder %s1091_s26, %s1091_s26 }
  0x1e   :  { %p985_p11 = scmp.ne.s32.totalorder %s1091_s26, %s984_s20  ;;  %p990_p13 = scmp.lt.s32.totalorder %s984_s20, %s984_s20 }
  0x20   :  { %p991_p0 = por %p990_p13, %p989_p12 }
  0x22   :  { %p992_p1 = pnand %p991_p0, %p985_p11 }
  0x24   :  { %995 = shalt.err (!%p992_p1)
}
  0x25   :  { %s1048_s2 = smov 128   ;;  %s1049_s21 = smov 8  }
  0x26   :  { %29 = dma.hbm_to_vmem [thread:$0]  %s1255_s1, 16384, %s1091_s26, [#allocation4], %s1048_s2, %s1048_s2, %s1049_s21  }
  0x27   :  { %s1050_s24 = smov [#allocation7]   ;;  %s1051_s27 = smov [#allocation8]  }
  0x28   :  { %s48_s25 = sshll.u32 %s1050_s24, 4  ;;  %s58_s28 = sshll.u32 %s1051_s27, 4  ;;  %s49_s25 = int_to_ptr.vmem [resolvable:$true] %s48_s25  ;;  %s59_s28 = int_to_ptr.vmem [resolvable:$true] %s58_s28 }
  0x29   :  { %s996_s7 = scalar_lea.hbm %s1258_s4, 16 }
  0x2a   :  { %p997_p2 = scmp.ne.s32.totalorder %s1258_s4, %s996_s7  ;;  %p1000_p3 = scmp.lt.u32.totalorder %s996_s7, %s1258_s4 }
  0x2c   :  { %p1002_p4 = pnand %p1000_p3, %p997_p2 }
  0x2e   :  { %1005 = shalt.err (!%p1002_p4)
}
  0x2f   :  { %s1006_s1 = scalar_lea.vmem %s49_s25, 16  ;;  %s1010_s26 = scalar_lea.vmem %s49_s25, 32 }
  0x30   :  { %p1007_p5 = scmp.ne.s32.totalorder %s49_s25, %s1006_s1  ;;  %p1011_p6 = scmp.lt.s32.totalorder %s49_s25, %s49_s25 }
  0x31   :  { %p1012_p7 = scmp.lt.s32.totalorder %s1010_s26, %s1006_s1 }
  0x33   :  { %p1013_p8 = por %p1012_p7, %p1011_p6 }
  0x35   :  { %p1014_p9 = pnand %p1013_p8, %p1007_p5 }
  0x37   :  { %1017 = shalt.err (!%p1014_p9)
}
  0x38   :  { %51 = dma.hbm_to_vmem [thread:$0]  %s1258_s4, 16, %s49_s25, [#allocation6]  }
  0x39   :  { %s1018_s15 = scalar_lea.hbm %s1259_s5, 16 }
  0x3a   :  { %p1019_p10 = scmp.ne.s32.totalorder %s1259_s5, %s1018_s15  ;;  %p1022_p11 = scmp.lt.u32.totalorder %s1018_s15, %s1259_s5 }
  0x3c   :  { %p1024_p12 = pnand %p1022_p11, %p1019_p10 }
  0x3e   :  { %1027 = shalt.err (!%p1024_p12)
}
  0x3f   :  { %s1028_s20 = scalar_lea.vmem %s59_s28, 16  ;;  %s1032_s2 = scalar_lea.vmem %s59_s28, 32 }
  0x40   :  { %p1029_p13 = scmp.ne.s32.totalorder %s59_s28, %s1028_s20  ;;  %p1033_p0 = scmp.lt.s32.totalorder %s59_s28, %s59_s28 }
  0x41   :  { %p1034_p1 = scmp.lt.s32.totalorder %s1032_s2, %s1028_s20 }
  0x43   :  { %p1035_p2 = por %p1034_p1, %p1033_p0 }
  0x45   :  { %p1036_p3 = pnand %p1035_p2, %p1029_p13 }
  0x47   :  { %1039 = shalt.err (!%p1036_p3)
}
  0x48   :  { %61 = dma.hbm_to_vmem [thread:$0]  %s1259_s5, 16, %s59_s28, [#allocation9]  }
  0x49   :  { %1040 = dma.done.wait [#allocation4], 16384  }
  0x4a   :  { %1041 = vsyncadd [#allocation4], 4294950912 }
  0x4b   :  { %1042 = dma.done.wait [#allocation6], 32  }
  0x4c   :  { %1043 = vsyncadd [#allocation6], 4294967264 }
  0x4d   :  { %1044 = dma.done.wait [#allocation9], 16  }
  0x4e   :  { %1045 = vsyncadd [#allocation9], 4294967280  ;;  %v1052_v1 = vmov 0   ;;  %v122_v2 = vld [vmem:[#allocation3 + $0x80] sm:$0xff]  ;;  %v123_v3 = vld [vmem:[#allocation3 + $0x88] sm:$0xff] }
  0x4f   :  { %951 = vset.pattern.permute.xlu0 %v1052_v1  ;;  %v106_v4 = vld [vmem:[#allocation3] sm:$0xff]  ;;  %v816_v5 = vpack.c.bf16 %v123_v3, %v122_v2  ;;  %v107_v6 = vld [vmem:[#allocation3 + $0x8] sm:$0xff]  ;;  %v124_v13 = vld [vmem:[#allocation3 + $0x90] sm:$0xff] }
  0x50   :  { %v154_v7 = vld [vmem:[#allocation3 + $0x180] sm:$0xff]  ;;  %v155_v8 = vld [vmem:[#allocation3 + $0x188] sm:$0xff]  ;;  %v818_v9 = vpack.c.bf16 %v107_v6, %v106_v4  ;;  %v125_v15 = vld [vmem:[#allocation3 + $0x98] sm:$0xff] }
  0x51   :  { %v848_v10 = vpack.c.bf16 %v155_v8, %v154_v7  ;;  %v138_v11 = vld [vmem:[#allocation3 + $0x100] sm:$0xff]  ;;  %v139_v12 = vld [vmem:[#allocation3 + $0x108] sm:$0xff]  ;;  %817 = vmatprep.subr.bf16.mxu0 %v816_v5  ;;  %v108_v16 = vld [vmem:[#allocation3 + $0x10] sm:$0xff]  ;;  %v820_v18 = vpack.c.bf16 %v125_v15, %v124_v13 }
  0x52   :  { %v850_v14 = vpack.c.bf16 %v139_v12, %v138_v11  ;;  %v109_v17 = vld [vmem:[#allocation3 + $0x18] sm:$0xff]  ;;  %819 = vmatpush3.bf16.msra.mxu0 %v818_v9  ;;  %v156_v20 = vld [vmem:[#allocation3 + $0x190] sm:$0xff]  ;;  %v126_v25 = vld [vmem:[#allocation3 + $0xa0] sm:$0xff] }
  0x53   :  { %849 = vmatprep.subr.bf16.mxu1 %v848_v10  ;;  %v822_v19 = vpack.c.bf16 %v109_v17, %v108_v16  ;;  %v157_v21 = vld [vmem:[#allocation3 + $0x198] sm:$0xff]  ;;  %v140_v22 = vld [vmem:[#allocation3 + $0x110] sm:$0xff]  ;;  %v127_v26 = vld [vmem:[#allocation3 + $0xa8] sm:$0xff]  ;;  %821 = vmatprep.subr.bf16.mxu0 %v820_v18 }
  0x54   :  { %851 = vmatpush3.bf16.msra.mxu1 %v850_v14  ;;  %v852_v23 = vpack.c.bf16 %v157_v21, %v156_v20  ;;  %v141_v24 = vld [vmem:[#allocation3 + $0x118] sm:$0xff]  ;;  %v824_v28 = vpack.c.bf16 %v127_v26, %v126_v25  ;;  %v110_v29 = vld [vmem:[#allocation3 + $0x20] sm:$0xff]  ;;  %v111_v30 = vld [vmem:[#allocation3 + $0x28] sm:$0xff] }
  0x55   :  { %v854_v27 = vpack.c.bf16 %v141_v24, %v140_v22  ;;  %v158_v31 = vld [vmem:[#allocation3 + $0x1a0] sm:$0xff]  ;;  %v159_v32 = vld [vmem:[#allocation3 + $0x1a8] sm:$0xff]  ;;  %v826_v35 = vpack.c.bf16 %v111_v30, %v110_v29  ;;  %v128_v37 = vld [vmem:[#allocation3 + $0xb0] sm:$0xff] }
  0x56   :  { %853 = vmatprep.subr.bf16.mxu1 %v852_v23  ;;  %v142_v33 = vld [vmem:[#allocation3 + $0x120] sm:$0xff]  ;;  %v143_v34 = vld [vmem:[#allocation3 + $0x128] sm:$0xff]  ;;  %823 = vmatpush3.bf16.msra.mxu0 %v822_v19  ;;  %v856_v36 = vpack.c.bf16 %v159_v32, %v158_v31  ;;  %v129_v38 = vld [vmem:[#allocation3 + $0xb8] sm:$0xff] }
  0x57   :  { %v112_v39 = vld [vmem:[#allocation3 + $0x30] sm:$0xff]  ;;  %825 = vmatprep.subr.bf16.mxu0 %v824_v28  ;;  %v858_v40 = vpack.c.bf16 %v143_v34, %v142_v33  ;;  %v828_v41 = vpack.c.bf16 %v129_v38, %v128_v37  ;;  %v113_v42 = vld [vmem:[#allocation3 + $0x38] sm:$0xff]  ;;  %v130_v48 = vld [vmem:[#allocation3 + $0xc0] sm:$0xff] }
  0x58   :  { %855 = vmatpush3.bf16.msra.mxu1 %v854_v27  ;;  %v160_v43 = vld [vmem:[#allocation3 + $0x1b0] sm:$0xff]  ;;  %v161_v44 = vld [vmem:[#allocation3 + $0x1b8] sm:$0xff]  ;;  %v131_v49 = vld [vmem:[#allocation3 + $0xc8] sm:$0xff]  ;;  %v830_v50 = vpack.c.bf16 %v113_v42, %v112_v39 }
  0x59   :  { %857 = vmatprep.subr.bf16.mxu1 %v856_v36  ;;  %v860_v45 = vpack.c.bf16 %v161_v44, %v160_v43  ;;  %v144_v46 = vld [vmem:[#allocation3 + $0x130] sm:$0xff]  ;;  %v145_v47 = vld [vmem:[#allocation3 + $0x138] sm:$0xff]  ;;  %v162_v51 = vld [vmem:[#allocation3 + $0x1c0] sm:$0xff]  ;;  %v832_v54 = vpack.c.bf16 %v131_v49, %v130_v48 }
  0x5a   :  { %827 = vmatpush3.bf16.msra.mxu0 %v826_v35  ;;  %v163_v52 = vld [vmem:[#allocation3 + $0x1c8] sm:$0xff]  ;;  %v862_v53 = vpack.c.bf16 %v145_v47, %v144_v46  ;;  %v114_v55 = vld [vmem:[#allocation3 + $0x40] sm:$0xff]  ;;  %v132_v60 = vld [vmem:[#allocation3 + $0xd0] sm:$0xff] }
  0x5b   :  { %829 = vmatprep.subr.bf16.mxu0 %v828_v41  ;;  %v115_v56 = vld [vmem:[#allocation3 + $0x48] sm:$0xff]  ;;  %v146_v57 = vld [vmem:[#allocation3 + $0x140] sm:$0xff]  ;;  %v864_v58 = vpack.c.bf16 %v163_v52, %v162_v51  ;;  %v133_v61 = vld [vmem:[#allocation3 + $0xd8] sm:$0xff] }
  0x5c   :  { %859 = vmatpush3.bf16.msra.mxu1 %v858_v40  ;;  %v147_v59 = vld [vmem:[#allocation3 + $0x148] sm:$0xff]  ;;  %v164_v62 = vld [vmem:[#allocation3 + $0x1d0] sm:$0xff]  ;;  %v165_v63 = vld [vmem:[#allocation3 + $0x1d8] sm:$0xff]  ;;  %v834_v0 = vpack.c.bf16 %v115_v56, %v114_v55  ;;  %v836_v2 = vpack.c.bf16 %v133_v61, %v132_v60 }
  0x5d   :  { %861 = vmatprep.subr.bf16.mxu1 %v860_v45  ;;  %v866_v1 = vpack.c.bf16 %v147_v59, %v146_v57  ;;  %v116_v3 = vld [vmem:[#allocation3 + $0x50] sm:$0xff]  ;;  %v117_v4 = vld [vmem:[#allocation3 + $0x58] sm:$0xff]  ;;  %v868_v6 = vpack.c.bf16 %v165_v63, %v164_v62  ;;  %v134_v8 = vld [vmem:[#allocation3 + $0xe0] sm:$0xff] }
  0x5e   :  { %831 = vmatpush3.bf16.msra.mxu0 %v830_v50  ;;  %v148_v5 = vld [vmem:[#allocation3 + $0x150] sm:$0xff]  ;;  %v149_v7 = vld [vmem:[#allocation3 + $0x158] sm:$0xff]  ;;  %v135_v9 = vld [vmem:[#allocation3 + $0xe8] sm:$0xff]  ;;  %v838_v12 = vpack.c.bf16 %v117_v4, %v116_v3 }
  0x5f   :  { %833 = vmatprep.subr.bf16.mxu0 %v832_v54  ;;  %v166_v10 = vld [vmem:[#allocation3 + $0x1e0] sm:$0xff]  ;;  %v167_v11 = vld [vmem:[#allocation3 + $0x1e8] sm:$0xff]  ;;  %v870_v15 = vpack.c.bf16 %v149_v7, %v148_v5  ;;  %v840_v16 = vpack.c.bf16 %v135_v9, %v134_v8  ;;  %v136_v21 = vld [vmem:[#allocation3 + $0xf0] sm:$0xff] }
  0x60   :  { %863 = vmatpush3.bf16.msra.mxu1 %v862_v53  ;;  %v118_v13 = vld [vmem:[#allocation3 + $0x60] sm:$0xff]  ;;  %v119_v14 = vld [vmem:[#allocation3 + $0x68] sm:$0xff]  ;;  %v872_v20 = vpack.c.bf16 %v167_v11, %v166_v10  ;;  %v137_v22 = vld [vmem:[#allocation3 + $0xf8] sm:$0xff] }
  0x61   :  { %865 = vmatprep.subr.bf16.mxu1 %v864_v58  ;;  %v150_v17 = vld [vmem:[#allocation3 + $0x160] sm:$0xff]  ;;  %v151_v18 = vld [vmem:[#allocation3 + $0x168] sm:$0xff]  ;;  %v77_v23 = vld [vmem:[%s1254_s0 + $0x18] sm:$0xff]  ;;  %v842_v26 = vpack.c.bf16 %v119_v14, %v118_v13  ;;  %v844_v28 = vpack.c.bf16 %v137_v22, %v136_v21 }
  0x62   :  { %835 = vmatpush3.bf16.msra.mxu0 %v834_v0  ;;  %v75_v19 = vld [vmem:[%s1254_s0 + $0x8] sm:$0xff]  ;;  %v168_v24 = vld [vmem:[#allocation3 + $0x1f0] sm:$0xff]  ;;  %v169_v25 = vld [vmem:[#allocation3 + $0x1f8] sm:$0xff]  ;;  %390 = vmatprep.mubr.f32.mxu1 %v77_v23  ;;  %v874_v27 = vpack.c.bf16 %v151_v18, %v150_v17 }
  0x63   :  { %837 = vmatprep.subr.bf16.mxu0 %v836_v2  ;;  %305 = vmatprep.mubr.f32.mxu0 %v75_v19  ;;  %v120_v29 = vld [vmem:[#allocation3 + $0x70] sm:$0xff]  ;;  %v121_v30 = vld [vmem:[#allocation3 + $0x78] sm:$0xff]  ;;  %v876_v32 = vpack.c.bf16 %v169_v25, %v168_v24  ;;  %v186_v34 = vld [vmem:[#allocation3 + $0x280] sm:$0xff] }
  0x64   :  { %867 = vmatpush3.bf16.msra.mxu1 %v866_v1  ;;  %v152_v31 = vld [vmem:[#allocation3 + $0x170] sm:$0xff]  ;;  %v153_v33 = vld [vmem:[#allocation3 + $0x178] sm:$0xff]  ;;  %v187_v35 = vld [vmem:[#allocation3 + $0x288] sm:$0xff]  ;;  %v846_v38 = vpack.c.bf16 %v121_v30, %v120_v29 }
  0x65   :  { %869 = vmatprep.subr.bf16.mxu1 %v868_v6  ;;  %v218_v36 = vld [vmem:[#allocation3 + $0x380] sm:$0xff]  ;;  %v219_v37 = vld [vmem:[#allocation3 + $0x388] sm:$0xff]  ;;  %v878_v39 = vpack.c.bf16 %v153_v33, %v152_v31  ;;  %v880_v40 = vpack.c.bf16 %v187_v35, %v186_v34  ;;  %v188_v46 = vld [vmem:[#allocation3 + $0x290] sm:$0xff] }
  0x66   :  { %839 = vmatpush3.bf16.msra.mxu0 %v838_v12  ;;  %v170_v41 = vld [vmem:[#allocation3 + $0x200] sm:$0xff]  ;;  %v171_v42 = vld [vmem:[#allocation3 + $0x208] sm:$0xff]  ;;  %v912_v44 = vpack.c.bf16 %v219_v37, %v218_v36  ;;  %v189_v47 = vld [vmem:[#allocation3 + $0x298] sm:$0xff] }
  0x67   :  { %841 = vmatprep.subr.bf16.mxu0 %v840_v16  ;;  %v202_v43 = vld [vmem:[#allocation3 + $0x300] sm:$0xff]  ;;  %v203_v45 = vld [vmem:[#allocation3 + $0x308] sm:$0xff]  ;;  %v220_v48 = vld [vmem:[#allocation3 + $0x390] sm:$0xff]  ;;  %v882_v51 = vpack.c.bf16 %v171_v42, %v170_v41  ;;  %v884_v54 = vpack.c.bf16 %v189_v47, %v188_v46 }
  0x68   :  { %871 = vmatpush3.bf16.msra.mxu1 %v870_v15  ;;  %v221_v49 = vld [vmem:[#allocation3 + $0x398] sm:$0xff]  ;;  %v76_v52 = vld [vmem:[%s1254_s0 + $0x10] sm:$0xff]  ;;  %v914_v53 = vpack.c.bf16 %v203_v45, %v202_v43  ;;  %v190_v60 = vld [vmem:[#allocation3 + $0x2a0] sm:$0xff] }
  0x69   :  { %873 = vmatprep.subr.bf16.mxu1 %v872_v20  ;;  %v74_v50 = vld [vmem:[%s1254_s0] sm:$0xff]  ;;  %v172_v55 = vld [vmem:[#allocation3 + $0x210] sm:$0xff]  ;;  %v916_v58 = vpack.c.bf16 %v221_v49, %v220_v48  ;;  %v191_v61 = vld [vmem:[#allocation3 + $0x2a8] sm:$0xff] }
  0x6a   :  { %843 = vmatpush3.bf16.msra.mxu0 %v842_v26  ;;  %v173_v56 = vld [vmem:[#allocation3 + $0x218] sm:$0xff]  ;;  %v204_v57 = vld [vmem:[#allocation3 + $0x310] sm:$0xff]  ;;  %v222_v62 = vld [vmem:[#allocation3 + $0x3a0] sm:$0xff]  ;;  %v888_v6 = vpack.c.bf16 %v191_v61, %v190_v60 }
  0x6b   :  { %845 = vmatprep.subr.bf16.mxu0 %v844_v28  ;;  %v205_v59 = vld [vmem:[#allocation3 + $0x318] sm:$0xff]  ;;  %v223_v63 = vld [vmem:[#allocation3 + $0x3a8] sm:$0xff]  ;;  %v886_v1 = vpack.c.bf16 %v173_v56, %v172_v55  ;;  %v174_v2 = vld [vmem:[#allocation3 + $0x220] sm:$0xff] }
  0x6c   :  { %875 = vmatpush3.bf16.msra.mxu1 %v874_v27  ;;  %v83_v0 = vld [vmem:[%s1254_s0 + $0x48] sm:$0xff]  ;;  %v82_v3 = vld [vmem:[%s1254_s0 + $0x40] sm:$0xff]  ;;  %v85_v4 = vld [vmem:[%s1254_s0 + $0x58] sm:$0xff]  ;;  %v918_v5 = vpack.c.bf16 %v205_v59, %v204_v57  ;;  %v920_v10 = vpack.c.bf16 %v223_v63, %v222_v62 }
  0x6d   :  { %877 = vmatprep.subr.bf16.mxu1 %v876_v32  ;;  %v175_v7 = vld [vmem:[#allocation3 + $0x228] sm:$0xff]  ;;  %v206_v8 = vld [vmem:[#allocation3 + $0x320] sm:$0xff]  ;;  %v192_v12 = vld [vmem:[#allocation3 + $0x2b0] sm:$0xff] }
  0x6e   :  { %847 = vmatpush3.bf16.msra.mxu0 %v846_v38  ;;  %v84_v9 = vld [vmem:[%s1254_s0 + $0x50] sm:$0xff]  ;;  %v193_v13 = vld [vmem:[#allocation3 + $0x2b8] sm:$0xff]  ;;  %v91_v16 = vld [vmem:[%s1254_s0 + $0x88] sm:$0xff]  ;;  %v890_v17 = vpack.c.bf16 %v175_v7, %v174_v2 }
  0x6f   :  { %881 = vmatprep.subr.bf16.mxu0 %v880_v40  ;;  %v207_v11 = vld [vmem:[#allocation3 + $0x328] sm:$0xff]  ;;  %v224_v14 = vld [vmem:[#allocation3 + $0x3b0] sm:$0xff]  ;;  %v225_v15 = vld [vmem:[#allocation3 + $0x3b8] sm:$0xff]  ;;  %v892_v22 = vpack.c.bf16 %v193_v13, %v192_v12 }
  0x70   :  { %879 = vmatpush3.bf16.msra.mxu1 %v878_v39  ;;  %v176_v18 = vld [vmem:[#allocation3 + $0x230] sm:$0xff]  ;;  %v90_v19 = vld [vmem:[%s1254_s0 + $0x80] sm:$0xff]  ;;  %v922_v21 = vpack.c.bf16 %v207_v11, %v206_v8  ;;  %v924_v26 = vpack.c.bf16 %v225_v15, %v224_v14  ;;  %v195_v29 = vld [vmem:[#allocation3 + $0x2c8] sm:$0xff] }
  0x71   :  { %913 = vmatprep.subr.bf16.mxu1 %v912_v44  ;;  %306 = vmatmul.mubr.f32.vlgmr.msra.gmra.mrb[0].mxu0 %v74_v50  ;;  %v93_v20 = vld [vmem:[%s1254_s0 + $0x98] sm:$0xff]  ;;  %v92_v25 = vld [vmem:[%s1254_s0 + $0x90] sm:$0xff]  ;;  %v194_v28 = vld [vmem:[#allocation3 + $0x2c0] sm:$0xff] }
  0x72   :  { %883 = vmatpush3.bf16.msra.mxu0 %v882_v51  ;;  %310 = vmatprep.mubr.f32.mxu0 %v83_v0  ;;  %v177_v23 = vld [vmem:[#allocation3 + $0x238] sm:$0xff]  ;;  %v208_v24 = vld [vmem:[#allocation3 + $0x330] sm:$0xff]  ;;  %v226_v30 = vld [vmem:[#allocation3 + $0x3c0] sm:$0xff]  ;;  %v896_v38 = vpack.c.bf16 %v195_v29, %v194_v28 }
  0x73   :  { %391 = vmatmul.mubr.f32.vlgmr.msra.gmra.mrb[0].mxu1 %v76_v52  ;;  %885 = vmatprep.subr.bf16.mxu0 %v884_v54  ;;  %v209_v27 = vld [vmem:[#allocation3 + $0x338] sm:$0xff]  ;;  %v227_v31 = vld [vmem:[#allocation3 + $0x3c8] sm:$0xff]  ;;  %v894_v33 = vpack.c.bf16 %v177_v23, %v176_v18  ;;  %v178_v34 = vld [vmem:[#allocation3 + $0x240] sm:$0xff] }
  0x74   :  { %915 = vmatpush3.bf16.msra.mxu1 %v914_v53  ;;  %395 = vmatprep.mubr.f32.mxu1 %v85_v4  ;;  %v99_v32 = vld [vmem:[%s1254_s0 + $0xc8] sm:$0xff]  ;;  %v98_v35 = vld [vmem:[%s1254_s0 + $0xc0] sm:$0xff]  ;;  %v101_v36 = vld [vmem:[%s1254_s0 + $0xd8] sm:$0xff]  ;;  %v926_v37 = vpack.c.bf16 %v209_v27, %v208_v24  ;;  %v928_v42 = vpack.c.bf16 %v227_v31, %v226_v30 }
  0x75   :  { %917 = vmatprep.subr.bf16.mxu1 %v916_v58  ;;  %311 = vmatmul.mubr.f32.gmra.mrb[2].mxu0 %v82_v3  ;;  %v179_v39 = vld [vmem:[#allocation3 + $0x248] sm:$0xff]  ;;  %v210_v40 = vld [vmem:[#allocation3 + $0x340] sm:$0xff]  ;;  %v196_v44 = vld [vmem:[#allocation3 + $0x2d0] sm:$0xff] }
  0x76   :  { %887 = vmatpush3.bf16.msra.mxu0 %v886_v1  ;;  %315 = vmatprep.mubr.f32.mxu0 %v91_v16  ;;  %v100_v41 = vld [vmem:[%s1254_s0 + $0xd0] sm:$0xff]  ;;  %v197_v45 = vld [vmem:[#allocation3 + $0x2d8] sm:$0xff]  ;;  %v898_v48 = vpack.c.bf16 %v179_v39, %v178_v34  ;;  %v79_v49 = vld [vmem:[%s1254_s0 + $0x28] sm:$0xff] }
  0x77   :  { %396 = vmatmul.mubr.f32.gmra.mrb[2].mxu1 %v84_v9  ;;  %889 = vmatprep.subr.bf16.mxu0 %v888_v6  ;;  %v211_v43 = vld [vmem:[#allocation3 + $0x348] sm:$0xff]  ;;  %v228_v46 = vld [vmem:[#allocation3 + $0x3d0] sm:$0xff]  ;;  %v229_v47 = vld [vmem:[#allocation3 + $0x3d8] sm:$0xff]  ;;  %v900_v52 = vpack.c.bf16 %v197_v45, %v196_v44 }
  0x78   :  { %919 = vmatpush3.bf16.msra.mxu1 %v918_v5  ;;  %400 = vmatprep.mubr.f32.mxu1 %v93_v20  ;;  %v81_v50 = vld [vmem:[%s1254_s0 + $0x38] sm:$0xff]  ;;  %v930_v51 = vpack.c.bf16 %v211_v43, %v210_v40  ;;  %v932_v56 = vpack.c.bf16 %v229_v47, %v228_v46  ;;  %v198_v58 = vld [vmem:[#allocation3 + $0x2e0] sm:$0xff]  ;;  %v199_v59 = vld [vmem:[#allocation3 + $0x2e8] sm:$0xff] }
  0x79   :  { %921 = vmatprep.subr.bf16.mxu1 %v920_v10  ;;  %316 = vmatmul.mubr.f32.gmra.mrb[4].mxu0 %v90_v19  ;;  %v180_v53 = vld [vmem:[#allocation3 + $0x250] sm:$0xff]  ;;  %v181_v54 = vld [vmem:[#allocation3 + $0x258] sm:$0xff]  ;;  %v230_v60 = vld [vmem:[#allocation3 + $0x3e0] sm:$0xff]  ;;  %v904_v1 = vpack.c.bf16 %v199_v59, %v198_v58 }
  0x7a   :  { %891 = vmatpush3.bf16.msra.mxu0 %v890_v17  ;;  %320 = vmatprep.mubr.f32.mxu0 %v99_v32  ;;  %v212_v55 = vld [vmem:[#allocation3 + $0x350] sm:$0xff]  ;;  %v213_v57 = vld [vmem:[#allocation3 + $0x358] sm:$0xff]  ;;  %v231_v61 = vld [vmem:[#allocation3 + $0x3e8] sm:$0xff]  ;;  %v902_v62 = vpack.c.bf16 %v181_v54, %v180_v53 }
  0x7b   :  { %401 = vmatmul.mubr.f32.gmra.mrb[4].mxu1 %v92_v25  ;;  %893 = vmatprep.subr.bf16.mxu0 %v892_v22  ;;  %v182_v63 = vld [vmem:[#allocation3 + $0x260] sm:$0xff]  ;;  %v934_v0 = vpack.c.bf16 %v213_v57, %v212_v55  ;;  %v183_v2 = vld [vmem:[#allocation3 + $0x268] sm:$0xff]  ;;  %v637_v4 = vld [vmem:[#allocation2] ss:$0 sm:$0xff]  ;;  %v936_v5 = vpack.c.bf16 %v231_v61, %v230_v60 }
  0x7c   :  { %923 = vmatpush3.bf16.msra.mxu1 %v922_v21  ;;  %405 = vmatprep.mubr.f32.mxu1 %v101_v36  ;;  %v214_v3 = vld [vmem:[#allocation3 + $0x360] sm:$0xff]  ;;  %v215_v6 = vld [vmem:[#allocation3 + $0x368] sm:$0xff]  ;;  %v200_v7 = vld [vmem:[#allocation3 + $0x2f0] sm:$0xff]  ;;  %v906_v11 = vpack.c.bf16 %v183_v2, %v182_v63 }
  0x7d   :  { %925 = vmatprep.subr.bf16.mxu1 %v924_v26  ;;  %321 = vmatmul.mubr.f32.gmra.mrb[6].mxu0 %v98_v35  ;;  %v201_v8 = vld [vmem:[#allocation3 + $0x2f8] sm:$0xff]  ;;  %v232_v9 = vld [vmem:[#allocation3 + $0x3f0] sm:$0xff]  ;;  %v938_v12 = vpack.c.bf16 %v215_v6, %v214_v3  ;;  %v87_v23 = vld [vmem:[%s1254_s0 + $0x68] sm:$0xff] }
  0x7e   :  { %895 = vmatpush3.bf16.msra.mxu0 %v894_v33  ;;  %475 = vmatprep.mubr.f32.mxu0 %v79_v49  ;;  %v233_v10 = vld [vmem:[#allocation3 + $0x3f8] sm:$0xff]  ;;  %v908_v13 = vpack.c.bf16 %v201_v8, %v200_v7  ;;  %v184_v14 = vld [vmem:[#allocation3 + $0x270] sm:$0xff]  ;;  %v95_v27 = vld [vmem:[%s1254_s0 + $0xa8] sm:$0xff] }
  0x7f   :  { %406 = vmatmul.mubr.f32.gmra.mrb[6].mxu1 %v100_v41  ;;  %897 = vmatprep.subr.bf16.mxu0 %v896_v38  ;;  %v185_v15 = vld [vmem:[#allocation3 + $0x278] sm:$0xff]  ;;  %v940_v16 = vpack.c.bf16 %v233_v10, %v232_v9  ;;  %v216_v17 = vld [vmem:[#allocation3 + $0x370] sm:$0xff]  ;;  %v103_v31 = vld [vmem:[%s1254_s0 + $0xe8] sm:$0xff] }
  0x80   :  { %927 = vmatpush3.bf16.msra.mxu1 %v926_v37  ;;  %560 = vmatprep.mubr.f32.mxu1 %v81_v50  ;;  %v217_v18 = vld [vmem:[#allocation3 + $0x378] sm:$0xff]  ;;  %v910_v19 = vpack.c.bf16 %v185_v15, %v184_v14  ;;  %v80_v22 = vld [vmem:[%s1254_s0 + $0x30] sm:$0xff]  ;;  %v636_v36 = vld [vmem:[#allocation5] ss:$0 sm:$0xff] }
  0x81   :  { %929 = vmatprep.subr.bf16.mxu1 %v928_v42  ;;  %592 = vperm.xlu0 %951, %v637_v4   ;;  %v942_v20 = vpack.c.bf16 %v217_v18, %v216_v17  ;;  %v78_v21 = vld [vmem:[%s1254_s0 + $0x20] sm:$0xff]  ;;  %v89_v24 = vld [vmem:[%s1254_s0 + $0x78] sm:$0xff]  ;;  %v88_v26 = vld [vmem:[%s1254_s0 + $0x70] sm:$0xff] }
  0x82   :  { %899 = vmatpush3.bf16.msra.mxu0 %v898_v48  ;;  %v86_v25 = vld [vmem:[%s1254_s0 + $0x60] sm:$0xff]  ;;  %v97_v28 = vld [vmem:[%s1254_s0 + $0xb8] sm:$0xff]  ;;  %v96_v30 = vld [vmem:[%s1254_s0 + $0xb0] sm:$0xff] }
  0x83   :  { %901 = vmatprep.subr.bf16.mxu0 %v900_v52  ;;  %v94_v29 = vld [vmem:[%s1254_s0 + $0xa0] sm:$0xff]  ;;  %v105_v32 = vld [vmem:[%s1254_s0 + $0xf8] sm:$0xff]  ;;  %v104_v34 = vld [vmem:[%s1254_s0 + $0xf0] sm:$0xff] }
  0x84   :  { %931 = vmatpush3.bf16.msra.mxu1 %v930_v51  ;;  %v102_v33 = vld [vmem:[%s1254_s0 + $0xe0] sm:$0xff] }
  0x85   :  { %933 = vmatprep.subr.bf16.mxu1 %v932_v56 }
  0x86   :  { %903 = vmatpush3.bf16.msra.mxu0 %v902_v62 }
  0x87   :  { %905 = vmatprep.subr.bf16.mxu0 %v904_v1 }
  0x88   :  { %935 = vmatpush3.bf16.msra.mxu1 %v934_v0 }
  0x89   :  { %937 = vmatprep.subr.bf16.mxu1 %v936_v5 }
  0x8a   :  { %907 = vmatpush3.bf16.msra.mxu0 %v906_v11 }
  0x8b   :  { %909 = vmatprep.subr.bf16.mxu0 %v908_v13 }
  0x8c   :  { %939 = vmatpush3.bf16.msra.mxu1 %v938_v12 }
  0x8d   :  { %941 = vmatprep.subr.bf16.mxu1 %v940_v16 }
  0x8e   :  { %911 = vmatpush3.bf16.msra.mxu0 %v910_v19 }
  0x90   :  { %943 = vmatpush3.bf16.msra.mxu1 %v942_v20  ;;  %v638_v20 = vld [vmem:[#allocation7] ss:$0 sm:$0xff] }
  0x91   :  { %476 = vmatmul.mubr.f32.vlgmr.msra.gmra.mrb[8].mxu0 %v78_v21 }
  0x92   :  { %480 = vmatprep.mubr.f32.mxu0 %v87_v23 }
  0x93   :  { %561 = vmatmul.mubr.f32.vlgmr.msra.gmra.mrb[8].mxu1 %v80_v22 }
  0x94   :  { %565 = vmatprep.mubr.f32.mxu1 %v89_v24 }
  0x95   :  { %481 = vmatmul.mubr.f32.gmra.mrb[10].mxu0 %v86_v25 }
  0x96   :  { %485 = vmatprep.mubr.f32.mxu0 %v95_v27 }
  0x97   :  { %566 = vmatmul.mubr.f32.gmra.mrb[10].mxu1 %v88_v26  ;;  %v639_v26 = vld [vmem:[#allocation8] ss:$0 sm:$0xff] }
  0x98   :  { %570 = vmatprep.mubr.f32.mxu1 %v97_v28 }
  0x99   :  { %486 = vmatmul.mubr.f32.gmra.mrb[12].mxu0 %v94_v29 }
  0x9a   :  { %490 = vmatprep.mubr.f32.mxu0 %v103_v31 }
  0x9b   :  { %571 = vmatmul.mubr.f32.gmra.mrb[12].mxu1 %v96_v30 }
  0x9c   :  { %575 = vmatprep.mubr.f32.mxu1 %v105_v32 }
  0x9d   :  { %491 = vmatmul.mubr.f32.gmra.mrb[14].mxu0 %v102_v33 }
  0x9f   :  { %576 = vmatmul.mubr.f32.gmra.mrb[14].mxu1 %v104_v34 }
 0x100   :  { %v593_v12 = vpop.permute.xlu0 %592 }
 0x144   :  { %v672_v35 = vpop.f32.mrb[0].mxu0 }
 0x145   :  { %v673_v37 = vpop.f32.mrb[1].mxu0 }
 0x146   :  { %v716_v38 = vpop.f32.mrb[0].mxu1  ;;  %v674_v39 = vadd.f32 %v673_v37, %v672_v35 }
 0x147   :  { %v717_v40 = vpop.f32.mrb[1].mxu1 }
 0x148   :  { %v718_v41 = vadd.f32 %v717_v40, %v716_v38  ;;  %v308_v42 = vadd.f32 %v674_v39, %v636_v36  ;;  %v675_v43 = vpop.f32.mrb[2].mxu0 }
 0x149   :  { %v676_v44 = vpop.f32.mrb[3].mxu0 }
 0x14a   :  { %v719_v45 = vpop.f32.mrb[2].mxu1  ;;  %v393_v46 = vadd.f32 %v718_v41, %v308_v42  ;;  %v677_v47 = vadd.f32 %v676_v44, %v675_v43 }
 0x14b   :  { %v720_v48 = vpop.f32.mrb[3].mxu1 }
 0x14c   :  { %v721_v49 = vadd.f32 %v720_v48, %v719_v45  ;;  %v313_v50 = vadd.f32 %v677_v47, %v636_v36  ;;  %v678_v51 = vpop.f32.mrb[4].mxu0 }
 0x14d   :  { %v679_v52 = vpop.f32.mrb[5].mxu0 }
 0x14e   :  { %v722_v53 = vpop.f32.mrb[4].mxu1  ;;  %v398_v54 = vadd.f32 %v721_v49, %v313_v50  ;;  %v680_v55 = vadd.f32 %v679_v52, %v678_v51 }
 0x14f   :  { %v723_v56 = vpop.f32.mrb[5].mxu1 }
 0x150   :  { %v724_v57 = vadd.f32 %v723_v56, %v722_v53  ;;  %v318_v58 = vadd.f32 %v680_v55, %v636_v36  ;;  %v681_v59 = vpop.f32.mrb[6].mxu0 }
 0x151   :  { %v682_v60 = vpop.f32.mrb[7].mxu0 }
 0x152   :  { %v725_v61 = vpop.f32.mrb[6].mxu1  ;;  %v403_v62 = vadd.f32 %v724_v57, %v318_v58  ;;  %v683_v63 = vadd.f32 %v682_v60, %v681_v59 }
 0x153   :  { %v726_v0 = vpop.f32.mrb[7].mxu1 }
 0x154   :  { %v727_v1 = vadd.f32 %v726_v0, %v725_v61  ;;  %v323_v2 = vadd.f32 %v683_v63, %v636_v36 }
 0x156   :  { %v408_v3 = vadd.f32 %v727_v1, %v323_v2 }
 0x164   :  { %v760_v4 = vpop.f32.mrb[8].mxu0 }
 0x165   :  { %v761_v5 = vpop.f32.mrb[9].mxu0 }
 0x166   :  { %v804_v6 = vpop.f32.mrb[8].mxu1  ;;  %v762_v7 = vadd.f32 %v761_v5, %v760_v4 }
 0x167   :  { %v805_v8 = vpop.f32.mrb[9].mxu1 }
 0x168   :  { %v806_v9 = vadd.f32 %v805_v8, %v804_v6  ;;  %v478_v10 = vadd.f32 %v762_v7, %v393_v46  ;;  %v763_v11 = vpop.f32.mrb[10].mxu0 }
 0x169   :  { %v764_v13 = vpop.f32.mrb[11].mxu0 }
 0x16a   :  { %v807_v14 = vpop.f32.mrb[10].mxu1  ;;  %v563_v15 = vadd.f32 %v806_v9, %v478_v10  ;;  %v765_v16 = vadd.f32 %v764_v13, %v763_v11 }
 0x16b   :  { %v808_v17 = vpop.f32.mrb[11].mxu1 }
 0x16c   :  { %v809_v18 = vadd.f32 %v808_v17, %v807_v14  ;;  %vm582_vm0 = vcmp.ge.f32.partialorder %v563_v15, 0.0  ;;  %v483_v19 = vadd.f32 %v765_v16, %v398_v54  ;;  %v595_v21 = vmul.f32 %v593_v12, %v563_v15  ;;  %v766_v22 = vpop.f32.mrb[12].mxu0 }
 0x16d   :  { %v767_v23 = vpop.f32.mrb[13].mxu0 }
 0x16e   :  { %v810_v24 = vpop.f32.mrb[12].mxu1  ;;  %v568_v25 = vadd.f32 %v809_v18, %v483_v19  ;;  %v599_v27 = vsel %vm582_vm0, %v563_v15, %v595_v21  ;;  %v768_v28 = vadd.f32 %v767_v23, %v766_v22 }
 0x16f   :  { %v811_v29 = vpop.f32.mrb[13].mxu1  ;;  %v610_v30 = vmul.f32 %v638_v20, %v599_v27 }
 0x170   :  { %v812_v31 = vadd.f32 %v811_v29, %v810_v24  ;;  %vm583_vm1 = vcmp.ge.f32.partialorder %v568_v25, 0.0  ;;  %v596_v32 = vmul.f32 %v593_v12, %v568_v25  ;;  %v488_v33 = vadd.f32 %v768_v28, %v403_v62  ;;  %v769_v34 = vpop.f32.mrb[14].mxu0 }
 0x171   :  { %v621_v35 = vadd.f32 %v639_v26, %v610_v30  ;;  %v770_v36 = vpop.f32.mrb[15].mxu0 }
 0x172   :  { %v813_v37 = vpop.f32.mrb[14].mxu1  ;;  %v600_v38 = vsel %vm583_vm1, %v568_v25, %v596_v32  ;;  %v573_v39 = vadd.f32 %v812_v31, %v488_v33  ;;  %v771_v40 = vadd.f32 %v770_v36, %v769_v34 }
 0x173   :  { %v814_v41 = vpop.f32.mrb[15].mxu1  ;;  %v611_v42 = vmul.f32 %v638_v20, %v600_v38  ;;  %625 = vst [vmem:[%s1260_s6] sm:$0xff] %v621_v35 }
 0x174   :  { %v815_v43 = vadd.f32 %v814_v41, %v813_v37  ;;  %vm584_vm2 = vcmp.ge.f32.partialorder %v573_v39, 0.0  ;;  %v597_v44 = vmul.f32 %v593_v12, %v573_v39  ;;  %v493_v45 = vadd.f32 %v771_v40, %v408_v3 }
 0x175   :  { %v622_v46 = vadd.f32 %v639_v26, %v611_v42 }
 0x176   :  { %v601_v47 = vsel %vm584_vm2, %v573_v39, %v597_v44  ;;  %v578_v48 = vadd.f32 %v815_v43, %v493_v45 }
 0x177   :  { %626 = vst [vmem:[%s1260_s6 + $0x8] sm:$0xff] %v622_v46  ;;  %v612_v49 = vmul.f32 %v638_v20, %v601_v47 }
 0x178   :  { %vm585_vm3 = vcmp.ge.f32.partialorder %v578_v48, 0.0  ;;  %v598_v50 = vmul.f32 %v593_v12, %v578_v48 }
 0x179   :  { %v623_v51 = vadd.f32 %v639_v26, %v612_v49 }
 0x17a   :  { %v602_v52 = vsel %vm585_vm3, %v578_v48, %v598_v50 }
 0x17b   :  { %627 = vst [vmem:[%s1260_s6 + $0x10] sm:$0xff] %v623_v51  ;;  %v613_v53 = vmul.f32 %v638_v20, %v602_v52 }
 0x17d   :  { %v624_v54 = vadd.f32 %v639_v26, %v613_v53 }
 0x17f   :  { %628 = vst [vmem:[%s1260_s6 + $0x18] sm:$0xff] %v624_v54 }
 0x180   :  { %633 = vsyncpa [#allocation4], 1 }
 0x181   :  { %634 = vsyncpa [#allocation6], 1 }
 0x182   :  { %635 = vsyncpa [#allocation9], 1 }

// kernel: cblane_forward.13
= control target key start
LH: loop header
LB: loop body
LE: loop exit
PB: predicated region body
PF: predicated region fallthrough
CT: control target
= control target key end

     0   :  { %s546_s0 = inlined_call_operand.vmem [shape: f32[30,32], index: 0, kind: input, shape index: {}]   ;;  %s547_s1 = inlined_call_operand.hbm [shape: f32[32,256], index: 1, kind: input, shape index: {}]   ;;  %s548_s2 = inlined_call_operand.hbm [shape: f32[1,256], index: 2, kind: input, shape index: {}]   ;;  %s549_s3 = inlined_call_operand.<no memory space> [shape: f32[1,1], index: 3, kind: input, shape index: {}]   ;;  %s550_s4 = inlined_call_operand.hbm [shape: f32[1,256], index: 4, kind: input, shape index: {}]   ;;  %s551_s5 = inlined_call_operand.hbm [shape: f32[1,256], index: 5, kind: input, shape index: {}]   ;;  %s552_s6 = inlined_call_operand.vmem [shape: f32[30,256], index: 6, kind: output, shape index: {}]  }
   0x1   :  { %v11_v0 = vstv %s549_s3 }
   0x2   :  { %12 = vst [vmem:[#allocation2] sm:$0x1] %v11_v0 }
   0x3   :  { %13 = vsyncpa [#allocation4], 0 }
   0x4   :  { %14 = vsyncpa [#allocation6], 0 }
   0x5   :  { %15 = vsyncpa [#allocation9], 0  ;;  %s409_s23 = smov [#allocation5]   ;;  %s410_s25 = smov [#allocation3]  }
   0x6   :  { %s36_s24 = sshll.u32 %s409_s23, 4  ;;  %s23_s26 = sshll.u32 %s410_s25, 4  ;;  %s37_s24 = int_to_ptr.vmem [resolvable:$true] %s36_s24  ;;  %s455_s26 = int_to_ptr.vmem [resolvable:$true] %s23_s26 }
   0x7   :  { %s315_s29 = scalar_lea.hbm %s548_s2, 32 }
   0x8   :  { %p316_p0 = scmp.ne.s32.totalorder %s548_s2, %s315_s29  ;;  %p319_p1 = scmp.lt.u32.totalorder %s315_s29, %s548_s2 }
   0xa   :  { %p321_p2 = pnand %p319_p1, %p316_p0 }
   0xc   :  { %324 = shalt.err (!%p321_p2)
}
   0xd   :  { %s325_s9 = scalar_lea.vmem %s37_s24, 32  ;;  %p330_p4 = scmp.lt.s32.totalorder %s37_s24, %s37_s24 }
   0xe   :  { %p326_p3 = scmp.ne.s32.totalorder %s37_s24, %s325_s9  ;;  %p331_p5 = scmp.lt.s32.totalorder %s325_s9, %s325_s9 }
  0x10   :  { %p332_p6 = por %p331_p5, %p330_p4 }
  0x12   :  { %p333_p7 = pnand %p332_p6, %p326_p3 }
  0x14   :  { %336 = shalt.err (!%p333_p7)
}
  0x15   :  { %39 = dma.hbm_to_vmem [thread:$0]  %s548_s2, 32, %s37_s24, [#allocation6]  }
  0x16   :  { %s337_s14 = scalar_lea.hbm %s547_s1, 1024 }
  0x17   :  { %p338_p8 = scmp.ne.s32.totalorder %s547_s1, %s337_s14  ;;  %p341_p9 = scmp.lt.u32.totalorder %s337_s14, %s547_s1 }
  0x19   :  { %p343_p10 = pnand %p341_p9, %p338_p8 }
  0x1b   :  { %346 = shalt.err (!%p343_p10)
}
  0x1c   :  { %s347_s19 = scalar_lea.vmem %s455_s26, 1024  ;;  %p352_p12 = scmp.lt.s32.totalorder %s455_s26, %s455_s26 }
  0x1d   :  { %p348_p11 = scmp.ne.s32.totalorder %s455_s26, %s347_s19  ;;  %p353_p13 = scmp.lt.s32.totalorder %s347_s19, %s347_s19 }
  0x1f   :  { %p354_p0 = por %p353_p13, %p352_p12 }
  0x21   :  { %p355_p1 = pnand %p354_p0, %p348_p11 }
  0x23   :  { %358 = shalt.err (!%p355_p1)
}
  0x24   :  { %s411_s2 = smov 256   ;;  %s412_s20 = smov 16  }
  0x25   :  { %29 = dma.hbm_to_vmem [thread:$0]  %s547_s1, 1024, %s455_s26, [#allocation4], %s411_s2, %s411_s2, %s412_s20  }
  0x26   :  { %s413_s23 = smov [#allocation7]   ;;  %s414_s25 = smov [#allocation8]  }
  0x27   :  { %s48_s24 = sshll.u32 %s413_s23, 4  ;;  %s58_s27 = sshll.u32 %s414_s25, 4  ;;  %s49_s24 = int_to_ptr.vmem [resolvable:$true] %s48_s24  ;;  %s59_s27 = int_to_ptr.vmem [resolvable:$true] %s58_s27 }
  0x28   :  { %s359_s30 = scalar_lea.hbm %s550_s4, 32 }
  0x29   :  { %p360_p2 = scmp.ne.s32.totalorder %s550_s4, %s359_s30  ;;  %p363_p3 = scmp.lt.u32.totalorder %s359_s30, %s550_s4 }
  0x2b   :  { %p365_p4 = pnand %p363_p3, %p360_p2 }
  0x2d   :  { %368 = shalt.err (!%p365_p4)
}
  0x2e   :  { %s369_s1 = scalar_lea.vmem %s49_s24, 32  ;;  %p374_p6 = scmp.lt.s32.totalorder %s49_s24, %s49_s24 }
  0x2f   :  { %p370_p5 = scmp.ne.s32.totalorder %s49_s24, %s369_s1  ;;  %p375_p7 = scmp.lt.s32.totalorder %s369_s1, %s369_s1 }
  0x31   :  { %p376_p8 = por %p375_p7, %p374_p6 }
  0x33   :  { %p377_p9 = pnand %p376_p8, %p370_p5 }
  0x35   :  { %380 = shalt.err (!%p377_p9)
}
  0x36   :  { %51 = dma.hbm_to_vmem [thread:$0]  %s550_s4, 32, %s49_s24, [#allocation6]  }
  0x37   :  { %s381_s13 = scalar_lea.hbm %s551_s5, 32 }
  0x38   :  { %p382_p10 = scmp.ne.s32.totalorder %s551_s5, %s381_s13  ;;  %p385_p11 = scmp.lt.u32.totalorder %s381_s13, %s551_s5 }
  0x3a   :  { %p387_p12 = pnand %p385_p11, %p382_p10 }
  0x3c   :  { %390 = shalt.err (!%p387_p12)
}
  0x3d   :  { %s391_s18 = scalar_lea.vmem %s59_s27, 32  ;;  %p396_p0 = scmp.lt.s32.totalorder %s59_s27, %s59_s27 }
  0x3e   :  { %p392_p13 = scmp.ne.s32.totalorder %s59_s27, %s391_s18  ;;  %p397_p1 = scmp.lt.s32.totalorder %s391_s18, %s391_s18 }
  0x40   :  { %p398_p2 = por %p397_p1, %p396_p0 }
  0x42   :  { %p399_p3 = pnand %p398_p2, %p392_p13 }
  0x44   :  { %402 = shalt.err (!%p399_p3)
}
  0x45   :  { %61 = dma.hbm_to_vmem [thread:$0]  %s551_s5, 32, %s59_s27, [#allocation9]  }
  0x46   :  { %403 = dma.done.wait [#allocation4], 1024  }
  0x47   :  { %404 = vsyncadd [#allocation4], 4294966272 }
  0x48   :  { %405 = dma.done.wait [#allocation6], 64  }
  0x49   :  { %406 = vsyncadd [#allocation6], 4294967232 }
  0x4a   :  { %407 = dma.done.wait [#allocation9], 32  }
  0x4b   :  { %408 = vsyncadd [#allocation9], 4294967264  ;;  %v415_v1 = vmov 0.0   ;;  %v416_v2 = vmov 0   ;;  %v79_v3 = vld [vmem:[#allocation3 + $0x8] sm:$0xff]  ;;  %v81_v4 = vld [vmem:[#allocation3 + $0x18] sm:$0xff]  ;;  %v88_v20 = vlaneseq }
  0x4c   :  { %175 = vmatprep.mubr.f32.mxu0 %v415_v1  ;;  %187 = vmatprep.mubr.f32.mxu1 %v415_v1  ;;  %v78_v5 = vld [vmem:[#allocation3] sm:$0xff]  ;;  %v294_v6 = vpack.c.bf16 %v81_v4, %v79_v3  ;;  %v80_v7 = vld [vmem:[#allocation3 + $0x10] sm:$0xff]  ;;  %v83_v8 = vld [vmem:[#allocation3 + $0x28] sm:$0xff]  ;;  %vm98_vm0 = vcmask 261120  }
  0x4d   :  { %314 = vset.pattern.permute.xlu0 %v416_v2  ;;  %v85_v9 = vld [vmem:[#allocation3 + $0x38] sm:$0xff]  ;;  %v296_v10 = vpack.c.bf16 %v80_v7, %v78_v5  ;;  %v82_v12 = vld [vmem:[#allocation3 + $0x20] sm:$0xff]  ;;  %v84_v13 = vld [vmem:[#allocation3 + $0x30] sm:$0xff]  ;;  %v89_v21 = vshrl.u32 %v88_v20, 7 }
  0x4e   :  { %v298_v11 = vpack.c.bf16 %v85_v9, %v83_v8  ;;  %295 = vmatprep.subr.bf16.mxu0 %v294_v6  ;;  %302 = vmatprep.subr.bf16.mxu1 %v294_v6  ;;  %v300_v14 = vpack.c.bf16 %v84_v13, %v82_v12  ;;  %v293_v15 = vld [vmem:[#allocation2] ss:$0 sm:$0xff]  ;;  %v76_v17 = vld [vmem:[%s546_s0 + $0x10] sm:$0xff]  ;;  %v75_v18 = vld [vmem:[%s546_s0 + $0x8] sm:$0xff] }
  0x4f   :  { %297 = vmatpush1.bf16.msra.mxu0 %v296_v10  ;;  %304 = vmatpush1.bf16.msra.mxu1 %v296_v10  ;;  %v74_v16 = vld [vmem:[%s546_s0] sm:$0xff]  ;;  %v77_v19 = vld [vmem:[%s546_s0 + $0x18] sm:$0x3f]  ;;  %v90_v22 = vsub.s32 0, %v89_v21  ;;  %v94_v24 = vsub.s32 1, %v89_v21 }
  0x50   :  { %299 = vmatprep.subr.bf16.mxu0 %v298_v11  ;;  %303 = vmatprep.subr.bf16.mxu1 %v298_v11  ;;  %v86_v23 = vld [vmem:[#allocation5] sm:$0x3]  ;;  %v234_v27 = vld [vmem:[#allocation7] sm:$0x3]  ;;  %v254_v28 = vld [vmem:[#allocation8] sm:$0x3] }
  0x51   :  { %215 = vperm.xlu0 %314, %v293_v15   ;;  %v91_v25 = vrot.slane %v86_v23, %v90_v22  ;;  %v95_v26 = vrot.slane %v86_v23, %v94_v24  ;;  %v239_v36 = vrot.slane %v234_v27, %v90_v22  ;;  %v259_v37 = vrot.slane %v254_v28, %v90_v22 }
  0x52   :  { %v243_v40 = vrot.slane %v234_v27, %v94_v24  ;;  %v263_v41 = vrot.slane %v254_v28, %v94_v24 }
  0x53   :  { %301 = vmatpush1.bf16.msra.mxu0 %v300_v14  ;;  %305 = vmatpush1.bf16.msra.mxu1 %v300_v14 }
  0x56   :  { %289 = vmatmul.mubr.msk.f32.vlgmr.msra.gmra.mrb[0].mxu0 %vm98_vm0, %v74_v16  ;;  %291 = vmatmul.mubr.msk.f32.vlgmr.msra.gmra.mrb[0].mxu1 %vm98_vm0, %v76_v17 }
  0x57   :  { %181 = vmatprep.mubr.f32.mxu0 %v415_v1  ;;  %193 = vmatprep.mubr.f32.mxu1 %v415_v1 }
  0x5a   :  { %290 = vmatmul.mubr.msk.f32.gmra.mrb[2].mxu0 %vm98_vm0, %v75_v18  ;;  %292 = vmatmul.mubr.msk.f32.gmra.mrb[2].mxu1 %vm98_vm0, %v77_v19 }
  0xd0   :  { %v216_v29 = vpop.permute.xlu0 %215 }
 0x129   :  { %v177_v30 = vpop.f32.mrb[0].mxu0  ;;  %v189_v31 = vpop.f32.mrb[0].mxu1 }
 0x12a   :  { %v178_v32 = vadd.f32 %v177_v30, %v91_v25  ;;  %v190_v33 = vadd.f32 %v189_v31, %v91_v25  ;;  %v179_v34 = vpop.f32.mrb[1].mxu0  ;;  %v191_v35 = vpop.f32.mrb[1].mxu1 }
 0x12b   :  { %v180_v38 = vadd.f32 %v179_v34, %v95_v26  ;;  %v192_v39 = vadd.f32 %v191_v35, %v95_v26 }
 0x12c   :  { %vm201_vm1 = vcmp.ge.f32.partialorder %v178_v32, 0.0  ;;  %vm205_vm2 = vcmp.ge.f32.partialorder %v190_v33, 0.0  ;;  %v218_v42 = vmul.f32 %v216_v29, %v178_v32  ;;  %v222_v43 = vmul.f32 %v216_v29, %v190_v33 }
 0x12d   :  { %vm202_vm3 = vcmp.ge.f32.partialorder %v180_v38, 0.0  ;;  %vm206_vm4 = vcmp.ge.f32.partialorder %v192_v39, 0.0  ;;  %v219_v44 = vmul.f32 %v216_v29, %v180_v38  ;;  %v223_v45 = vmul.f32 %v216_v29, %v192_v39  ;;  %v183_v46 = vpop.f32.mrb[2].mxu0  ;;  %v195_v47 = vpop.f32.mrb[2].mxu1 }
 0x12e   :  { %v226_v48 = vsel %vm201_vm1, %v178_v32, %v218_v42  ;;  %v230_v49 = vsel %vm205_vm2, %v190_v33, %v222_v43  ;;  %v184_v50 = vadd.f32 %v183_v46, %v91_v25  ;;  %v196_v51 = vadd.f32 %v195_v47, %v91_v25  ;;  %v185_v52 = vpop.f32.mrb[3].mxu0  ;;  %v197_v53 = vpop.f32.mrb[3].mxu1 }
 0x12f   :  { %v227_v54 = vsel %vm202_vm3, %v180_v38, %v219_v44  ;;  %v231_v55 = vsel %vm206_vm4, %v192_v39, %v223_v45  ;;  %v246_v56 = vmul.f32 %v239_v36, %v226_v48  ;;  %v250_v57 = vmul.f32 %v239_v36, %v230_v49 }
 0x130   :  { %vm203_vm5 = vcmp.ge.f32.partialorder %v184_v50, 0.0  ;;  %v220_v58 = vmul.f32 %v216_v29, %v184_v50  ;;  %vm207_vm6 = vcmp.ge.f32.partialorder %v196_v51, 0.0  ;;  %v224_v59 = vmul.f32 %v216_v29, %v196_v51 }
 0x131   :  { %v266_v60 = vadd.f32 %v259_v37, %v246_v56  ;;  %v270_v61 = vadd.f32 %v259_v37, %v250_v57  ;;  %v186_v62 = vadd.f32 %v185_v52, %v95_v26  ;;  %v247_v63 = vmul.f32 %v243_v40, %v227_v54 }
 0x132   :  { %v228_v0 = vsel %vm203_vm5, %v184_v50, %v220_v58  ;;  %v232_v1 = vsel %vm207_vm6, %v196_v51, %v224_v59  ;;  %v251_v2 = vmul.f32 %v243_v40, %v231_v55  ;;  %v198_v3 = vadd.f32 %v197_v53, %v95_v26 }
 0x133   :  { %v248_v4 = vmul.f32 %v239_v36, %v228_v0  ;;  %274 = vst [vmem:[%s552_s6] sm:$0xff] %v266_v60  ;;  %278 = vst [vmem:[%s552_s6 + $0x20] sm:$0xff] %v270_v61  ;;  %v252_v5 = vmul.f32 %v239_v36, %v232_v1  ;;  %vm204_vm7 = vcmp.ge.f32.partialorder %v186_v62, 0.0  ;;  %v221_v6 = vmul.f32 %v216_v29, %v186_v62 }
 0x134   :  { %v267_v7 = vadd.f32 %v263_v41, %v247_v63  ;;  %v271_v8 = vadd.f32 %v263_v41, %v251_v2  ;;  %vm208_vm8 = vcmp.ge.f32.partialorder %v198_v3, 0.0  ;;  %v225_v9 = vmul.f32 %v216_v29, %v198_v3 }
 0x135   :  { %v268_v10 = vadd.f32 %v259_v37, %v248_v4  ;;  %v272_v11 = vadd.f32 %v259_v37, %v252_v5  ;;  %v229_v12 = vsel %vm204_vm7, %v186_v62, %v221_v6 }
 0x136   :  { %v249_v13 = vmul.f32 %v243_v40, %v229_v12  ;;  %275 = vst [vmem:[%s552_s6 + $0x8] sm:$0xff] %v267_v7  ;;  %279 = vst [vmem:[%s552_s6 + $0x28] sm:$0xff] %v271_v8  ;;  %v233_v14 = vsel %vm208_vm8, %v198_v3, %v225_v9 }
 0x137   :  { %276 = vst [vmem:[%s552_s6 + $0x10] sm:$0xff] %v268_v10  ;;  %280 = vst [vmem:[%s552_s6 + $0x30] sm:$0x3f] %v272_v11  ;;  %v253_v15 = vmul.f32 %v243_v40, %v233_v14 }
 0x138   :  { %v269_v16 = vadd.f32 %v263_v41, %v249_v13 }
 0x139   :  { %v273_v17 = vadd.f32 %v263_v41, %v253_v15 }
 0x13a   :  { %277 = vst [vmem:[%s552_s6 + $0x18] sm:$0xff] %v269_v16 }
 0x13b   :  { %281 = vst [vmem:[%s552_s6 + $0x38] sm:$0x3f] %v273_v17 }
 0x13c   :  { %286 = vsyncpa [#allocation4], 1 }
 0x13d   :  { %287 = vsyncpa [#allocation6], 1 }
 0x13e   :  { %288 = vsyncpa [#allocation9], 1 }

// kernel: cblane_forward.15
= control target key start
LH: loop header
LB: loop body
LE: loop exit
PB: predicated region body
PF: predicated region fallthrough
CT: control target
= control target key end

     0   :  { %s518_s0 = inlined_call_operand.vmem [shape: f32[34,256], index: 0, kind: input, shape index: {}]   ;;  %s519_s1 = inlined_call_operand.vmem [shape: f32[256,64], index: 1, kind: input, shape index: {}]   ;;  %s520_s2 = inlined_call_operand.hbm [shape: f32[1,64], index: 2, kind: input, shape index: {}]   ;;  %s521_s3 = inlined_call_operand.<no memory space> [shape: f32[1,1], index: 3, kind: input, shape index: {}]   ;;  %s522_s4 = inlined_call_operand.vmem [shape: f32[34,64], index: 4, kind: output, shape index: {}]  }
   0x1   :  { %v9_v0 = vstv %s521_s3 }
   0x2   :  { %10 = vst [vmem:[#allocation2] sm:$0x1] %v9_v0 }
   0x3   :  { %11 = vsyncpa [#allocation4], 0  ;;  %s331_s17 = smov [#allocation3]   ;;  %s307_s21 = scalar_lea.hbm %s520_s2, 16 }
   0x4   :  { %s22_s18 = sshll.u32 %s331_s17, 4  ;;  %p308_p0 = scmp.ne.s32.totalorder %s520_s2, %s307_s21  ;;  %s23_s18 = int_to_ptr.vmem [resolvable:$true] %s22_s18 }
   0x5   :  { %p311_p1 = scmp.lt.u32.totalorder %s307_s21, %s520_s2 }
   0x7   :  { %p313_p2 = pnand %p311_p1, %p308_p0 }
   0x9   :  { %316 = shalt.err (!%p313_p2)
}
   0xa   :  { %s317_s3 = scalar_lea.vmem %s23_s18, 16  ;;  %s321_s26 = scalar_lea.vmem %s23_s18, 32 }
   0xb   :  { %p318_p3 = scmp.ne.s32.totalorder %s23_s18, %s317_s3  ;;  %p322_p4 = scmp.lt.s32.totalorder %s23_s18, %s23_s18 }
   0xc   :  { %p323_p5 = scmp.lt.s32.totalorder %s321_s26, %s317_s3 }
   0xe   :  { %p324_p6 = por %p323_p5, %p322_p4 }
  0x10   :  { %p325_p7 = pnand %p324_p6, %p318_p3 }
  0x12   :  { %328 = shalt.err (!%p325_p7)
}
  0x13   :  { %25 = dma.hbm_to_vmem [thread:$0]  %s520_s2, 16, %s23_s18, [#allocation4]  }
  0x14   :  { %329 = dma.done.wait [#allocation4], 16  }
  0x15   :  { %330 = vsyncadd [#allocation4], 4294967280  ;;  %v332_v1 = vmov 0   ;;  %v57_v2 = vld [vmem:[%s519_s1 + $0x80] sm:$0xff]  ;;  %v58_v3 = vld [vmem:[%s519_s1 + $0x88] sm:$0xff]  ;;  %vm195_vm0 = vcmask 523264  }
  0x16   :  { %306 = vset.pattern.permute.xlu0 %v332_v1  ;;  %v41_v4 = vld [vmem:[%s519_s1] sm:$0xff]  ;;  %v256_v5 = vpack.c.bf16 %v58_v3, %v57_v2  ;;  %v42_v6 = vld [vmem:[%s519_s1 + $0x8] sm:$0xff]  ;;  %v59_v7 = vld [vmem:[%s519_s1 + $0x90] sm:$0xff]  ;;  %vm200_vm3 = vcmask 517120  }
  0x17   :  { %v60_v8 = vld [vmem:[%s519_s1 + $0x98] sm:$0xff]  ;;  %v258_v9 = vpack.c.bf16 %v42_v6, %v41_v4  ;;  %v43_v11 = vld [vmem:[%s519_s1 + $0x10] sm:$0xff]  ;;  %v61_v13 = vld [vmem:[%s519_s1 + $0xa0] sm:$0xff] }
  0x18   :  { %v260_v10 = vpack.c.bf16 %v60_v8, %v59_v7  ;;  %v44_v12 = vld [vmem:[%s519_s1 + $0x18] sm:$0xff]  ;;  %257 = vmatprep.subr.bf16.mxu0 %v256_v5  ;;  %288 = vmatprep.subr.bf16.mxu1 %v256_v5  ;;  %v62_v14 = vld [vmem:[%s519_s1 + $0xa8] sm:$0xff]  ;;  %v45_v17 = vld [vmem:[%s519_s1 + $0x20] sm:$0xff] }
  0x19   :  { %259 = vmatpush3.bf16.msra.mxu0 %v258_v9  ;;  %296 = vmatpush3.bf16.msra.mxu1 %v258_v9  ;;  %v262_v15 = vpack.c.bf16 %v44_v12, %v43_v11  ;;  %v264_v16 = vpack.c.bf16 %v62_v14, %v61_v13  ;;  %v46_v18 = vld [vmem:[%s519_s1 + $0x28] sm:$0xff]  ;;  %v63_v19 = vld [vmem:[%s519_s1 + $0xb0] sm:$0xff]  ;;  %v64_v20 = vld [vmem:[%s519_s1 + $0xb8] sm:$0xff] }
  0x1a   :  { %261 = vmatprep.subr.bf16.mxu0 %v260_v10  ;;  %289 = vmatprep.subr.bf16.mxu1 %v260_v10  ;;  %v266_v21 = vpack.c.bf16 %v46_v18, %v45_v17  ;;  %v268_v22 = vpack.c.bf16 %v64_v20, %v63_v19  ;;  %v47_v23 = vld [vmem:[%s519_s1 + $0x30] sm:$0xff]  ;;  %v48_v24 = vld [vmem:[%s519_s1 + $0x38] sm:$0xff]  ;;  %v65_v25 = vld [vmem:[%s519_s1 + $0xc0] sm:$0xff] }
  0x1b   :  { %v66_v26 = vld [vmem:[%s519_s1 + $0xc8] sm:$0xff]  ;;  %v38_v28 = vld [vmem:[%s518_s0 + $0x38] sm:$0xff]  ;;  %v270_v29 = vpack.c.bf16 %v48_v24, %v47_v23  ;;  %v49_v31 = vld [vmem:[%s519_s1 + $0x40] sm:$0xff] }
  0x1c   :  { %v32_v27 = vld [vmem:[%s518_s0 + $0x8] sm:$0xff]  ;;  %v272_v30 = vpack.c.bf16 %v66_v26, %v65_v25  ;;  %v67_v33 = vld [vmem:[%s519_s1 + $0xd0] sm:$0xff]  ;;  %v68_v34 = vld [vmem:[%s519_s1 + $0xd8] sm:$0xff]  ;;  %159 = vmatprep.mubr.f32.mxu1 %v38_v28 }
  0x1d   :  { %263 = vmatpush3.bf16.msra.mxu0 %v262_v15  ;;  %297 = vmatpush3.bf16.msra.mxu1 %v262_v15  ;;  %v50_v32 = vld [vmem:[%s519_s1 + $0x48] sm:$0xff]  ;;  %v208_v35 = vld [vmem:[#allocation2] ss:$0 sm:$0xff]  ;;  %v276_v37 = vpack.c.bf16 %v68_v34, %v67_v33  ;;  %v51_v38 = vld [vmem:[%s519_s1 + $0x50] sm:$0xff] }
  0x1e   :  { %265 = vmatprep.subr.bf16.mxu0 %v264_v16  ;;  %290 = vmatprep.subr.bf16.mxu1 %v264_v16  ;;  %v274_v36 = vpack.c.bf16 %v50_v32, %v49_v31  ;;  %v52_v39 = vld [vmem:[%s519_s1 + $0x58] sm:$0xff]  ;;  %v69_v40 = vld [vmem:[%s519_s1 + $0xe0] sm:$0xff]  ;;  %v70_v41 = vld [vmem:[%s519_s1 + $0xe8] sm:$0xff] }
  0x1f   :  { %144 = vmatprep.mubr.f32.mxu0 %v32_v27  ;;  %182 = vperm.xlu0 %306, %v208_v35   ;;  %v278_v42 = vpack.c.bf16 %v52_v39, %v51_v38  ;;  %v280_v43 = vpack.c.bf16 %v70_v41, %v69_v40  ;;  %v53_v44 = vld [vmem:[%s519_s1 + $0x60] sm:$0xff]  ;;  %v54_v45 = vld [vmem:[%s519_s1 + $0x68] sm:$0xff]  ;;  %v71_v46 = vld [vmem:[%s519_s1 + $0xf0] sm:$0xff] }
  0x20   :  { %v72_v47 = vld [vmem:[%s519_s1 + $0xf8] sm:$0xff]  ;;  %v282_v48 = vpack.c.bf16 %v54_v45, %v53_v44  ;;  %v55_v50 = vld [vmem:[%s519_s1 + $0x70] sm:$0xff]  ;;  %v31_v53 = vld [vmem:[%s518_s0] sm:$0xff] }
  0x21   :  { %267 = vmatpush3.bf16.msra.mxu0 %v266_v21  ;;  %298 = vmatpush3.bf16.msra.mxu1 %v266_v21  ;;  %v284_v49 = vpack.c.bf16 %v72_v47, %v71_v46  ;;  %v56_v51 = vld [vmem:[%s519_s1 + $0x78] sm:$0xff]  ;;  %v37_v54 = vld [vmem:[%s518_s0 + $0x30] sm:$0xff]  ;;  %v40_v56 = vld [vmem:[%s518_s0 + $0x48] sm:$0x3] }
  0x22   :  { %269 = vmatprep.subr.bf16.mxu0 %v268_v22  ;;  %291 = vmatprep.subr.bf16.mxu1 %v268_v22  ;;  %v286_v52 = vpack.c.bf16 %v56_v51, %v55_v50  ;;  %v34_v55 = vld [vmem:[%s518_s0 + $0x18] sm:$0xff]  ;;  %v33_v57 = vld [vmem:[%s518_s0 + $0x10] sm:$0xff]  ;;  %v39_v58 = vld [vmem:[%s518_s0 + $0x40] sm:$0x3] }
  0x23   :  { %v36_v59 = vld [vmem:[%s518_s0 + $0x28] sm:$0xff]  ;;  %v35_v60 = vld [vmem:[%s518_s0 + $0x20] sm:$0xff] }
  0x24   :  { %v207_v63 = vld [vmem:[#allocation3] ss:$0 sm:$0xff] }
  0x25   :  { %271 = vmatpush3.bf16.msra.mxu0 %v270_v29  ;;  %299 = vmatpush3.bf16.msra.mxu1 %v270_v29 }
  0x26   :  { %273 = vmatprep.subr.bf16.mxu0 %v272_v30  ;;  %292 = vmatprep.subr.bf16.mxu1 %v272_v30 }
  0x29   :  { %275 = vmatpush3.bf16.msra.mxu0 %v274_v36  ;;  %300 = vmatpush3.bf16.msra.mxu1 %v274_v36 }
  0x2a   :  { %277 = vmatprep.subr.bf16.mxu0 %v276_v37  ;;  %293 = vmatprep.subr.bf16.mxu1 %v276_v37 }
  0x2d   :  { %279 = vmatpush3.bf16.msra.mxu0 %v278_v42  ;;  %301 = vmatpush3.bf16.msra.mxu1 %v278_v42 }
  0x2e   :  { %281 = vmatprep.subr.bf16.mxu0 %v280_v43  ;;  %294 = vmatprep.subr.bf16.mxu1 %v280_v43 }
  0x31   :  { %283 = vmatpush3.bf16.msra.mxu0 %v282_v48  ;;  %302 = vmatpush3.bf16.msra.mxu1 %v282_v48 }
  0x32   :  { %285 = vmatprep.subr.bf16.mxu0 %v284_v49  ;;  %295 = vmatprep.subr.bf16.mxu1 %v284_v49 }
  0x35   :  { %287 = vmatpush3.bf16.msra.mxu0 %v286_v52  ;;  %303 = vmatpush3.bf16.msra.mxu1 %v286_v52 }
  0x38   :  { %145 = vmatmul.mubr.f32.vlgmr.msra.gmra.mrb[0].mxu0 %v31_v53  ;;  %160 = vmatmul.mubr.f32.vlgmr.msra.gmra.mrb[0].mxu1 %v37_v54 }
  0x39   :  { %149 = vmatprep.mubr.f32.mxu0 %v34_v55  ;;  %164 = vmatprep.mubr.f32.mxu1 %v40_v56 }
  0x3c   :  { %150 = vmatmul.mubr.f32.gmra.mrb[2].mxu0 %v33_v57  ;;  %165 = vmatmul.mubr.f32.gmra.mrb[2].mxu1 %v39_v58 }
  0x3d   :  { %154 = vmatprep.mubr.f32.mxu0 %v36_v59 }
  0x40   :  { %155 = vmatmul.mubr.f32.gmra.mrb[4].mxu0 %v35_v60 }
  0x9e   :  { %v183_v4 = vpop.permute.xlu0 %182 }
 0x10b   :  { %v241_v61 = vpop.f32.mrb[0].mxu0  ;;  %v250_v62 = vpop.f32.mrb[0].mxu1 }
 0x10c   :  { %v242_v0 = vpop.f32.mrb[1].mxu0  ;;  %v251_v1 = vpop.f32.mrb[1].mxu1 }
 0x10d   :  { %v243_v2 = vadd.f32 %v242_v0, %v241_v61  ;;  %v252_v3 = vadd.f32 %v251_v1, %v250_v62 }
 0x10f   :  { %v147_v5 = vadd.f32 %v243_v2, %v207_v63  ;;  %v162_v6 = vadd.f32 %v252_v3, %v207_v63  ;;  %v244_v7 = vpop.f32.mrb[2].mxu0  ;;  %v253_v8 = vpop.f32.mrb[2].mxu1 }
 0x110   :  { %v245_v9 = vpop.f32.mrb[3].mxu0  ;;  %v254_v10 = vpop.f32.mrb[3].mxu1 }
 0x111   :  { %vm171_vm1 = vcmp.ge.f32.partialorder %v147_v5, 0.0  ;;  %vm174_vm2 = vcmp.ge.f32.partialorder %v162_v6, 0.0  ;;  %v185_v11 = vmul.f32 %v183_v4, %v147_v5  ;;  %v188_v12 = vmul.f32 %v183_v4, %v162_v6 }
 0x112   :  { %v246_v13 = vadd.f32 %v245_v9, %v244_v7  ;;  %v255_v14 = vadd.f32 %v254_v10, %v253_v8 }
 0x113   :  { %v190_v15 = vsel %vm171_vm1, %v147_v5, %v185_v11  ;;  %v193_v16 = vsel %vm174_vm2, %v162_v6, %v188_v12  ;;  %v247_v17 = vpop.f32.mrb[4].mxu0 }
 0x114   :  { %196 = vst.msk [vmem:[%s522_s4] sm:$0xff] %vm195_vm0, %v190_v15  ;;  %199 = vst.msk [vmem:[%s522_s4 + $0x18] sm:$0xff] %vm195_vm0, %v193_v16  ;;  %v152_v18 = vadd.f32 %v246_v13, %v207_v63  ;;  %v167_v19 = vadd.f32 %v255_v14, %v207_v63  ;;  %v248_v20 = vpop.f32.mrb[5].mxu0 }
 0x115   :  { %v249_v21 = vadd.f32 %v248_v20, %v247_v17 }
 0x116   :  { %vm172_vm4 = vcmp.ge.f32.partialorder %v152_v18, 0.0  ;;  %v186_v22 = vmul.f32 %v183_v4, %v152_v18  ;;  %vm175_vm5 = vcmp.ge.f32.partialorder %v167_v19, 0.0  ;;  %v189_v23 = vmul.f32 %v183_v4, %v167_v19 }
 0x117   :  { %v157_v24 = vadd.f32 %v249_v21, %v207_v63 }
 0x118   :  { %v191_v25 = vsel %vm172_vm4, %v152_v18, %v186_v22  ;;  %v194_v26 = vsel %vm175_vm5, %v167_v19, %v189_v23 }
 0x119   :  { %197 = vst.msk [vmem:[%s522_s4 + $0x8] sm:$0xff] %vm195_vm0, %v191_v25  ;;  %vm173_vm6 = vcmp.ge.f32.partialorder %v157_v24, 0.0  ;;  %v187_v27 = vmul.f32 %v183_v4, %v157_v24 }
 0x11a   :  { %201 = vst.msk [vmem:[%s522_s4 + $0x20] sm:$0x3] %vm200_vm3, %v194_v26 }
 0x11b   :  { %v192_v28 = vsel %vm173_vm6, %v157_v24, %v187_v27 }
 0x11c   :  { %198 = vst.msk [vmem:[%s522_s4 + $0x10] sm:$0xff] %vm195_vm0, %v192_v28 }
 0x11d   :  { %206 = vsyncpa [#allocation4], 1 }

// kernel: cblane_forward.16
= control target key start
LH: loop header
LB: loop body
LE: loop exit
PB: predicated region body
PF: predicated region fallthrough
CT: control target
= control target key end

     0   :  { %8 = vsyncpa [#allocation3], 0  ;;  %s177_s0 = inlined_call_operand.vmem [shape: f32[16,64], index: 0, kind: input, shape index: {}]   ;;  %s178_s1 = inlined_call_operand.hbm [shape: f32[1,64], index: 1, kind: input, shape index: {}]   ;;  %s179_s2 = inlined_call_operand.hbm [shape: f32[1,64], index: 2, kind: input, shape index: {}]   ;;  %s180_s3 = inlined_call_operand.vmem [shape: f32[16,64], index: 3, kind: output, shape index: {}]  }
   0x1   :  { %9 = vsyncpa [#allocation5], 0  ;;  %s119_s12 = smov [#allocation2]   ;;  %s120_s14 = smov [#allocation4]  }
   0x2   :  { %s18_s13 = sshll.u32 %s119_s12, 4  ;;  %s28_s15 = sshll.u32 %s120_s14, 4  ;;  %s19_s13 = int_to_ptr.vmem [resolvable:$true] %s18_s13  ;;  %s29_s15 = int_to_ptr.vmem [resolvable:$true] %s28_s15 }
   0x3   :  { %s71_s18 = scalar_lea.hbm %s178_s1, 16 }
   0x4   :  { %p72_p0 = scmp.ne.s32.totalorder %s178_s1, %s71_s18  ;;  %p75_p1 = scmp.lt.u32.totalorder %s71_s18, %s178_s1 }
   0x6   :  { %p77_p2 = pnand %p75_p1, %p72_p0 }
   0x8   :  { %80 = shalt.err (!%p77_p2)
}
   0x9   :  { %s81_s23 = scalar_lea.vmem %s19_s13, 16  ;;  %s85_s24 = scalar_lea.vmem %s19_s13, 32 }
   0xa   :  { %p82_p3 = scmp.ne.s32.totalorder %s19_s13, %s81_s23  ;;  %p86_p4 = scmp.lt.s32.totalorder %s19_s13, %s19_s13 }
   0xb   :  { %p87_p5 = scmp.lt.s32.totalorder %s85_s24, %s81_s23 }
   0xd   :  { %p88_p6 = por %p87_p5, %p86_p4 }
   0xf   :  { %p89_p7 = pnand %p88_p6, %p82_p3 }
  0x11   :  { %92 = shalt.err (!%p89_p7)
}
  0x12   :  { %21 = dma.hbm_to_vmem [thread:$0]  %s178_s1, 16, %s19_s13, [#allocation3]  }
  0x13   :  { %s93_s29 = scalar_lea.hbm %s179_s2, 16 }
  0x14   :  { %p94_p8 = scmp.ne.s32.totalorder %s179_s2, %s93_s29  ;;  %p97_p9 = scmp.lt.u32.totalorder %s93_s29, %s179_s2 }
  0x16   :  { %p99_p10 = pnand %p97_p9, %p94_p8 }
  0x18   :  { %102 = shalt.err (!%p99_p10)
}
  0x19   :  { %s103_s7 = scalar_lea.vmem %s29_s15, 16  ;;  %s107_s8 = scalar_lea.vmem %s29_s15, 32 }
  0x1a   :  { %p104_p11 = scmp.ne.s32.totalorder %s29_s15, %s103_s7  ;;  %p108_p12 = scmp.lt.s32.totalorder %s29_s15, %s29_s15 }
  0x1b   :  { %p109_p13 = scmp.lt.s32.totalorder %s107_s8, %s103_s7 }
  0x1d   :  { %p110_p0 = por %p109_p13, %p108_p12 }
  0x1f   :  { %p111_p1 = pnand %p110_p0, %p104_p11 }
  0x21   :  { %114 = shalt.err (!%p111_p1)
}
  0x22   :  { %31 = dma.hbm_to_vmem [thread:$0]  %s179_s2, 16, %s29_s15, [#allocation5]  }
  0x23   :  { %115 = dma.done.wait [#allocation3], 16  }
  0x24   :  { %116 = vsyncadd [#allocation3], 4294967280 }
  0x25   :  { %117 = dma.done.wait [#allocation5], 16  }
  0x26   :  { %118 = vsyncadd [#allocation5], 4294967280  ;;  %v38_v0 = vld [vmem:[%s177_s0] sm:$0xff]  ;;  %v39_v4 = vld [vmem:[%s177_s0 + $0x8] sm:$0xff]  ;;  %vm58_vm0 = vcmask 523264  }
  0x27   :  { %v67_v1 = vld [vmem:[#allocation2] ss:$0 sm:$0xff]  ;;  %v68_v2 = vld [vmem:[#allocation4] ss:$0 sm:$0xff] }
  0x28   :  { %v47_v3 = vmul.f32 %v67_v1, %v38_v0  ;;  %v48_v5 = vmul.f32 %v67_v1, %v39_v4 }
  0x2a   :  { %v56_v6 = vadd.f32 %v68_v2, %v47_v3  ;;  %v57_v7 = vadd.f32 %v68_v2, %v48_v5 }
  0x2c   :  { %59 = vst.msk [vmem:[%s180_s3] sm:$0xff] %vm58_vm0, %v56_v6  ;;  %60 = vst.msk [vmem:[%s180_s3 + $0x8] sm:$0xff] %vm58_vm0, %v57_v7 }
  0x2d   :  { %65 = vsyncpa [#allocation3], 1 }
  0x2e   :  { %66 = vsyncpa [#allocation5], 1 }

// kernel: cblane_forward.17
= control target key start
LH: loop header
LB: loop body
LE: loop exit
PB: predicated region body
PF: predicated region fallthrough
CT: control target
= control target key end

     0   :  { %s415_s0 = inlined_call_operand.vmem [shape: f32[18,128], index: 0, kind: input, shape index: {}]   ;;  %s416_s1 = inlined_call_operand.vmem [shape: f32[128,64], index: 1, kind: input, shape index: {}]   ;;  %s417_s2 = inlined_call_operand.hbm [shape: f32[1,64], index: 2, kind: input, shape index: {}]   ;;  %s418_s3 = inlined_call_operand.<no memory space> [shape: f32[1,1], index: 3, kind: input, shape index: {}]   ;;  %s419_s4 = inlined_call_operand.vmem [shape: f32[18,64], index: 4, kind: output, shape index: {}]  }
   0x1   :  { %v9_v0 = vstv %s418_s3 }
   0x2   :  { %10 = vst [vmem:[#allocation2] sm:$0x1] %v9_v0 }
   0x3   :  { %11 = vsyncpa [#allocation4], 0  ;;  %s298_s17 = smov [#allocation3]   ;;  %s274_s21 = scalar_lea.hbm %s417_s2, 16 }
   0x4   :  { %s22_s18 = sshll.u32 %s298_s17, 4  ;;  %p275_p0 = scmp.ne.s32.totalorder %s417_s2, %s274_s21  ;;  %s23_s18 = int_to_ptr.vmem [resolvable:$true] %s22_s18 }
   0x5   :  { %p278_p1 = scmp.lt.u32.totalorder %s274_s21, %s417_s2 }
   0x7   :  { %p280_p2 = pnand %p278_p1, %p275_p0 }
   0x9   :  { %283 = shalt.err (!%p280_p2)
}
   0xa   :  { %s284_s3 = scalar_lea.vmem %s23_s18, 16  ;;  %s288_s26 = scalar_lea.vmem %s23_s18, 32 }
   0xb   :  { %p285_p3 = scmp.ne.s32.totalorder %s23_s18, %s284_s3  ;;  %p289_p4 = scmp.lt.s32.totalorder %s23_s18, %s23_s18 }
   0xc   :  { %p290_p5 = scmp.lt.s32.totalorder %s288_s26, %s284_s3 }
   0xe   :  { %p291_p6 = por %p290_p5, %p289_p4 }
  0x10   :  { %p292_p7 = pnand %p291_p6, %p285_p3 }
  0x12   :  { %295 = shalt.err (!%p292_p7)
}
  0x13   :  { %25 = dma.hbm_to_vmem [thread:$0]  %s417_s2, 16, %s23_s18, [#allocation4]  }
  0x14   :  { %296 = dma.done.wait [#allocation4], 16  }
  0x15   :  { %297 = vsyncadd [#allocation4], 4294967280  ;;  %v299_v1 = vmov 0.0|0.0   ;;  %vm300_vm0 = vmmov 0   ;;  %v301_v2 = vmov 0.0   ;;  %v302_v3 = vmov 0  }
  0x16   :  { %252 = vmatprep.subr.bf16.mxu1 %v299_v1  ;;  %228 = vmatprep.subr.bf16.mxu0 %v299_v1  ;;  %v34_v4 = vld [vmem:[%s416_s1] sm:$0xff]  ;;  %v35_v5 = vld [vmem:[%s416_s1 + $0x8] sm:$0xff]  ;;  %v36_v6 = vld [vmem:[%s416_s1 + $0x10] sm:$0xff]  ;;  %vm156_vm1 = vcmask 523264   ;;  %vm159_vm5 = vcmask 517120  }
  0x17   :  { %222 = vmatprep.mubr.msk.f32.mxu1 %vm300_vm0, %v301_v2  ;;  %219 = vmatprep.mubr.msk.f32.mxu0 %vm300_vm0, %v301_v2  ;;  %v229_v7 = vpack.c.bf16 %v35_v5, %v34_v4  ;;  %v37_v8 = vld [vmem:[%s416_s1 + $0x18] sm:$0xff]  ;;  %v38_v10 = vld [vmem:[%s416_s1 + $0x20] sm:$0xff]  ;;  %v39_v11 = vld [vmem:[%s416_s1 + $0x28] sm:$0xff] }
  0x18   :  { %273 = vset.pattern.permute.xlu0 %v302_v3  ;;  %v232_v9 = vpack.c.bf16 %v37_v8, %v36_v6  ;;  %v167_v12 = vld [vmem:[#allocation2] ss:$0 sm:$0xff]  ;;  %v235_v13 = vpack.c.bf16 %v39_v11, %v38_v10  ;;  %v40_v14 = vld [vmem:[%s416_s1 + $0x30] sm:$0xff]  ;;  %v41_v15 = vld [vmem:[%s416_s1 + $0x38] sm:$0xff] }
  0x19   :  { %260 = vmatpush3.bf16.msra.mxu1 %v229_v7  ;;  %230 = vmatpush3.bf16.msra.mxu0 %v229_v7  ;;  %v238_v16 = vpack.c.bf16 %v41_v15, %v40_v14  ;;  %v42_v17 = vld [vmem:[%s416_s1 + $0x40] sm:$0xff]  ;;  %v43_v18 = vld [vmem:[%s416_s1 + $0x48] sm:$0xff]  ;;  %v44_v20 = vld [vmem:[%s416_s1 + $0x50] sm:$0xff] }
  0x1a   :  { %253 = vmatprep.subr.bf16.mxu1 %v299_v1  ;;  %231 = vmatprep.subr.bf16.mxu0 %v299_v1  ;;  %v241_v19 = vpack.c.bf16 %v43_v18, %v42_v17  ;;  %v45_v21 = vld [vmem:[%s416_s1 + $0x58] sm:$0xff]  ;;  %v46_v23 = vld [vmem:[%s416_s1 + $0x60] sm:$0xff]  ;;  %v47_v24 = vld [vmem:[%s416_s1 + $0x68] sm:$0xff] }
  0x1b   :  { %147 = vperm.xlu0 %273, %v167_v12   ;;  %v244_v22 = vpack.c.bf16 %v45_v21, %v44_v20  ;;  %v247_v25 = vpack.c.bf16 %v47_v24, %v46_v23  ;;  %v48_v26 = vld [vmem:[%s416_s1 + $0x70] sm:$0xff]  ;;  %v49_v27 = vld [vmem:[%s416_s1 + $0x78] sm:$0xff]  ;;  %v32_v29 = vld [vmem:[%s415_s0 + $0x8] sm:$0xff] }
  0x1c   :  { %v250_v28 = vpack.c.bf16 %v49_v27, %v48_v26  ;;  %v31_v30 = vld [vmem:[%s415_s0] sm:$0xff]  ;;  %v33_v31 = vld [vmem:[%s415_s0 + $0x10] sm:$0x3] }
  0x1d   :  { %261 = vmatpush3.bf16.msra.mxu1 %v232_v9  ;;  %233 = vmatpush3.bf16.msra.mxu0 %v232_v9  ;;  %v166_v32 = vld [vmem:[#allocation3] ss:$0 sm:$0xff] }
  0x1e   :  { %254 = vmatprep.subr.bf16.mxu1 %v299_v1  ;;  %234 = vmatprep.subr.bf16.mxu0 %v299_v1 }
  0x21   :  { %262 = vmatpush3.bf16.msra.mxu1 %v235_v13  ;;  %236 = vmatpush3.bf16.msra.mxu0 %v235_v13 }
  0x22   :  { %255 = vmatprep.subr.bf16.mxu1 %v299_v1  ;;  %237 = vmatprep.subr.bf16.mxu0 %v299_v1 }
  0x25   :  { %263 = vmatpush3.bf16.msra.mxu1 %v238_v16  ;;  %239 = vmatpush3.bf16.msra.mxu0 %v238_v16 }
  0x26   :  { %256 = vmatprep.subr.bf16.mxu1 %v299_v1  ;;  %240 = vmatprep.subr.bf16.mxu0 %v299_v1 }
  0x29   :  { %264 = vmatpush3.bf16.msra.mxu1 %v241_v19  ;;  %242 = vmatpush3.bf16.msra.mxu0 %v241_v19 }
  0x2a   :  { %257 = vmatprep.subr.bf16.mxu1 %v299_v1  ;;  %243 = vmatprep.subr.bf16.mxu0 %v299_v1 }
  0x2d   :  { %265 = vmatpush3.bf16.msra.mxu1 %v244_v22  ;;  %245 = vmatpush3.bf16.msra.mxu0 %v244_v22 }
  0x2e   :  { %258 = vmatprep.subr.bf16.mxu1 %v299_v1  ;;  %246 = vmatprep.subr.bf16.mxu0 %v299_v1 }
  0x31   :  { %266 = vmatpush3.bf16.msra.mxu1 %v247_v25  ;;  %248 = vmatpush3.bf16.msra.mxu0 %v247_v25 }
  0x32   :  { %259 = vmatprep.subr.bf16.mxu1 %v299_v1  ;;  %249 = vmatprep.subr.bf16.mxu0 %v299_v1 }
  0x35   :  { %267 = vmatpush3.bf16.msra.mxu1 %v250_v28  ;;  %251 = vmatpush3.bf16.msra.mxu0 %v250_v28 }
  0x38   :  { %223 = vmatmul.mubr.f32.vlgmr.msra.gmra.mrb[0].mxu1 %v32_v29  ;;  %220 = vmatmul.mubr.f32.vlgmr.msra.gmra.mrb[0].mxu0 %v31_v30 }
  0x39   :  { %225 = vmatprep.mubr.msk.f32.mxu1 %vm300_vm0, %v301_v2 }
  0x3c   :  { %226 = vmatmul.mubr.f32.gmra.mrb[2].mxu1 %v33_v31 }
  0x9a   :  { %v148_v33 = vpop.permute.xlu0 %147 }
 0x10b   :  { %v128_v34 = vpop.f32.mrb[0].mxu1  ;;  %v123_v35 = vpop.f32.mrb[0].mxu0 }
 0x10c   :  { %v129_v36 = vadd.f32 %v166_v32, %v128_v34  ;;  %v224_v37 = vpop.f32.mrb[1].mxu1  ;;  %v124_v38 = vadd.f32 %v166_v32, %v123_v35  ;;  %v221_v39 = vpop.f32.mrb[1].mxu0 }
 0x10e   :  { %vm139_vm2 = vcmp.ge.f32.partialorder %v129_v36, 0.0  ;;  %v151_v40 = vmul.f32 %v148_v33, %v129_v36  ;;  %vm138_vm3 = vcmp.ge.f32.partialorder %v124_v38, 0.0  ;;  %v150_v41 = vmul.f32 %v148_v33, %v124_v38 }
 0x10f   :  { %v133_v42 = vpop.f32.mrb[2].mxu1 }
 0x110   :  { %v154_v43 = vsel %vm139_vm2, %v129_v36, %v151_v40  ;;  %v153_v44 = vsel %vm138_vm3, %v124_v38, %v150_v41  ;;  %v134_v45 = vadd.f32 %v166_v32, %v133_v42  ;;  %v227_v46 = vpop.f32.mrb[3].mxu1 }
 0x111   :  { %158 = vst.msk [vmem:[%s419_s4 + $0x8] sm:$0xff] %vm156_vm1, %v154_v43  ;;  %157 = vst.msk [vmem:[%s419_s4] sm:$0xff] %vm156_vm1, %v153_v44 }
 0x112   :  { %vm140_vm4 = vcmp.ge.f32.partialorder %v134_v45, 0.0  ;;  %v152_v47 = vmul.f32 %v148_v33, %v134_v45 }
 0x114   :  { %v155_v48 = vsel %vm140_vm4, %v134_v45, %v152_v47 }
 0x115   :  { %160 = vst.msk [vmem:[%s419_s4 + $0x10] sm:$0x3] %vm159_vm5, %v155_v48 }
 0x116   :  { %165 = vsyncpa [#allocation4], 1 }

// kernel: cblane_forward.18
= control target key start
LH: loop header
LB: loop body
LE: loop exit
PB: predicated region body
PF: predicated region fallthrough
CT: control target
= control target key end

     0   :  { %8 = vsyncpa [#allocation3], 0  ;;  %s167_s0 = inlined_call_operand.vmem [shape: f32[8,64], index: 0, kind: input, shape index: {}]   ;;  %s168_s1 = inlined_call_operand.hbm [shape: f32[1,64], index: 1, kind: input, shape index: {}]   ;;  %s169_s2 = inlined_call_operand.hbm [shape: f32[1,64], index: 2, kind: input, shape index: {}]   ;;  %s170_s3 = inlined_call_operand.vmem [shape: f32[8,64], index: 3, kind: output, shape index: {}]  }
   0x1   :  { %9 = vsyncpa [#allocation5], 0  ;;  %s115_s12 = smov [#allocation2]   ;;  %s116_s14 = smov [#allocation4]  }
   0x2   :  { %s18_s13 = sshll.u32 %s115_s12, 4  ;;  %s28_s15 = sshll.u32 %s116_s14, 4  ;;  %s19_s13 = int_to_ptr.vmem [resolvable:$true] %s18_s13  ;;  %s29_s15 = int_to_ptr.vmem [resolvable:$true] %s28_s15 }
   0x3   :  { %s67_s18 = scalar_lea.hbm %s168_s1, 16 }
   0x4   :  { %p68_p0 = scmp.ne.s32.totalorder %s168_s1, %s67_s18  ;;  %p71_p1 = scmp.lt.u32.totalorder %s67_s18, %s168_s1 }
   0x6   :  { %p73_p2 = pnand %p71_p1, %p68_p0 }
   0x8   :  { %76 = shalt.err (!%p73_p2)
}
   0x9   :  { %s77_s23 = scalar_lea.vmem %s19_s13, 16  ;;  %s81_s24 = scalar_lea.vmem %s19_s13, 32 }
   0xa   :  { %p78_p3 = scmp.ne.s32.totalorder %s19_s13, %s77_s23  ;;  %p82_p4 = scmp.lt.s32.totalorder %s19_s13, %s19_s13 }
   0xb   :  { %p83_p5 = scmp.lt.s32.totalorder %s81_s24, %s77_s23 }
   0xd   :  { %p84_p6 = por %p83_p5, %p82_p4 }
   0xf   :  { %p85_p7 = pnand %p84_p6, %p78_p3 }
  0x11   :  { %88 = shalt.err (!%p85_p7)
}
  0x12   :  { %21 = dma.hbm_to_vmem [thread:$0]  %s168_s1, 16, %s19_s13, [#allocation3]  }
  0x13   :  { %s89_s29 = scalar_lea.hbm %s169_s2, 16 }
  0x14   :  { %p90_p8 = scmp.ne.s32.totalorder %s169_s2, %s89_s29  ;;  %p93_p9 = scmp.lt.u32.totalorder %s89_s29, %s169_s2 }
  0x16   :  { %p95_p10 = pnand %p93_p9, %p90_p8 }
  0x18   :  { %98 = shalt.err (!%p95_p10)
}
  0x19   :  { %s99_s7 = scalar_lea.vmem %s29_s15, 16  ;;  %s103_s8 = scalar_lea.vmem %s29_s15, 32 }
  0x1a   :  { %p100_p11 = scmp.ne.s32.totalorder %s29_s15, %s99_s7  ;;  %p104_p12 = scmp.lt.s32.totalorder %s29_s15, %s29_s15 }
  0x1b   :  { %p105_p13 = scmp.lt.s32.totalorder %s103_s8, %s99_s7 }
  0x1d   :  { %p106_p0 = por %p105_p13, %p104_p12 }
  0x1f   :  { %p107_p1 = pnand %p106_p0, %p100_p11 }
  0x21   :  { %110 = shalt.err (!%p107_p1)
}
  0x22   :  { %31 = dma.hbm_to_vmem [thread:$0]  %s169_s2, 16, %s29_s15, [#allocation5]  }
  0x23   :  { %111 = dma.done.wait [#allocation3], 16  }
  0x24   :  { %112 = vsyncadd [#allocation3], 4294967280 }
  0x25   :  { %113 = dma.done.wait [#allocation5], 16  }
  0x26   :  { %114 = vsyncadd [#allocation5], 4294967280  ;;  %v38_v0 = vld [vmem:[%s167_s0] sm:$0xff]  ;;  %vm55_vm0 = vcmask 523264  }
  0x27   :  { %v63_v1 = vld [vmem:[#allocation2] ss:$0 sm:$0xff]  ;;  %v64_v2 = vld [vmem:[#allocation4] ss:$0 sm:$0xff] }
  0x28   :  { %v46_v3 = vmul.f32 %v63_v1, %v38_v0 }
  0x2a   :  { %v54_v4 = vadd.f32 %v64_v2, %v46_v3 }
  0x2c   :  { %56 = vst.msk [vmem:[%s170_s3] sm:$0xff] %vm55_vm0, %v54_v4 }
  0x2d   :  { %61 = vsyncpa [#allocation3], 1 }
  0x2e   :  { %62 = vsyncpa [#allocation5], 1 }

// kernel: cblane_forward.19
= control target key start
LH: loop header
LB: loop body
LE: loop exit
PB: predicated region body
PF: predicated region fallthrough
CT: control target
= control target key end

     0   :  { %vm243_vm0 = vcmask 523264   ;;  %vm245_vm1 = vcmask 517120   ;;  %s637_s1 = inlined_call_operand.vmem [shape: f32[512,64], index: 1, kind: input, shape index: {}]   ;;  %s638_s0 = inlined_call_operand.vmem [shape: f32[10,512], index: 0, kind: input, shape index: {}]   ;;  %s639_s2 = inlined_call_operand.vmem [shape: f32[1,64], index: 2, kind: input, shape index: {}]   ;;  %s640_s3 = inlined_call_operand.vmem [shape: f32[10,64], index: 3, kind: output, shape index: {}]  }
   0x1   :  { %v38_v0 = vld [vmem:[%s637_s1 + $0x80] sm:$0xff]  ;;  %v39_v1 = vld [vmem:[%s637_s1 + $0x88] sm:$0xff]  ;;  %v40_v11 = vld [vmem:[%s637_s1 + $0x90] sm:$0xff] }
   0x2   :  { %v22_v2 = vld [vmem:[%s637_s1] sm:$0xff]  ;;  %v328_v3 = vpack.c.bf16 %v39_v1, %v38_v0  ;;  %v23_v4 = vld [vmem:[%s637_s1 + $0x8] sm:$0xff]  ;;  %v41_v13 = vld [vmem:[%s637_s1 + $0x98] sm:$0xff] }
   0x3   :  { %v70_v5 = vld [vmem:[%s637_s1 + $0x180] sm:$0xff]  ;;  %v71_v6 = vld [vmem:[%s637_s1 + $0x188] sm:$0xff]  ;;  %v330_v7 = vpack.c.bf16 %v23_v4, %v22_v2  ;;  %v24_v14 = vld [vmem:[%s637_s1 + $0x10] sm:$0xff]  ;;  %v332_v16 = vpack.c.bf16 %v41_v13, %v40_v11 }
   0x4   :  { %v360_v8 = vpack.c.bf16 %v71_v6, %v70_v5  ;;  %v54_v9 = vld [vmem:[%s637_s1 + $0x100] sm:$0xff]  ;;  %v55_v10 = vld [vmem:[%s637_s1 + $0x108] sm:$0xff]  ;;  %329 = vmatprep.subr.bf16.mxu0 %v328_v3  ;;  %v25_v15 = vld [vmem:[%s637_s1 + $0x18] sm:$0xff] }
   0x5   :  { %v362_v12 = vpack.c.bf16 %v55_v10, %v54_v9  ;;  %331 = vmatpush3.bf16.msra.mxu0 %v330_v7  ;;  %v334_v17 = vpack.c.bf16 %v25_v15, %v24_v14  ;;  %v72_v18 = vld [vmem:[%s637_s1 + $0x190] sm:$0xff]  ;;  %v73_v19 = vld [vmem:[%s637_s1 + $0x198] sm:$0xff]  ;;  %v42_v23 = vld [vmem:[%s637_s1 + $0xa0] sm:$0xff] }
   0x6   :  { %361 = vmatprep.subr.bf16.mxu1 %v360_v8  ;;  %v56_v20 = vld [vmem:[%s637_s1 + $0x110] sm:$0xff]  ;;  %v364_v21 = vpack.c.bf16 %v73_v19, %v72_v18  ;;  %v57_v22 = vld [vmem:[%s637_s1 + $0x118] sm:$0xff]  ;;  %v43_v24 = vld [vmem:[%s637_s1 + $0xa8] sm:$0xff]  ;;  %333 = vmatprep.subr.bf16.mxu0 %v332_v16 }
   0x7   :  { %363 = vmatpush3.bf16.msra.mxu1 %v362_v12  ;;  %v366_v25 = vpack.c.bf16 %v57_v22, %v56_v20  ;;  %v336_v26 = vpack.c.bf16 %v43_v24, %v42_v23  ;;  %v26_v27 = vld [vmem:[%s637_s1 + $0x20] sm:$0xff]  ;;  %v27_v28 = vld [vmem:[%s637_s1 + $0x28] sm:$0xff]  ;;  %v44_v35 = vld [vmem:[%s637_s1 + $0xb0] sm:$0xff] }
   0x8   :  { %v74_v29 = vld [vmem:[%s637_s1 + $0x1a0] sm:$0xff]  ;;  %365 = vmatprep.subr.bf16.mxu1 %v364_v21  ;;  %v75_v30 = vld [vmem:[%s637_s1 + $0x1a8] sm:$0xff]  ;;  %v338_v33 = vpack.c.bf16 %v27_v28, %v26_v27  ;;  %v45_v36 = vld [vmem:[%s637_s1 + $0xb8] sm:$0xff] }
   0x9   :  { %v58_v31 = vld [vmem:[%s637_s1 + $0x120] sm:$0xff]  ;;  %v59_v32 = vld [vmem:[%s637_s1 + $0x128] sm:$0xff]  ;;  %335 = vmatpush3.bf16.msra.mxu0 %v334_v17  ;;  %v368_v34 = vpack.c.bf16 %v75_v30, %v74_v29  ;;  %v28_v37 = vld [vmem:[%s637_s1 + $0x30] sm:$0xff]  ;;  %v340_v39 = vpack.c.bf16 %v45_v36, %v44_v35 }
   0xa   :  { %337 = vmatprep.subr.bf16.mxu0 %v336_v26  ;;  %v370_v38 = vpack.c.bf16 %v59_v32, %v58_v31  ;;  %v29_v40 = vld [vmem:[%s637_s1 + $0x38] sm:$0xff]  ;;  %v76_v41 = vld [vmem:[%s637_s1 + $0x1b0] sm:$0xff]  ;;  %v46_v46 = vld [vmem:[%s637_s1 + $0xc0] sm:$0xff] }
   0xb   :  { %367 = vmatpush3.bf16.msra.mxu1 %v366_v25  ;;  %v77_v42 = vld [vmem:[%s637_s1 + $0x1b8] sm:$0xff]  ;;  %v60_v44 = vld [vmem:[%s637_s1 + $0x130] sm:$0xff]  ;;  %v47_v47 = vld [vmem:[%s637_s1 + $0xc8] sm:$0xff]  ;;  %v342_v48 = vpack.c.bf16 %v29_v40, %v28_v37 }
   0xc   :  { %369 = vmatprep.subr.bf16.mxu1 %v368_v34  ;;  %v372_v43 = vpack.c.bf16 %v77_v42, %v76_v41  ;;  %v61_v45 = vld [vmem:[%s637_s1 + $0x138] sm:$0xff]  ;;  %v78_v49 = vld [vmem:[%s637_s1 + $0x1c0] sm:$0xff]  ;;  %v79_v50 = vld [vmem:[%s637_s1 + $0x1c8] sm:$0xff]  ;;  %v344_v52 = vpack.c.bf16 %v47_v47, %v46_v46 }
   0xd   :  { %339 = vmatpush3.bf16.msra.mxu0 %v338_v33  ;;  %v374_v51 = vpack.c.bf16 %v61_v45, %v60_v44  ;;  %v30_v53 = vld [vmem:[%s637_s1 + $0x40] sm:$0xff]  ;;  %v31_v54 = vld [vmem:[%s637_s1 + $0x48] sm:$0xff]  ;;  %v376_v56 = vpack.c.bf16 %v79_v50, %v78_v49  ;;  %v48_v58 = vld [vmem:[%s637_s1 + $0xd0] sm:$0xff] }
   0xe   :  { %341 = vmatprep.subr.bf16.mxu0 %v340_v39  ;;  %v62_v55 = vld [vmem:[%s637_s1 + $0x140] sm:$0xff]  ;;  %v63_v57 = vld [vmem:[%s637_s1 + $0x148] sm:$0xff]  ;;  %v49_v59 = vld [vmem:[%s637_s1 + $0xd8] sm:$0xff]  ;;  %v346_v62 = vpack.c.bf16 %v31_v54, %v30_v53 }
   0xf   :  { %371 = vmatpush3.bf16.msra.mxu1 %v370_v38  ;;  %v80_v60 = vld [vmem:[%s637_s1 + $0x1d0] sm:$0xff]  ;;  %v81_v61 = vld [vmem:[%s637_s1 + $0x1d8] sm:$0xff]  ;;  %v378_v63 = vpack.c.bf16 %v63_v57, %v62_v55  ;;  %v348_v0 = vpack.c.bf16 %v49_v59, %v48_v58  ;;  %v50_v6 = vld [vmem:[%s637_s1 + $0xe0] sm:$0xff] }
  0x10   :  { %373 = vmatprep.subr.bf16.mxu1 %v372_v43  ;;  %v32_v1 = vld [vmem:[%s637_s1 + $0x50] sm:$0xff]  ;;  %v33_v2 = vld [vmem:[%s637_s1 + $0x58] sm:$0xff]  ;;  %v380_v4 = vpack.c.bf16 %v81_v61, %v80_v60  ;;  %v51_v7 = vld [vmem:[%s637_s1 + $0xe8] sm:$0xff] }
  0x11   :  { %343 = vmatpush3.bf16.msra.mxu0 %v342_v48  ;;  %v64_v3 = vld [vmem:[%s637_s1 + $0x150] sm:$0xff]  ;;  %v65_v5 = vld [vmem:[%s637_s1 + $0x158] sm:$0xff]  ;;  %v82_v8 = vld [vmem:[%s637_s1 + $0x1e0] sm:$0xff]  ;;  %v350_v10 = vpack.c.bf16 %v33_v2, %v32_v1  ;;  %v352_v14 = vpack.c.bf16 %v51_v7, %v50_v6 }
  0x12   :  { %345 = vmatprep.subr.bf16.mxu0 %v344_v52  ;;  %v83_v9 = vld [vmem:[%s637_s1 + $0x1e8] sm:$0xff]  ;;  %v34_v11 = vld [vmem:[%s637_s1 + $0x60] sm:$0xff]  ;;  %v382_v13 = vpack.c.bf16 %v65_v5, %v64_v3  ;;  %v52_v19 = vld [vmem:[%s637_s1 + $0xf0] sm:$0xff] }
  0x13   :  { %375 = vmatpush3.bf16.msra.mxu1 %v374_v51  ;;  %v35_v12 = vld [vmem:[%s637_s1 + $0x68] sm:$0xff]  ;;  %v66_v15 = vld [vmem:[%s637_s1 + $0x160] sm:$0xff]  ;;  %v384_v18 = vpack.c.bf16 %v83_v9, %v82_v8  ;;  %v53_v20 = vld [vmem:[%s637_s1 + $0xf8] sm:$0xff] }
  0x14   :  { %377 = vmatprep.subr.bf16.mxu1 %v376_v56  ;;  %v67_v16 = vld [vmem:[%s637_s1 + $0x168] sm:$0xff]  ;;  %v17_v21 = vld [vmem:[%s638_s0 + $0x18] sm:$0xff]  ;;  %v84_v22 = vld [vmem:[%s637_s1 + $0x1f0] sm:$0xff]  ;;  %v354_v24 = vpack.c.bf16 %v35_v12, %v34_v11  ;;  %v356_v26 = vpack.c.bf16 %v53_v20, %v52_v19 }
  0x15   :  { %347 = vmatpush3.bf16.msra.mxu0 %v346_v62  ;;  %v15_v17 = vld [vmem:[%s638_s0 + $0x8] sm:$0xff]  ;;  %v85_v23 = vld [vmem:[%s637_s1 + $0x1f8] sm:$0xff]  ;;  %232 = vmatprep.mubr.f32.mxu1 %v17_v21  ;;  %v386_v25 = vpack.c.bf16 %v67_v16, %v66_v15  ;;  %v36_v27 = vld [vmem:[%s637_s1 + $0x70] sm:$0xff] }
  0x16   :  { %349 = vmatprep.subr.bf16.mxu0 %v348_v0  ;;  %157 = vmatprep.mubr.f32.mxu0 %v15_v17  ;;  %v37_v28 = vld [vmem:[%s637_s1 + $0x78] sm:$0xff]  ;;  %v388_v29 = vpack.c.bf16 %v85_v23, %v84_v22  ;;  %v68_v30 = vld [vmem:[%s637_s1 + $0x170] sm:$0xff]  ;;  %v14_v34 = vld [vmem:[%s638_s0] sm:$0xff] }
  0x17   :  { %379 = vmatpush3.bf16.msra.mxu1 %v378_v63  ;;  %v69_v31 = vld [vmem:[%s637_s1 + $0x178] sm:$0xff]  ;;  %v358_v32 = vpack.c.bf16 %v37_v28, %v36_v27  ;;  %v16_v35 = vld [vmem:[%s638_s0 + $0x10] sm:$0xff]  ;;  %v19_v36 = vld [vmem:[%s638_s0 + $0x28] sm:$0x3] }
  0x18   :  { %381 = vmatprep.subr.bf16.mxu1 %v380_v4  ;;  %v390_v33 = vpack.c.bf16 %v69_v31, %v68_v30  ;;  %v21_v37 = vld [vmem:[%s638_s0 + $0x38] sm:$0x3]  ;;  %v18_v38 = vld [vmem:[%s638_s0 + $0x20] sm:$0x3]  ;;  %v20_v39 = vld [vmem:[%s638_s0 + $0x30] sm:$0x3] }
  0x19   :  { %351 = vmatpush3.bf16.msra.mxu0 %v350_v10  ;;  %v251_v41 = vld [vmem:[%s639_s2] ss:$0 sm:$0xff] }
  0x1a   :  { %353 = vmatprep.subr.bf16.mxu0 %v352_v14 }
  0x1b   :  { %383 = vmatpush3.bf16.msra.mxu1 %v382_v13 }
  0x1c   :  { %385 = vmatprep.subr.bf16.mxu1 %v384_v18 }
  0x1d   :  { %355 = vmatpush3.bf16.msra.mxu0 %v354_v24 }
  0x1e   :  { %357 = vmatprep.subr.bf16.mxu0 %v356_v26 }
  0x1f   :  { %387 = vmatpush3.bf16.msra.mxu1 %v386_v25 }
  0x20   :  { %389 = vmatprep.subr.bf16.mxu1 %v388_v29 }
  0x21   :  { %359 = vmatpush3.bf16.msra.mxu0 %v358_v32 }
  0x23   :  { %391 = vmatpush3.bf16.msra.mxu1 %v390_v33 }
  0x24   :  { %158 = vmatmul.mubr.f32.vlgmr.msra.gmra.mrb[0].mxu0 %v14_v34 }
  0x25   :  { %162 = vmatprep.mubr.f32.mxu0 %v19_v36 }
  0x26   :  { %233 = vmatmul.mubr.f32.vlgmr.msra.gmra.mrb[0].mxu1 %v16_v35 }
  0x27   :  { %237 = vmatprep.mubr.f32.mxu1 %v21_v37 }
  0x28   :  { %163 = vmatmul.mubr.f32.gmra.mrb[2].mxu0 %v18_v38 }
  0x2a   :  { %238 = vmatmul.mubr.f32.gmra.mrb[2].mxu1 %v20_v39 }
  0xf7   :  { %v284_v40 = vpop.f32.mrb[0].mxu0 }
  0xf8   :  { %v285_v42 = vpop.f32.mrb[1].mxu0 }
  0xf9   :  { %v322_v43 = vpop.f32.mrb[0].mxu1  ;;  %v286_v44 = vadd.f32 %v285_v42, %v284_v40 }
  0xfa   :  { %v323_v45 = vpop.f32.mrb[1].mxu1 }
  0xfb   :  { %v324_v46 = vadd.f32 %v323_v45, %v322_v43  ;;  %v160_v47 = vadd.f32 %v286_v44, %v251_v41  ;;  %v287_v48 = vpop.f32.mrb[2].mxu0 }
  0xfc   :  { %v288_v49 = vpop.f32.mrb[3].mxu0 }
  0xfd   :  { %v325_v50 = vpop.f32.mrb[2].mxu1  ;;  %v235_v51 = vadd.f32 %v324_v46, %v160_v47  ;;  %v289_v52 = vadd.f32 %v288_v49, %v287_v48 }
  0xfe   :  { %v326_v53 = vpop.f32.mrb[3].mxu1 }
  0xff   :  { %v327_v54 = vadd.f32 %v326_v53, %v325_v50  ;;  %244 = vst.msk [vmem:[%s640_s3] sm:$0xff] %vm243_vm0, %v235_v51  ;;  %v165_v55 = vadd.f32 %v289_v52, %v251_v41 }
 0x101   :  { %v240_v56 = vadd.f32 %v327_v54, %v165_v55 }
 0x103   :  { %246 = vst.msk [vmem:[%s640_s3 + $0x8] sm:$0x3] %vm245_vm1, %v240_v56 }

// kernel: cblane_forward.21
= control target key start
LH: loop header
LB: loop body
LE: loop exit
PB: predicated region body
PF: predicated region fallthrough
CT: control target
= control target key end

     0   :  { %v154_v0 = vmov 0.0|0.0   ;;  %vm155_vm0 = vmmov 0   ;;  %v156_v4 = vmov 0.0   ;;  %vm30_vm1 = vcmask 523264   ;;  %s210_s1 = inlined_call_operand.vmem [shape: f32[64,128], index: 1, kind: input, shape index: {}]   ;;  %s211_s0 = inlined_call_operand.vmem [shape: f32[8,64], index: 0, kind: input, shape index: {}]   ;;  %s212_s2 = inlined_call_operand.vmem [shape: f32[1,128], index: 2, kind: input, shape index: {}]   ;;  %s213_s3 = inlined_call_operand.vmem [shape: f32[8,128], index: 3, kind: output, shape index: {}]  }
   0x1   :  { %139 = vmatprep.subr.bf16.mxu0 %v154_v0  ;;  %v15_v1 = vld [vmem:[%s210_s1] sm:$0xff]  ;;  %v16_v2 = vld [vmem:[%s210_s1 + $0x8] sm:$0xff]  ;;  %v17_v3 = vld [vmem:[%s210_s1 + $0x10] sm:$0xff]  ;;  %136 = vmatprep.mubr.msk.f32.mxu0 %vm155_vm0, %v156_v4 }
   0x2   :  { %v140_v5 = vpack.c.bf16 %v16_v2, %v15_v1  ;;  %v18_v6 = vld [vmem:[%s210_s1 + $0x18] sm:$0xff]  ;;  %v19_v8 = vld [vmem:[%s210_s1 + $0x20] sm:$0xff]  ;;  %v20_v9 = vld [vmem:[%s210_s1 + $0x28] sm:$0xff] }
   0x3   :  { %v143_v7 = vpack.c.bf16 %v18_v6, %v17_v3  ;;  %v146_v10 = vpack.c.bf16 %v20_v9, %v19_v8  ;;  %v21_v11 = vld [vmem:[%s210_s1 + $0x30] sm:$0xff]  ;;  %v22_v12 = vld [vmem:[%s210_s1 + $0x38] sm:$0xff]  ;;  %v14_v14 = vld [vmem:[%s211_s0] sm:$0xff] }
   0x4   :  { %141 = vmatpush3.bf16.msra.mxu0 %v140_v5  ;;  %v149_v13 = vpack.c.bf16 %v22_v12, %v21_v11  ;;  %v109_v15 = vld [vmem:[%s212_s2] ss:$0 sm:$0xff] }
   0x5   :  { %142 = vmatprep.subr.bf16.mxu0 %v154_v0 }
   0x8   :  { %144 = vmatpush3.bf16.msra.mxu0 %v143_v7 }
   0x9   :  { %145 = vmatprep.subr.bf16.mxu0 %v154_v0 }
   0xc   :  { %147 = vmatpush3.bf16.msra.mxu0 %v146_v10 }
   0xd   :  { %148 = vmatprep.subr.bf16.mxu0 %v154_v0 }
  0x10   :  { %150 = vmatpush3.bf16.msra.mxu0 %v149_v13 }
  0x13   :  { %137 = vmatmul.mubr.msk.f32.vlgmr.msra.gmra.mrb[0].mxu0 %vm30_vm1, %v14_v14 }
  0xe6   :  { %v100_v16 = vpop.f32.mrb[0].mxu0 }
  0xe7   :  { %v101_v17 = vadd.f32 %v109_v15, %v100_v16  ;;  %v138_v18 = vpop.f32.mrb[1].mxu0 }
  0xe9   :  { %104 = vst [vmem:[%s213_s3] sm:$0xff] %v101_v17 }

// kernel: cblane_forward.20
= control target key start
LH: loop header
LB: loop body
LE: loop exit
PB: predicated region body
PF: predicated region fallthrough
CT: control target
= control target key end

     0   :  { %vm31_vm0 = vcmask 523264   ;;  %vm114_vm1 = vcmask 517120   ;;  %s230_s1 = inlined_call_operand.vmem [shape: f32[64,64], index: 1, kind: input, shape index: {}]   ;;  %s231_s0 = inlined_call_operand.vmem [shape: f32[10,64], index: 0, kind: input, shape index: {}]   ;;  %s232_s2 = inlined_call_operand.vmem [shape: f32[1,64], index: 2, kind: input, shape index: {}]   ;;  %s233_s3 = inlined_call_operand.vmem [shape: f32[10,64], index: 3, kind: output, shape index: {}]  }
   0x1   :  { %v16_v0 = vld [vmem:[%s230_s1] sm:$0xff]  ;;  %v17_v1 = vld [vmem:[%s230_s1 + $0x8] sm:$0xff]  ;;  %v18_v2 = vld [vmem:[%s230_s1 + $0x10] sm:$0xff] }
   0x2   :  { %v152_v3 = vpack.c.bf16 %v17_v1, %v16_v0  ;;  %v19_v4 = vld [vmem:[%s230_s1 + $0x18] sm:$0xff]  ;;  %v20_v6 = vld [vmem:[%s230_s1 + $0x20] sm:$0xff]  ;;  %v21_v7 = vld [vmem:[%s230_s1 + $0x28] sm:$0xff] }
   0x3   :  { %v156_v5 = vpack.c.bf16 %v19_v4, %v18_v2  ;;  %v14_v8 = vld [vmem:[%s231_s0] sm:$0xff]  ;;  %v160_v9 = vpack.c.bf16 %v21_v7, %v20_v6  ;;  %v22_v10 = vld [vmem:[%s230_s1 + $0x30] sm:$0xff]  ;;  %v23_v11 = vld [vmem:[%s230_s1 + $0x38] sm:$0xff] }
   0x4   :  { %153 = vmatprep.subr.bf16.mxu0 %v152_v3  ;;  %149 = vmatprep.mubr.msk.f32.mxu0 %vm31_vm0, %v14_v8  ;;  %v164_v12 = vpack.c.bf16 %v23_v11, %v22_v10  ;;  %v15_v13 = vld [vmem:[%s231_s0 + $0x8] sm:$0x3]  ;;  %v120_v14 = vld [vmem:[%s232_s2] ss:$0 sm:$0xff] }
   0x5   :  { %155 = vmatpush3.bf16.msra.mxu0 %v152_v3 }
   0x6   :  { %157 = vmatprep.subr.bf16.mxu0 %v156_v5 }
   0x9   :  { %159 = vmatpush3.bf16.msra.mxu0 %v156_v5 }
   0xa   :  { %161 = vmatprep.subr.bf16.mxu0 %v160_v9 }
   0xd   :  { %163 = vmatpush3.bf16.msra.mxu0 %v160_v9 }
   0xe   :  { %165 = vmatprep.subr.bf16.mxu0 %v164_v12 }
  0x11   :  { %167 = vmatpush3.bf16.msra.mxu0 %v164_v12 }
  0x14   :  { %150 = vmatmul.mubr.msk.f32.vlgmr.msra.gmra.mrb[0].mxu0 %vm31_vm0, %v15_v13 }
  0xe7   :  { %v151_v15 = vpop.f32.mrb[0].mxu0 }
  0xe8   :  { %v110_v16 = vadd.f32 %v151_v15, %v120_v14  ;;  %v104_v17 = vpop.f32.mrb[1].mxu0 }
  0xe9   :  { %v105_v18 = vadd.f32 %v120_v14, %v104_v17 }
  0xea   :  { %115 = vst.msk [vmem:[%s233_s3 + $0x8] sm:$0x3] %vm114_vm1, %v110_v16 }
  0xeb   :  { %113 = vst.msk [vmem:[%s233_s3] sm:$0xff] %vm31_vm0, %v105_v18 }

// kernel: cblane_forward.23
= control target key start
LH: loop header
LB: loop body
LE: loop exit
PB: predicated region body
PF: predicated region fallthrough
CT: control target
= control target key end

     0   :  { %v159_v0 = vmov 0.0|0.0   ;;  %vm160_vm0 = vmmov 0   ;;  %v161_v4 = vmov 0.0   ;;  %vm33_vm1 = vcmask 523264   ;;  %s223_s1 = inlined_call_operand.vmem [shape: f32[64,64], index: 1, kind: input, shape index: {}]   ;;  %s224_s0 = inlined_call_operand.vmem [shape: f32[8,64], index: 0, kind: input, shape index: {}]   ;;  %s225_s2 = inlined_call_operand.vmem [shape: f32[1,64], index: 2, kind: input, shape index: {}]   ;;  %s226_s3 = inlined_call_operand.vmem [shape: f32[8,64], index: 3, kind: input, shape index: {}]   ;;  %s227_s4 = inlined_call_operand.vmem [shape: f32[8,64], index: 4, kind: output, shape index: {}]  }
   0x1   :  { %144 = vmatprep.subr.bf16.mxu0 %v159_v0  ;;  %v18_v1 = vld [vmem:[%s223_s1] sm:$0xff]  ;;  %v19_v2 = vld [vmem:[%s223_s1 + $0x8] sm:$0xff]  ;;  %v20_v3 = vld [vmem:[%s223_s1 + $0x10] sm:$0xff]  ;;  %141 = vmatprep.mubr.msk.f32.mxu0 %vm160_vm0, %v161_v4 }
   0x2   :  { %v145_v5 = vpack.c.bf16 %v19_v2, %v18_v1  ;;  %v21_v6 = vld [vmem:[%s223_s1 + $0x18] sm:$0xff]  ;;  %v22_v8 = vld [vmem:[%s223_s1 + $0x20] sm:$0xff]  ;;  %v23_v9 = vld [vmem:[%s223_s1 + $0x28] sm:$0xff] }
   0x3   :  { %v148_v7 = vpack.c.bf16 %v21_v6, %v20_v3  ;;  %v151_v10 = vpack.c.bf16 %v23_v9, %v22_v8  ;;  %v24_v11 = vld [vmem:[%s223_s1 + $0x30] sm:$0xff]  ;;  %v25_v12 = vld [vmem:[%s223_s1 + $0x38] sm:$0xff]  ;;  %v17_v14 = vld [vmem:[%s224_s0] sm:$0xff] }
   0x4   :  { %146 = vmatpush3.bf16.msra.mxu0 %v145_v5  ;;  %v154_v13 = vpack.c.bf16 %v25_v12, %v24_v11  ;;  %v114_v15 = vld [vmem:[%s225_s2] ss:$0 sm:$0xff] }
   0x5   :  { %147 = vmatprep.subr.bf16.mxu0 %v159_v0  ;;  %v107_v17 = vld [vmem:[%s226_s3] sm:$0xff] }
   0x8   :  { %149 = vmatpush3.bf16.msra.mxu0 %v148_v7 }
   0x9   :  { %150 = vmatprep.subr.bf16.mxu0 %v159_v0 }
   0xc   :  { %152 = vmatpush3.bf16.msra.mxu0 %v151_v10 }
   0xd   :  { %153 = vmatprep.subr.bf16.mxu0 %v159_v0 }
  0x10   :  { %155 = vmatpush3.bf16.msra.mxu0 %v154_v13 }
  0x13   :  { %142 = vmatmul.mubr.msk.f32.vlgmr.msra.gmra.mrb[0].mxu0 %vm33_vm1, %v17_v14 }
  0xe6   :  { %v103_v16 = vpop.f32.mrb[0].mxu0 }
  0xe7   :  { %v104_v18 = vadd.f32 %v114_v15, %v103_v16  ;;  %v143_v19 = vpop.f32.mrb[1].mxu0 }
  0xe9   :  { %v108_v20 = vmul.f32 %v107_v17, %v104_v18 }
  0xeb   :  { %109 = vst.msk [vmem:[%s227_s4] sm:$0xff] %vm33_vm1, %v108_v20 }

// kernel: cblane_forward.22
= control target key start
LH: loop header
LB: loop body
LE: loop exit
PB: predicated region body
PF: predicated region fallthrough
CT: control target
= control target key end

     0   :  { %v1456_v0 = vmov 0.0   ;;  %vm1457_vm0 = vmmov 0   ;;  %v598_v25 = vlaneseq  ;;  %vm609_vm2 = vcmask 64512   ;;  %s1666_s1 = inlined_call_operand.vmem [shape: f32[8,8,128], index: 1, kind: input, shape index: {}]   ;;  %s1667_s0 = inlined_call_operand.vmem [shape: f32[8,8,128], index: 0, kind: input, shape index: {}]   ;;  %s1668_s2 = inlined_call_operand.vmem [shape: f32[8,8,128], index: 2, kind: input, shape index: {}]   ;;  %s1669_s3 = inlined_call_operand.vmem [shape: f32[8,8,128], index: 3, kind: output, shape index: {}]  }
   0x1   :  { %1342 = vmatprep.subr.mxu0 %v1456_v0  ;;  %v30_v1 = vld [vmem:[%s1666_s1] sm:$0xff]  ;;  %1344 = vmatprep.mubr.msk.f32.mxu0 %vm1457_vm0, %v1456_v0  ;;  %v31_v3 = vld [vmem:[%s1666_s1 + $0x8] sm:$0xff]  ;;  %v16_v6 = vld [vmem:[%s1667_s0 + $0x10] sm:$0xff] }
   0x2   :  { %v14_v2 = vld [vmem:[%s1667_s0] sm:$0xff]  ;;  %1343 = vmatpush3.xpose.msra.mxu0 %v30_v1  ;;  %1347 = vmatprep.subr.mxu1 %v1456_v0  ;;  %v15_v5 = vld [vmem:[%s1667_s0 + $0x8] sm:$0xff]  ;;  %v32_v7 = vld [vmem:[%s1666_s1 + $0x10] sm:$0xff]  ;;  %v24_v10 = vmul.f32 0.25, %v16_v6  ;;  %v599_v26 = vand.u32 127, %v598_v25 }
   0x3   :  { %v22_v4 = vmul.f32 0.25, %v14_v2  ;;  %1352 = vmatprep.subr.mxu0 %v1456_v0  ;;  %1348 = vmatpush3.xpose.msra.mxu1 %v31_v3  ;;  %v23_v8 = vmul.f32 0.25, %v15_v5  ;;  %v17_v9 = vld [vmem:[%s1667_s0 + $0x18] sm:$0xff]  ;;  %v18_v12 = vld [vmem:[%s1667_s0 + $0x20] sm:$0xff]  ;;  %v19_v15 = vld [vmem:[%s1667_s0 + $0x28] sm:$0xff] }
   0x4   :  { %1349 = vmatprep.mubr.msk.f32.mxu1 %vm1457_vm0, %v1456_v0  ;;  %1357 = vmatprep.subr.mxu1 %v1456_v0  ;;  %v33_v11 = vld [vmem:[%s1666_s1 + $0x18] sm:$0xff]  ;;  %v34_v13 = vld [vmem:[%s1666_s1 + $0x20] sm:$0xff]  ;;  %v25_v14 = vmul.f32 0.25, %v17_v9  ;;  %v26_v16 = vmul.f32 0.25, %v18_v12  ;;  %v35_v17 = vld [vmem:[%s1666_s1 + $0x28] sm:$0xff]  ;;  %v27_v20 = vmul.f32 0.25, %v19_v15 }
   0x5   :  { %1345 = vmatmul.mubr.f32.vlgmr.msra.gmra.mrb[0].mxu0 %v22_v4  ;;  %v20_v18 = vld [vmem:[%s1667_s0 + $0x30] sm:$0xff]  ;;  %v21_v21 = vld [vmem:[%s1667_s0 + $0x38] sm:$0xff]  ;;  %vm600_vm1 = vcmp.lt.s32.totalorder %v599_v26, 4 }
   0x6   :  { %1353 = vmatpush3.xpose.msra.mxu0 %v32_v7  ;;  %1354 = vmatprep.mubr.msk.f32.mxu0 %vm1457_vm0, %v1456_v0  ;;  %v36_v19 = vld [vmem:[%s1666_s1 + $0x30] sm:$0xff]  ;;  %v28_v22 = vmul.f32 0.25, %v20_v18  ;;  %v37_v23 = vld [vmem:[%s1666_s1 + $0x38] sm:$0xff]  ;;  %v29_v24 = vmul.f32 0.25, %v21_v21 }
   0x7   :  { %1350 = vmatmul.mubr.f32.vlgmr.msra.gmra.mrb[0].mxu1 %v23_v8  ;;  %1362 = vmatprep.subr.mxu0 %v1456_v0 }
   0x8   :  { %1358 = vmatpush3.xpose.msra.mxu1 %v33_v11  ;;  %1359 = vmatprep.mubr.msk.f32.mxu1 %vm1457_vm0, %v1456_v0 }
   0x9   :  { %1355 = vmatmul.mubr.f32.vlgmr.msra.gmra.mrb[2].mxu0 %v24_v10  ;;  %1367 = vmatprep.subr.mxu1 %v1456_v0 }
   0xa   :  { %1363 = vmatpush3.xpose.msra.mxu0 %v34_v13  ;;  %1364 = vmatprep.mubr.msk.f32.mxu0 %vm1457_vm0, %v1456_v0 }
   0xb   :  { %1360 = vmatmul.mubr.f32.vlgmr.msra.gmra.mrb[2].mxu1 %v25_v14  ;;  %1372 = vmatprep.subr.mxu0 %v1456_v0 }
   0xc   :  { %1368 = vmatpush3.xpose.msra.mxu1 %v35_v17  ;;  %1369 = vmatprep.mubr.msk.f32.mxu1 %vm1457_vm0, %v1456_v0 }
   0xd   :  { %1365 = vmatmul.mubr.f32.vlgmr.msra.gmra.mrb[4].mxu0 %v26_v16  ;;  %1377 = vmatprep.subr.mxu1 %v1456_v0 }
   0xe   :  { %1373 = vmatpush3.xpose.msra.mxu0 %v36_v19  ;;  %1374 = vmatprep.mubr.msk.f32.mxu0 %vm1457_vm0, %v1456_v0 }
   0xf   :  { %1370 = vmatmul.mubr.f32.vlgmr.msra.gmra.mrb[4].mxu1 %v27_v20  ;;  %1382 = vmatprep.subr.mxu0 %v1456_v0 }
  0x10   :  { %1378 = vmatpush3.xpose.msra.mxu1 %v37_v23  ;;  %1379 = vmatprep.mubr.msk.f32.mxu1 %vm1457_vm0, %v1456_v0 }
  0x11   :  { %1375 = vmatmul.mubr.f32.vlgmr.msra.gmra.mrb[6].mxu0 %v28_v22  ;;  %1387 = vmatprep.subr.mxu1 %v1456_v0 }
  0x12   :  { %1384 = vmatprep.mubr.msk.f32.mxu0 %vm1457_vm0, %v1456_v0 }
  0x13   :  { %1380 = vmatmul.mubr.f32.vlgmr.msra.gmra.mrb[6].mxu1 %v29_v24 }
  0x14   :  { %1389 = vmatprep.mubr.msk.f32.mxu1 %vm1457_vm0, %v1456_v0 }
  0xd8   :  { %v104_v27 = vpop.f32.mrb[0].mxu0 }
  0xd9   :  { %v601_v28 = vsel %vm600_vm1, %v104_v27, -1e+30  ;;  %v1346_v29 = vpop.f32.mrb[1].mxu0 }
  0xda   :  { %v610_v30 = vsel %vm609_vm2, %v601_v28, -inf  ;;  %v174_v31 = vpop.f32.mrb[0].mxu1 }
  0xdb   :  { %611 = vmax.xlane.f32.xlu0 %v610_v30  ;;  %v602_v32 = vsel %vm600_vm1, %v174_v31, -1e+30  ;;  %v1351_v33 = vpop.f32.mrb[1].mxu1 }
  0xdc   :  { %v244_v34 = vpop.f32.mrb[2].mxu0  ;;  %v613_v35 = vsel %vm609_vm2, %v602_v32, -inf }
  0xdd   :  { %v603_v36 = vsel %vm600_vm1, %v244_v34, -1e+30  ;;  %v1356_v37 = vpop.f32.mrb[3].mxu0 }
  0xde   :  { %v616_v38 = vsel %vm609_vm2, %v603_v36, -inf  ;;  %v314_v39 = vpop.f32.mrb[2].mxu1  ;;  %v699_v37 = vld [vmem:[%s1668_s2 + $0x8] sm:$0xff] }
  0xdf   :  { %614 = vmax.xlane.f32.xlu0 %v613_v35  ;;  %617 = vmax.xlane.f32.xlu1 %v616_v38  ;;  %v604_v40 = vsel %vm600_vm1, %v314_v39, -1e+30  ;;  %v1361_v41 = vpop.f32.mrb[3].mxu1 }
  0xe0   :  { %v384_v42 = vpop.f32.mrb[4].mxu0  ;;  %v619_v43 = vsel %vm609_vm2, %v604_v40, -inf  ;;  %1388 = vmatpush3.msra.mxu1 %v699_v37 }
  0xe1   :  { %v605_v44 = vsel %vm600_vm1, %v384_v42, -1e+30  ;;  %v1366_v45 = vpop.f32.mrb[5].mxu0  ;;  %1397 = vmatprep.subr.mxu1 %v1456_v0 }
  0xe2   :  { %v622_v46 = vsel %vm609_vm2, %v605_v44, -inf  ;;  %v454_v47 = vpop.f32.mrb[4].mxu1 }
  0xe3   :  { %620 = vmax.xlane.f32.xlu1 %v619_v43  ;;  %623 = vmax.xlane.f32.xlu0 %v622_v46  ;;  %v606_v48 = vsel %vm600_vm1, %v454_v47, -1e+30  ;;  %v1371_v49 = vpop.f32.mrb[5].mxu1  ;;  %v700_v46 = vld [vmem:[%s1668_s2 + $0x10] sm:$0xff] }
  0xe4   :  { %v524_v50 = vpop.f32.mrb[6].mxu0  ;;  %v625_v51 = vsel %vm609_vm2, %v606_v48, -inf }
  0xe5   :  { %v607_v52 = vsel %vm600_vm1, %v524_v50, -1e+30  ;;  %v1376_v53 = vpop.f32.mrb[7].mxu0 }
  0xe6   :  { %v628_v54 = vsel %vm609_vm2, %v607_v52, -inf  ;;  %v594_v55 = vpop.f32.mrb[6].mxu1 }
  0xe7   :  { %626 = vmax.xlane.f32.xlu1 %v625_v51  ;;  %629 = vmax.xlane.f32.xlu0 %v628_v54  ;;  %v608_v56 = vsel %vm600_vm1, %v594_v55, -1e+30  ;;  %v1381_v57 = vpop.f32.mrb[7].mxu1  ;;  %v702_v54 = vld [vmem:[%s1668_s2 + $0x20] sm:$0xff] }
  0xe8   :  { %v631_v58 = vsel %vm609_vm2, %v608_v56, -inf }
  0xeb   :  { %632 = vmax.xlane.f32.xlu1 %v631_v58  ;;  %v703_v58 = vld [vmem:[%s1668_s2 + $0x28] sm:$0xff] }
 0x168   :  { %v612_v59 = vpop.xlane.xlu0 %611 }
 0x169   :  { %v634_v60 = vsub.f32 %v601_v28, %v612_v59 }
 0x16b   :  { %v642_v61 = vmul.f32 1.442695, %v634_v60  ;;  %v704_v60 = vld [vmem:[%s1668_s2 + $0x30] sm:$0xff] }
 0x16c   :  { %v615_v62 = vpop.xlane.xlu0 %614  ;;  %v618_v63 = vpop.xlane.xlu1 %617 }
 0x16d   :  { %1424 = vpow2.f32 %v642_v61  ;;  %v635_v1 = vsub.f32 %v602_v32, %v615_v62  ;;  %v636_v2 = vsub.f32 %v603_v36, %v618_v63  ;;  %v698_v36 = vld [vmem:[%s1668_s2] sm:$0xff] }
 0x16e   :  { %1383 = vmatpush3.msra.mxu0 %v698_v36 }
 0x16f   :  { %v644_v3 = vmul.f32 1.442695, %v635_v1  ;;  %v646_v4 = vmul.f32 1.442695, %v636_v2  ;;  %1392 = vmatprep.subr.mxu0 %v1456_v0  ;;  %v705_v1 = vld [vmem:[%s1668_s2 + $0x38] sm:$0xff] }
 0x170   :  { %v621_v5 = vpop.xlane.xlu1 %620  ;;  %v624_v6 = vpop.xlane.xlu0 %623 }
 0x171   :  { %1426 = vpow2.f32 %v644_v3  ;;  %v637_v7 = vsub.f32 %v604_v40, %v621_v5  ;;  %v638_v8 = vsub.f32 %v605_v44, %v624_v6 }
 0x172   :  { %1428 = vpow2.f32 %v646_v4 }
 0x173   :  { %v648_v9 = vmul.f32 1.442695, %v637_v7  ;;  %v650_v10 = vmul.f32 1.442695, %v638_v8 }
 0x174   :  { %v627_v11 = vpop.xlane.xlu1 %626  ;;  %v630_v12 = vpop.xlane.xlu0 %629 }
 0x175   :  { %1430 = vpow2.f32 %v648_v9  ;;  %v639_v13 = vsub.f32 %v606_v48, %v627_v11  ;;  %v640_v14 = vsub.f32 %v607_v52, %v630_v12  ;;  %v701_v52 = vld [vmem:[%s1668_s2 + $0x18] sm:$0xff] }
 0x176   :  { %1432 = vpow2.f32 %v650_v10 }
 0x177   :  { %v1425_v15 = vpop.eup %1424  ;;  %v652_v16 = vmul.f32 1.442695, %v639_v13  ;;  %v654_v17 = vmul.f32 1.442695, %v640_v14 }
 0x178   :  { %v633_v18 = vpop.xlane.xlu1 %632  ;;  %v658_v19 = vsel %vm609_vm2, %v1425_v15, 0.0 }
 0x179   :  { %1434 = vpow2.f32 %v652_v16  ;;  %v641_v20 = vsub.f32 %v608_v56, %v633_v18  ;;  %659 = vadd.xlane.f32.xlu0 %v658_v19 }
 0x17a   :  { %1436 = vpow2.f32 %v654_v17 }
 0x17b   :  { %v1427_v21 = vpop.eup %1426  ;;  %v656_v22 = vmul.f32 1.442695, %v641_v20 }
 0x17c   :  { %v1429_v23 = vpop.eup %1428  ;;  %v661_v24 = vsel %vm609_vm2, %v1427_v21, 0.0 }
 0x17d   :  { %1438 = vpow2.f32 %v656_v22  ;;  %662 = vadd.xlane.f32.xlu1 %v661_v24  ;;  %v664_v25 = vsel %vm609_vm2, %v1429_v23, 0.0 }
 0x17e   :  { %665 = vadd.xlane.f32.xlu0 %v664_v25 }
 0x17f   :  { %v1431_v26 = vpop.eup %1430 }
 0x180   :  { %v1433_v27 = vpop.eup %1432  ;;  %v667_v28 = vsel %vm609_vm2, %v1431_v26, 0.0 }
 0x181   :  { %668 = vadd.xlane.f32.xlu1 %v667_v28  ;;  %v670_v29 = vsel %vm609_vm2, %v1433_v27, 0.0 }
 0x182   :  { %671 = vadd.xlane.f32.xlu0 %v670_v29 }
 0x183   :  { %v1577_v30 = vpop.eup %1434 }
 0x184   :  { %v1579_v31 = vpop.eup %1436  ;;  %v673_v32 = vsel %vm609_vm2, %v1577_v30, 0.0 }
 0x185   :  { %674 = vadd.xlane.f32.xlu1 %v673_v32  ;;  %v676_v33 = vsel %vm609_vm2, %v1579_v31, 0.0 }
 0x186   :  { %677 = vadd.xlane.f32.xlu0 %v676_v33 }
 0x187   :  { %v1585_v34 = vpop.eup %1438 }
 0x188   :  { %v679_v35 = vsel %vm609_vm2, %v1585_v34, 0.0 }
 0x189   :  { %680 = vadd.xlane.f32.xlu1 %v679_v35 }
 0x206   :  { %v660_v38 = vpop.xlane.xlu0 %659 }
 0x207   :  { %1440 = vrcp.f32 %v660_v38 }
 0x20a   :  { %v663_v39 = vpop.xlane.xlu1 %662 }
 0x20b   :  { %1442 = vrcp.f32 %v663_v39  ;;  %v666_v40 = vpop.xlane.xlu0 %665 }
 0x20c   :  { %1444 = vrcp.f32 %v666_v40 }
 0x20e   :  { %v669_v41 = vpop.xlane.xlu1 %668 }
 0x20f   :  { %1446 = vrcp.f32 %v669_v41  ;;  %v672_v42 = vpop.xlane.xlu0 %671 }
 0x210   :  { %1448 = vrcp.f32 %v672_v42 }
 0x211   :  { %v1441_v43 = vpop.eup %1440 }
 0x212   :  { %v683_v44 = vmul.f32 %v1441_v43, %v1425_v15  ;;  %v675_v45 = vpop.xlane.xlu1 %674 }
 0x213   :  { %1450 = vrcp.f32 %v675_v45  ;;  %v678_v47 = vpop.xlane.xlu0 %677 }
 0x214   :  { %1452 = vrcp.f32 %v678_v47  ;;  %1385 = vmatmul.mubr.msk.f32.vlgmr.msra.gmra.mrb[8].mxu0 %vm609_vm2, %v683_v44 }
 0x215   :  { %v1443_v48 = vpop.eup %1442  ;;  %1393 = vmatpush3.msra.mxu0 %v700_v46  ;;  %1394 = vmatprep.mubr.msk.f32.mxu0 %vm1457_vm0, %v1456_v0 }
 0x216   :  { %v1445_v49 = vpop.eup %1444  ;;  %v685_v50 = vmul.f32 %v1443_v48, %v1427_v21  ;;  %v681_v51 = vpop.xlane.xlu1 %680  ;;  %1402 = vmatprep.subr.mxu0 %v1456_v0 }
 0x217   :  { %v687_v53 = vmul.f32 %v1445_v49, %v1429_v23  ;;  %1454 = vrcp.f32 %v681_v51 }
 0x218   :  { %1390 = vmatmul.mubr.msk.f32.vlgmr.msra.gmra.mrb[8].mxu1 %vm609_vm2, %v685_v50 }
 0x219   :  { %v1447_v55 = vpop.eup %1446  ;;  %1395 = vmatmul.mubr.msk.f32.vlgmr.msra.gmra.mrb[10].mxu0 %vm609_vm2, %v687_v53  ;;  %1398 = vmatpush3.msra.mxu1 %v701_v52 }
 0x21a   :  { %v1449_v56 = vpop.eup %1448  ;;  %v689_v57 = vmul.f32 %v1447_v55, %v1431_v26  ;;  %1399 = vmatprep.mubr.msk.f32.mxu1 %vm1457_vm0, %v1456_v0  ;;  %1403 = vmatpush3.msra.mxu0 %v702_v54 }
 0x21b   :  { %v691_v59 = vmul.f32 %v1449_v56, %v1433_v27  ;;  %1404 = vmatprep.mubr.msk.f32.mxu0 %vm1457_vm0, %v1456_v0  ;;  %1407 = vmatprep.subr.mxu1 %v1456_v0 }
 0x21c   :  { %1400 = vmatmul.mubr.msk.f32.vlgmr.msra.gmra.mrb[10].mxu1 %vm609_vm2, %v689_v57  ;;  %1412 = vmatprep.subr.mxu0 %v1456_v0 }
 0x21d   :  { %v1451_v61 = vpop.eup %1450  ;;  %1405 = vmatmul.mubr.msk.f32.vlgmr.msra.gmra.mrb[12].mxu0 %vm609_vm2, %v691_v59  ;;  %1408 = vmatpush3.msra.mxu1 %v703_v58 }
 0x21e   :  { %v1453_v62 = vpop.eup %1452  ;;  %v693_v63 = vmul.f32 %v1451_v61, %v1577_v30  ;;  %1409 = vmatprep.mubr.msk.f32.mxu1 %vm1457_vm0, %v1456_v0  ;;  %1413 = vmatpush3.msra.mxu0 %v704_v60 }
 0x21f   :  { %v695_v2 = vmul.f32 %v1453_v62, %v1579_v31  ;;  %1414 = vmatprep.mubr.msk.f32.mxu0 %vm1457_vm0, %v1456_v0  ;;  %1417 = vmatprep.subr.mxu1 %v1456_v0 }
 0x220   :  { %1410 = vmatmul.mubr.msk.f32.vlgmr.msra.gmra.mrb[12].mxu1 %vm609_vm2, %v693_v63 }
 0x221   :  { %v1455_v3 = vpop.eup %1454  ;;  %1415 = vmatmul.mubr.msk.f32.vlgmr.msra.gmra.mrb[14].mxu0 %vm609_vm2, %v695_v2  ;;  %1418 = vmatpush3.msra.mxu1 %v705_v1 }
 0x222   :  { %v697_v4 = vmul.f32 %v1455_v3, %v1585_v34  ;;  %1419 = vmatprep.mubr.msk.f32.mxu1 %vm1457_vm0, %v1456_v0 }
 0x224   :  { %1420 = vmatmul.mubr.msk.f32.vlgmr.msra.gmra.mrb[14].mxu1 %vm609_vm2, %v697_v4 }
 0x2e7   :  { %v775_v5 = vpop.f32.mrb[8].mxu0 }
 0x2e8   :  { %1290 = vst [vmem:[%s1669_s3] sm:$0xff] %v775_v5  ;;  %v1386_v6 = vpop.f32.mrb[9].mxu0 }
 0x2eb   :  { %v848_v7 = vpop.f32.mrb[8].mxu1 }
 0x2ec   :  { %1291 = vst [vmem:[%s1669_s3 + $0x8] sm:$0xff] %v848_v7  ;;  %v921_v8 = vpop.f32.mrb[10].mxu0  ;;  %v1391_v9 = vpop.f32.mrb[9].mxu1 }
 0x2ed   :  { %1292 = vst [vmem:[%s1669_s3 + $0x10] sm:$0xff] %v921_v8  ;;  %v1396_v0 = vpop.f32.mrb[11].mxu0 }
 0x2ef   :  { %v994_v10 = vpop.f32.mrb[10].mxu1 }
 0x2f0   :  { %1293 = vst [vmem:[%s1669_s3 + $0x18] sm:$0xff] %v994_v10  ;;  %v1067_v11 = vpop.f32.mrb[12].mxu0  ;;  %v1401_v12 = vpop.f32.mrb[11].mxu1 }
 0x2f1   :  { %1294 = vst [vmem:[%s1669_s3 + $0x20] sm:$0xff] %v1067_v11  ;;  %v1406_v13 = vpop.f32.mrb[13].mxu0 }
 0x2f3   :  { %v1140_v14 = vpop.f32.mrb[12].mxu1 }
 0x2f4   :  { %1295 = vst [vmem:[%s1669_s3 + $0x28] sm:$0xff] %v1140_v14  ;;  %v1213_v15 = vpop.f32.mrb[14].mxu0  ;;  %v1411_v16 = vpop.f32.mrb[13].mxu1 }
 0x2f5   :  { %1296 = vst [vmem:[%s1669_s3 + $0x30] sm:$0xff] %v1213_v15  ;;  %v1416_v17 = vpop.f32.mrb[15].mxu0 }
 0x2f7   :  { %v1286_v18 = vpop.f32.mrb[14].mxu1 }
 0x2f8   :  { %1297 = vst [vmem:[%s1669_s3 + $0x38] sm:$0xff] %v1286_v18  ;;  %v1421_v19 = vpop.f32.mrb[15].mxu1 }

// kernel: cblane_forward.24
= control target key start
LH: loop header
LB: loop body
LE: loop exit
PB: predicated region body
PF: predicated region fallthrough
CT: control target
= control target key end

     0   :  { %v1913_v3 = vmov 0.0   ;;  %vm59_vm0 = vcmask 523264   ;;  %v210_v50 = vlaneseq  ;;  %vm1504_vm1 = vcmask 517120   ;;  %s2472_s2 = inlined_call_operand.vmem [shape: f32[64,256], index: 2, kind: input, shape index: {}]   ;;  %s2473_s1 = inlined_call_operand.vmem [shape: f32[64,256], index: 1, kind: input, shape index: {}]   ;;  %s2474_s0 = inlined_call_operand.vmem [shape: f32[4,2,64], index: 0, kind: input, shape index: {}]   ;;  %s2475_s3 = inlined_call_operand.vmem [shape: f32[1,256], index: 3, kind: input, shape index: {}]   ;;  %s2476_s5 = inlined_call_operand.vmem [shape: f32[64,256], index: 5, kind: input, shape index: {}]   ;;  %s2477_s4 = inlined_call_operand.vmem [shape: f32[64,256], index: 4, kind: input, shape index: {}]   ;;  %s2478_s6 = inlined_call_operand.vmem [shape: f32[1,256], index: 6, kind: input, shape index: {}]   ;;  %s2479_s7 = inlined_call_operand.vmem [shape: f32[2,64], index: 7, kind: output, shape index: {}]  }
   0x1   :  { %v44_v0 = vld [vmem:[%s2472_s2 + $0x8] sm:$0xff]  ;;  %v46_v1 = vld [vmem:[%s2472_s2 + $0x18] sm:$0xff]  ;;  %v43_v2 = vld [vmem:[%s2472_s2] sm:$0xff]  ;;  %127 = vmatprep.mubr.f32.mxu0 %v1913_v3  ;;  %340 = vmatprep.mubr.f32.mxu1 %v1913_v3 }
   0x2   :  { %v1966_v4 = vpack.c.bf16 %v46_v1, %v44_v0  ;;  %v45_v5 = vld [vmem:[%s2472_s2 + $0x10] sm:$0xff]  ;;  %v48_v6 = vld [vmem:[%s2472_s2 + $0x28] sm:$0xff]  ;;  %v50_v7 = vld [vmem:[%s2472_s2 + $0x38] sm:$0xff]  ;;  %v2117_v51 = vshrl.u32 %v210_v50, 7 }
   0x3   :  { %v1977_v8 = vpack.c.bf16 %v45_v5, %v43_v2  ;;  %v1979_v9 = vpack.c.bf16 %v50_v7, %v48_v6  ;;  %v47_v10 = vld [vmem:[%s2472_s2 + $0x20] sm:$0xff]  ;;  %v49_v11 = vld [vmem:[%s2472_s2 + $0x30] sm:$0xff]  ;;  %v52_v12 = vld [vmem:[%s2472_s2 + $0x48] sm:$0xff] }
   0x4   :  { %1544 = vmatprep.subr.bf16.mxu0 %v1966_v4  ;;  %v54_v13 = vld [vmem:[%s2472_s2 + $0x58] sm:$0xff]  ;;  %v1995_v14 = vpack.c.bf16 %v49_v11, %v47_v10  ;;  %v51_v16 = vld [vmem:[%s2472_s2 + $0x40] sm:$0xff]  ;;  %v53_v17 = vld [vmem:[%s2472_s2 + $0x50] sm:$0xff]  ;;  %v212_v52 = vsub.s32 0, %v2117_v51  ;;  %v216_v59 = vsub.s32 1, %v2117_v51 }
   0x5   :  { %1546 = vmatpush1.bf16.msra.mxu0 %v1977_v8  ;;  %v1998_v15 = vpack.c.bf16 %v54_v13, %v52_v12  ;;  %v56_v18 = vld [vmem:[%s2472_s2 + $0x68] sm:$0xff]  ;;  %v58_v19 = vld [vmem:[%s2472_s2 + $0x78] sm:$0xff]  ;;  %v2013_v20 = vpack.c.bf16 %v53_v17, %v51_v16  ;;  %v55_v22 = vld [vmem:[%s2472_s2 + $0x60] sm:$0xff] }
   0x6   :  { %1548 = vmatprep.subr.bf16.mxu0 %v1979_v9  ;;  %v2016_v21 = vpack.c.bf16 %v58_v19, %v56_v18  ;;  %v57_v23 = vld [vmem:[%s2472_s2 + $0x70] sm:$0xff]  ;;  %v28_v24 = vld [vmem:[%s2473_s1 + $0x8] sm:$0xff]  ;;  %v30_v25 = vld [vmem:[%s2473_s1 + $0x18] sm:$0xff] }
   0x7   :  { %v2031_v26 = vpack.c.bf16 %v57_v23, %v55_v22  ;;  %v2034_v27 = vpack.c.bf16 %v30_v25, %v28_v24  ;;  %v27_v28 = vld [vmem:[%s2473_s1] sm:$0xff]  ;;  %v29_v29 = vld [vmem:[%s2473_s1 + $0x10] sm:$0xff]  ;;  %v32_v30 = vld [vmem:[%s2473_s1 + $0x28] sm:$0xff] }
   0x8   :  { %v34_v31 = vld [vmem:[%s2473_s1 + $0x38] sm:$0xff]  ;;  %v2049_v32 = vpack.c.bf16 %v29_v29, %v27_v28  ;;  %v31_v34 = vld [vmem:[%s2473_s1 + $0x20] sm:$0xff]  ;;  %v33_v35 = vld [vmem:[%s2473_s1 + $0x30] sm:$0xff] }
   0x9   :  { %1550 = vmatpush1.bf16.msra.mxu0 %v1995_v14  ;;  %v2052_v33 = vpack.c.bf16 %v34_v31, %v32_v30  ;;  %v36_v36 = vld [vmem:[%s2473_s1 + $0x48] sm:$0xff]  ;;  %v38_v37 = vld [vmem:[%s2473_s1 + $0x58] sm:$0xff]  ;;  %v2068_v38 = vpack.c.bf16 %v33_v35, %v31_v34  ;;  %v35_v40 = vld [vmem:[%s2473_s1 + $0x40] sm:$0xff] }
   0xa   :  { %1552 = vmatprep.subr.bf16.mxu0 %v1998_v15  ;;  %v2072_v39 = vpack.c.bf16 %v38_v37, %v36_v36  ;;  %v37_v41 = vld [vmem:[%s2473_s1 + $0x50] sm:$0xff]  ;;  %v40_v42 = vld [vmem:[%s2473_s1 + $0x68] sm:$0xff]  ;;  %v42_v43 = vld [vmem:[%s2473_s1 + $0x78] sm:$0xff] }
   0xb   :  { %v2087_v44 = vpack.c.bf16 %v37_v41, %v35_v40  ;;  %v2090_v45 = vpack.c.bf16 %v42_v43, %v40_v42  ;;  %v39_v46 = vld [vmem:[%s2473_s1 + $0x60] sm:$0xff]  ;;  %v41_v47 = vld [vmem:[%s2473_s1 + $0x70] sm:$0xff]  ;;  %v261_v5 = vld [vmem:[%s2476_s5 + $0x8] sm:$0xff] }
   0xc   :  { %v2099_v48 = vpack.c.bf16 %v41_v47, %v39_v46  ;;  %v26_v49 = vld [vmem:[%s2474_s0] sm:$0x3]  ;;  %v263_v6 = vld [vmem:[%s2476_s5 + $0x18] sm:$0xff]  ;;  %v262_v11 = vld [vmem:[%s2476_s5 + $0x10] sm:$0xff] }
   0xd   :  { %1554 = vmatpush1.bf16.msra.mxu0 %v2013_v20  ;;  %v208_v53 = vld [vmem:[%s2475_s3] sm:$0x3]  ;;  %s1914_s3 = smov 64   ;;  %v2150_v10 = vpack.c.bf16 %v263_v6, %v261_v5  ;;  %v265_v12 = vld [vmem:[%s2476_s5 + $0x28] sm:$0xff]  ;;  %v267_v13 = vld [vmem:[%s2476_s5 + $0x38] sm:$0xff] }
   0xe   :  { %1556 = vmatprep.subr.bf16.mxu0 %v2016_v21  ;;  %v2125_v54 = vrot.slane %v208_v53, %v212_v52  ;;  %v2131_v60 = vrot.slane %v208_v53, %v216_v59  ;;  %v260_v7 = vld [vmem:[%s2476_s5] sm:$0xff]  ;;  %v2163_v17 = vpack.c.bf16 %v267_v13, %v265_v12  ;;  %v266_v19 = vld [vmem:[%s2476_s5 + $0x30] sm:$0xff]  ;;  %v269_v22 = vld [vmem:[%s2476_s5 + $0x48] sm:$0xff] }
   0xf   :  { %v2161_v16 = vpack.c.bf16 %v262_v11, %v260_v7  ;;  %v264_v18 = vld [vmem:[%s2476_s5 + $0x20] sm:$0xff]  ;;  %1576 = vmatprep.subr.bf16.mxu1 %v2150_v10  ;;  %v271_v23 = vld [vmem:[%s2476_s5 + $0x58] sm:$0xff]  ;;  %v270_v29 = vld [vmem:[%s2476_s5 + $0x50] sm:$0xff] }
  0x10   :  { %v2179_v24 = vpack.c.bf16 %v266_v19, %v264_v18  ;;  %v2182_v25 = vpack.c.bf16 %v271_v23, %v269_v22  ;;  %v268_v28 = vld [vmem:[%s2476_s5 + $0x40] sm:$0xff]  ;;  %v273_v30 = vld [vmem:[%s2476_s5 + $0x68] sm:$0xff]  ;;  %v275_v31 = vld [vmem:[%s2476_s5 + $0x78] sm:$0xff] }
  0x11   :  { %1558 = vmatpush1.bf16.msra.mxu0 %v2031_v26  ;;  %1578 = vmatpush1.bf16.msra.mxu1 %v2161_v16  ;;  %v2197_v34 = vpack.c.bf16 %v270_v29, %v268_v28  ;;  %v2200_v35 = vpack.c.bf16 %v275_v31, %v273_v30  ;;  %v272_v36 = vld [vmem:[%s2476_s5 + $0x60] sm:$0xff]  ;;  %v274_v37 = vld [vmem:[%s2476_s5 + $0x70] sm:$0xff]  ;;  %v245_v40 = vld [vmem:[%s2477_s4 + $0x8] sm:$0xff] }
  0x12   :  { %1560 = vmatprep.subr.bf16.mxu0 %v2034_v27  ;;  %1580 = vmatprep.subr.bf16.mxu1 %v2163_v17  ;;  %v247_v41 = vld [vmem:[%s2477_s4 + $0x18] sm:$0xff]  ;;  %v2215_v42 = vpack.c.bf16 %v274_v37, %v272_v36  ;;  %v244_v46 = vld [vmem:[%s2477_s4] sm:$0xff]  ;;  %v246_v47 = vld [vmem:[%s2477_s4 + $0x10] sm:$0xff] }
  0x13   :  { %v2218_v43 = vpack.c.bf16 %v247_v41, %v245_v40  ;;  %v251_v50 = vld [vmem:[%s2477_s4 + $0x38] sm:$0xff]  ;;  %v2233_v53 = vpack.c.bf16 %v246_v47, %v244_v46  ;;  %v254_v5 = vld [vmem:[%s2477_s4 + $0x50] sm:$0xff]  ;;  %v257_v6 = vld [vmem:[%s2477_s4 + $0x68] sm:$0xff] }
  0x14   :  { %128 = vmatmul.mubr.f32.vlgmr.msra.gmra.mrb[0].mxu0 %v1913_v3  ;;  %v259_v7 = vld [vmem:[%s2477_s4 + $0x78] sm:$0xff]  ;;  %v256_v13 = vld [vmem:[%s2477_s4 + $0x60] sm:$0xff]  ;;  %v258_v18 = vld [vmem:[%s2477_s4 + $0x70] sm:$0xff] }
  0x15   :  { %1562 = vmatpush1.bf16.msra.mxu0 %v2049_v32  ;;  %201 = vmatprep.mubr.f32.mxu0 %v1913_v3  ;;  %v2274_v12 = vpack.c.bf16 %v259_v7, %v257_v6  ;;  %v2283_v19 = vpack.c.bf16 %v258_v18, %v256_v13 }
  0x16   :  { %1564 = vmatprep.subr.bf16.mxu0 %v2052_v33  ;;  %1582 = vmatpush1.bf16.msra.mxu1 %v2179_v24 }
  0x17   :  { %1584 = vmatprep.subr.bf16.mxu1 %v2182_v25 }
  0x19   :  { %1566 = vmatpush1.bf16.msra.mxu0 %v2068_v38 }
  0x1a   :  { %1568 = vmatprep.subr.bf16.mxu0 %v2072_v39  ;;  %1586 = vmatpush1.bf16.msra.mxu1 %v2197_v34 }
  0x1b   :  { %1588 = vmatprep.subr.bf16.mxu1 %v2200_v35 }
  0x1d   :  { %1570 = vmatpush1.bf16.msra.mxu0 %v2087_v44 }
  0x1e   :  { %1572 = vmatprep.subr.bf16.mxu0 %v2090_v45  ;;  %1590 = vmatpush1.bf16.msra.mxu1 %v2215_v42 }
  0x1f   :  { %1592 = vmatprep.subr.bf16.mxu1 %v2218_v43 }
  0x21   :  { %1574 = vmatpush1.bf16.msra.mxu0 %v2099_v48  ;;  %341 = vmatmul.mubr.f32.vlgmr.msra.gmra.mrb[0].mxu1 %v1913_v3 }
  0x22   :  { %1608 = vmatprep.subr.bf16.mxu0 %v1966_v4  ;;  %1594 = vmatpush1.bf16.msra.mxu1 %v2233_v53 }
  0x23   :  { %416 = vmatprep.mubr.f32.mxu1 %v1913_v3 }
  0x24   :  { %1510 = vmatmul.mubr.msk.f32.vlgmr.msra.gmra.mrb[0].mxu0 %vm59_vm0, %v26_v49  ;;  %v249_v49 = vld [vmem:[%s2477_s4 + $0x28] sm:$0xff] }
  0x25   :  { %1610 = vmatpush1.bf16.msra.mxu0 %v1977_v8  ;;  %525 = vmatprep.mubr.f32.mxu0 %v1913_v3 }
  0x26   :  { %1612 = vmatprep.subr.bf16.mxu0 %v1979_v9 }
  0x29   :  { %1614 = vmatpush1.bf16.msra.mxu0 %v1995_v14 }
  0x2a   :  { %1616 = vmatprep.subr.bf16.mxu0 %v1998_v15 }
  0x2d   :  { %1618 = vmatpush1.bf16.msra.mxu0 %v2013_v20 }
  0x2e   :  { %1620 = vmatprep.subr.bf16.mxu0 %v2016_v21 }
  0x31   :  { %1622 = vmatpush1.bf16.msra.mxu0 %v2031_v26 }
  0x32   :  { %1624 = vmatprep.subr.bf16.mxu0 %v2034_v27 }
  0xf7   :  { %v203_v55 = vpop.f32.mrb[0].mxu0 }
  0xf8   :  { %v220_v56 = vadd.f32 %v2125_v54, %v203_v55  ;;  %v205_v57 = vpop.f32.mrb[1].mxu0  ;;  %v2236_v55 = vpack.c.bf16 %v251_v50, %v249_v49 }
  0xf9   :  { %v2134_v61 = vadd.f32 %v2131_v60, %v205_v57  ;;  %v250_v57 = vld [vmem:[%s2477_s4 + $0x30] sm:$0xff] }
  0xfa   :  { %v1511_v58 = vmul.f32 -1.442695, %v220_v56  ;;  %v248_v56 = vld [vmem:[%s2477_s4 + $0x20] sm:$0xff]  ;;  %1596 = vmatprep.subr.bf16.mxu1 %v2236_v55 }
  0xfb   :  { %v1512_v22 = vmul.f32 -1.442695, %v2134_v61 }
  0xfc   :  { %1817 = vpow2.f32 %v1511_v58  ;;  %v253_v58 = vld [vmem:[%s2477_s4 + $0x48] sm:$0xff] }
  0xfd   :  { %1819 = vtanh.f32 %v2134_v61  ;;  %v1516_v61 = vld [vmem:[%s2474_s0 + $0x2] sm:$0x3] }
 0x106   :  { %v1818_v62 = vpop.eup %1817 }
 0x107   :  { %v225_v63 = vadd.f32 1.0, %v1818_v62  ;;  %v1820_v0 = vpop.eup %1819  ;;  %v255_v62 = vld [vmem:[%s2477_s4 + $0x58] sm:$0xff] }
 0x109   :  { %1821 = vrcp.f32 %v225_v63  ;;  %v2252_v63 = vpack.c.bf16 %v250_v57, %v248_v56 }
 0x10a   :  { %1823 = vpow2.f32 %v1512_v22 }
 0x10b   :  { %1598 = vmatpush1.bf16.msra.mxu1 %v2252_v63 }
 0x113   :  { %v2137_v1 = vpop.eup %1821 }
 0x114   :  { %v236_v2 = vmul.f32 %v2137_v1, %v1820_v0  ;;  %v2256_v0 = vpack.c.bf16 %v255_v62, %v253_v58  ;;  %v1824_v23 = vpop.eup %1823  ;;  %v235_v29 = vmul.f32 0.0, %v2137_v1  ;;  %v423_v1 = vld [vmem:[%s2478_s6] sm:$0x3] }
 0x115   :  { %v232_v28 = vadd.f32 1.0, %v1824_v23  ;;  %v2332_v46 = vrot.slane %v423_v1, %v212_v52  ;;  %v2337_v57 = vrot.slane %v423_v1, %v216_v59 }
 0x116   :  { %238 = vrot.lane.b32.xlu0 %v236_v2, %s1914_s3  ;;  %v252_v2 = vld [vmem:[%s2477_s4 + $0x40] sm:$0xff]  ;;  %1600 = vmatprep.subr.bf16.mxu1 %v2256_v0 }
 0x117   :  { %v2271_v11 = vpack.c.bf16 %v254_v5, %v252_v2  ;;  %1825 = vrcp.f32 %v232_v28 }
 0x119   :  { %1602 = vmatpush1.bf16.msra.mxu1 %v2271_v11 }
 0x11a   :  { %1604 = vmatprep.subr.bf16.mxu1 %v2274_v12 }
 0x11d   :  { %1606 = vmatpush1.bf16.msra.mxu1 %v2283_v19 }
 0x11e   :  { %1640 = vmatprep.subr.bf16.mxu1 %v2150_v10 }
 0x121   :  { %v1826_v36 = vpop.eup %1825 }
 0x188   :  { %v239_v30 = vpop.permute.xlu0 %238 }
 0x189   :  { %v2290_v31 = vadd.f32 %v239_v30, %v235_v29 }
 0x18b   :  { %1827 = vtanh.f32 %v2290_v31 }
 0x195   :  { %v1828_v37 = vpop.eup %1827 }
 0x196   :  { %v243_v40 = vmul.f32 %v1828_v37, %v1826_v36 }
 0x198   :  { %348 = vrot.lane.b32.xlu0 %v243_v40, %s1914_s3 }
 0x20a   :  { %v349_v41 = vpop.permute.xlu0 %348 }
 0x20b   :  { %1513 = vmatmul.mubr.msk.f32.vlgmr.msra.gmra.mrb[0].mxu1 %vm59_vm0, %v349_v41  ;;  %1517 = vmatmul.mubr.msk.f32.vlgmr.msra.gmra.mrb[2].mxu0 %vm59_vm0, %v349_v41 }
 0x20c   :  { %1626 = vmatpush1.bf16.msra.mxu0 %v2049_v32  ;;  %599 = vmatprep.mubr.f32.mxu0 %v1913_v3 }
 0x20d   :  { %1628 = vmatprep.subr.bf16.mxu0 %v2052_v33  ;;  %1642 = vmatpush1.bf16.msra.mxu1 %v2161_v16 }
 0x20e   :  { %1644 = vmatprep.subr.bf16.mxu1 %v2163_v17  ;;  %699 = vmatprep.mubr.f32.mxu1 %v1913_v3 }
 0x210   :  { %1630 = vmatpush1.bf16.msra.mxu0 %v2068_v38 }
 0x211   :  { %1632 = vmatprep.subr.bf16.mxu0 %v2072_v39  ;;  %1646 = vmatpush1.bf16.msra.mxu1 %v2179_v24 }
 0x212   :  { %1648 = vmatprep.subr.bf16.mxu1 %v2182_v25 }
 0x214   :  { %1634 = vmatpush1.bf16.msra.mxu0 %v2087_v44 }
 0x215   :  { %1636 = vmatprep.subr.bf16.mxu0 %v2090_v45  ;;  %1650 = vmatpush1.bf16.msra.mxu1 %v2197_v34 }
 0x216   :  { %1652 = vmatprep.subr.bf16.mxu1 %v2200_v35 }
 0x218   :  { %1638 = vmatpush1.bf16.msra.mxu0 %v2099_v48 }
 0x219   :  { %1654 = vmatpush1.bf16.msra.mxu1 %v2215_v42  ;;  %1672 = vmatprep.subr.bf16.mxu0 %v1966_v4 }
 0x21a   :  { %1656 = vmatprep.subr.bf16.mxu1 %v2218_v43 }
 0x21b   :  { %1518 = vmatmul.mubr.msk.f32.vlgmr.msra.gmra.mrb[2].mxu0 %vm59_vm0, %v1516_v61 }
 0x21c   :  { %1674 = vmatpush1.bf16.msra.mxu0 %v1977_v8  ;;  %872 = vmatprep.mubr.f32.mxu0 %v1913_v3 }
 0x21d   :  { %1676 = vmatprep.subr.bf16.mxu0 %v1979_v9 }
 0x220   :  { %1678 = vmatpush1.bf16.msra.mxu0 %v1995_v14 }
 0x221   :  { %1680 = vmatprep.subr.bf16.mxu0 %v1998_v15 }
 0x224   :  { %1682 = vmatpush1.bf16.msra.mxu0 %v2013_v20 }
 0x225   :  { %1684 = vmatprep.subr.bf16.mxu0 %v2016_v21 }
 0x228   :  { %1686 = vmatpush1.bf16.msra.mxu0 %v2031_v26 }
 0x229   :  { %1688 = vmatprep.subr.bf16.mxu0 %v2034_v27 }
 0x2de   :  { %v418_v47 = vpop.f32.mrb[0].mxu1 }
 0x2df   :  { %v435_v49 = vadd.f32 %v2332_v46, %v418_v47  ;;  %v420_v50 = vpop.f32.mrb[1].mxu1 }
 0x2e0   :  { %v436_v58 = vadd.f32 %v2337_v57, %v420_v50 }
 0x2e1   :  { %v1514_v56 = vmul.f32 -1.442695, %v435_v49 }
 0x2e2   :  { %v1515_v36 = vmul.f32 -1.442695, %v436_v58 }
 0x2e3   :  { %1829 = vpow2.f32 %v1514_v56 }
 0x2e4   :  { %1831 = vtanh.f32 %v436_v58 }
 0x2ed   :  { %v1830_v62 = vpop.eup %1829 }
 0x2ee   :  { %v440_v2 = vadd.f32 1.0, %v1830_v62  ;;  %v601_v5 = vpop.f32.mrb[2].mxu0  ;;  %v1832_v13 = vpop.eup %1831 }
 0x2ef   :  { %v606_v6 = vadd.f32 %v601_v5, %v2125_v54  ;;  %v603_v52 = vpop.f32.mrb[3].mxu0 }
 0x2f0   :  { %1833 = vrcp.f32 %v440_v2  ;;  %v607_v22 = vadd.f32 %v603_v52, %v2131_v60 }
 0x2f1   :  { %v1519_v7 = vmul.f32 -1.442695, %v606_v6 }
 0x2f2   :  { %v1520_v40 = vmul.f32 -1.442695, %v607_v22 }
 0x2f3   :  { %1835 = vpow2.f32 %v1519_v7 }
 0x2f4   :  { %1837 = vtanh.f32 %v607_v22  ;;  %v1525_v22 = vld [vmem:[%s2474_s0 + $0x4] sm:$0x3] }
 0x2fa   :  { %v1834_v18 = vpop.eup %1833 }
 0x2fb   :  { %v451_v23 = vmul.f32 %v1834_v18, %v1832_v13  ;;  %v450_v61 = vmul.f32 0.0, %v1834_v18 }
 0x2fd   :  { %v1836_v51 = vpop.eup %1835  ;;  %453 = vrot.lane.b32.xlu1 %v451_v23, %s1914_s3 }
 0x2fe   :  { %v611_v59 = vadd.f32 1.0, %v1836_v51  ;;  %v1838_v28 = vpop.eup %1837 }
 0x300   :  { %1839 = vrcp.f32 %v611_v59 }
 0x301   :  { %1841 = vpow2.f32 %v1515_v36 }
 0x302   :  { %1843 = vpow2.f32 %v1520_v40 }
 0x30a   :  { %v1840_v29 = vpop.eup %1839 }
 0x30b   :  { %v622_v30 = vmul.f32 %v1840_v29, %v1838_v28  ;;  %v1842_v37 = vpop.eup %1841  ;;  %v621_v5 = vmul.f32 %v1840_v29, %v2290_v31 }
 0x30c   :  { %v447_v41 = vadd.f32 1.0, %v1842_v37  ;;  %v1844_v49 = vpop.eup %1843 }
 0x30d   :  { %624 = vrot.lane.b32.xlu1 %v622_v30, %s1914_s3  ;;  %v618_v62 = vadd.f32 1.0, %v1844_v49 }
 0x30e   :  { %1845 = vrcp.f32 %v447_v41 }
 0x318   :  { %v1846_v50 = vpop.eup %1845 }
 0x36f   :  { %v454_v1 = vpop.permute.xlu1 %453 }
 0x370   :  { %v2344_v47 = vadd.f32 %v454_v1, %v450_v61 }
 0x372   :  { %1847 = vtanh.f32 %v2344_v47 }
 0x373   :  { %1849 = vrcp.f32 %v618_v62 }
 0x37c   :  { %v1848_v56 = vpop.eup %1847 }
 0x37d   :  { %v458_v2 = vmul.f32 %v1848_v56, %v1846_v50  ;;  %v1850_v52 = vpop.eup %1849 }
 0x37f   :  { %v625_v58 = vpop.permute.xlu1 %624  ;;  %631 = vrot.lane.b32.xlu0 %v458_v2, %s1914_s3 }
 0x380   :  { %v2349_v6 = vadd.f32 %v625_v58, %v621_v5 }
 0x382   :  { %1851 = vtanh.f32 %v2349_v6 }
 0x38c   :  { %v1852_v7 = vpop.eup %1851 }
 0x38d   :  { %v629_v13 = vmul.f32 %v1852_v7, %v1850_v52 }
 0x38f   :  { %707 = vrot.lane.b32.xlu1 %v629_v13, %s1914_s3 }
 0x3f1   :  { %v632_v18 = vpop.permute.xlu0 %631 }
 0x3f2   :  { %1521 = vmatmul.mubr.msk.f32.vlgmr.msra.gmra.mrb[2].mxu1 %vm59_vm0, %v632_v18 }
 0x3f3   :  { %1658 = vmatpush1.bf16.msra.mxu1 %v2233_v53  ;;  %775 = vmatprep.mubr.f32.mxu1 %v1913_v3 }
 0x3f4   :  { %1660 = vmatprep.subr.bf16.mxu1 %v2236_v55 }
 0x3f7   :  { %1662 = vmatpush1.bf16.msra.mxu1 %v2252_v63 }
 0x3f8   :  { %1664 = vmatprep.subr.bf16.mxu1 %v2256_v0 }
 0x3fb   :  { %1666 = vmatpush1.bf16.msra.mxu1 %v2271_v11 }
 0x3fc   :  { %1668 = vmatprep.subr.bf16.mxu1 %v2274_v12 }
 0x3ff   :  { %1670 = vmatpush1.bf16.msra.mxu1 %v2283_v19 }
 0x400   :  { %1704 = vmatprep.subr.bf16.mxu1 %v2150_v10 }
 0x401   :  { %v708_v31 = vpop.permute.xlu1 %707 }
 0x402   :  { %1522 = vmatmul.mubr.msk.f32.vlgmr.msra.gmra.mrb[2].mxu1 %vm59_vm0, %v708_v31  ;;  %1526 = vmatmul.mubr.msk.f32.vlgmr.msra.gmra.mrb[4].mxu0 %vm59_vm0, %v708_v31 }
 0x403   :  { %1690 = vmatpush1.bf16.msra.mxu0 %v2049_v32  ;;  %946 = vmatprep.mubr.f32.mxu0 %v1913_v3 }
 0x404   :  { %1692 = vmatprep.subr.bf16.mxu0 %v2052_v33  ;;  %1706 = vmatpush1.bf16.msra.mxu1 %v2161_v16 }
 0x405   :  { %1708 = vmatprep.subr.bf16.mxu1 %v2163_v17  ;;  %1046 = vmatprep.mubr.f32.mxu1 %v1913_v3 }
 0x407   :  { %1694 = vmatpush1.bf16.msra.mxu0 %v2068_v38 }
 0x408   :  { %1696 = vmatprep.subr.bf16.mxu0 %v2072_v39  ;;  %1710 = vmatpush1.bf16.msra.mxu1 %v2179_v24 }
 0x409   :  { %1712 = vmatprep.subr.bf16.mxu1 %v2182_v25 }
 0x40b   :  { %1698 = vmatpush1.bf16.msra.mxu0 %v2087_v44 }
 0x40c   :  { %1700 = vmatprep.subr.bf16.mxu0 %v2090_v45  ;;  %1714 = vmatpush1.bf16.msra.mxu1 %v2197_v34 }
 0x40d   :  { %1716 = vmatprep.subr.bf16.mxu1 %v2200_v35 }
 0x40f   :  { %1702 = vmatpush1.bf16.msra.mxu0 %v2099_v48 }
 0x410   :  { %1718 = vmatpush1.bf16.msra.mxu1 %v2215_v42  ;;  %1736 = vmatprep.subr.bf16.mxu0 %v1966_v4 }
 0x411   :  { %1720 = vmatprep.subr.bf16.mxu1 %v2218_v43 }
 0x412   :  { %1527 = vmatmul.mubr.msk.f32.vlgmr.msra.gmra.mrb[4].mxu0 %vm59_vm0, %v1525_v22 }
 0x413   :  { %1738 = vmatpush1.bf16.msra.mxu0 %v1977_v8  ;;  %1219 = vmatprep.mubr.f32.mxu0 %v1913_v3 }
 0x414   :  { %1740 = vmatprep.subr.bf16.mxu0 %v1979_v9 }
 0x417   :  { %1742 = vmatpush1.bf16.msra.mxu0 %v1995_v14 }
 0x418   :  { %1744 = vmatprep.subr.bf16.mxu0 %v1998_v15 }
 0x41b   :  { %1746 = vmatpush1.bf16.msra.mxu0 %v2013_v20 }
 0x41c   :  { %1748 = vmatprep.subr.bf16.mxu0 %v2016_v21 }
 0x41f   :  { %1750 = vmatpush1.bf16.msra.mxu0 %v2031_v26 }
 0x420   :  { %1752 = vmatprep.subr.bf16.mxu0 %v2034_v27 }
 0x4d5   :  { %v777_v4 = vpop.f32.mrb[2].mxu1 }
 0x4d6   :  { %v782_v23 = vadd.f32 %v777_v4, %v2332_v46  ;;  %v779_v8 = vpop.f32.mrb[3].mxu1 }
 0x4d7   :  { %v783_v9 = vadd.f32 %v779_v8, %v2337_v57 }
 0x4d8   :  { %v1523_v51 = vmul.f32 -1.442695, %v782_v23 }
 0x4d9   :  { %v1524_v1 = vmul.f32 -1.442695, %v783_v9 }
 0x4da   :  { %1853 = vpow2.f32 %v1523_v51 }
 0x4db   :  { %1855 = vtanh.f32 %v783_v9 }
 0x4e4   :  { %v1854_v59 = vpop.eup %1853 }
 0x4e5   :  { %v787_v14 = vadd.f32 1.0, %v1854_v59  ;;  %v948_v28 = vpop.f32.mrb[4].mxu0  ;;  %v1856_v26 = vpop.eup %1855 }
 0x4e6   :  { %v953_v15 = vadd.f32 %v948_v28, %v2125_v54  ;;  %v950_v20 = vpop.f32.mrb[5].mxu0 }
 0x4e7   :  { %1857 = vrcp.f32 %v787_v14  ;;  %v954_v29 = vadd.f32 %v950_v20, %v2131_v60 }
 0x4e8   :  { %v1528_v21 = vmul.f32 -1.442695, %v953_v15 }
 0x4e9   :  { %v1529_v50 = vmul.f32 -1.442695, %v954_v29 }
 0x4ea   :  { %1859 = vpow2.f32 %v1528_v21 }
 0x4eb   :  { %1861 = vtanh.f32 %v954_v29 }
 0x4f1   :  { %v1858_v27 = vpop.eup %1857 }
 0x4f2   :  { %v798_v30 = vmul.f32 %v1858_v27, %v1856_v26  ;;  %v797_v62 = vmul.f32 %v1858_v27, %v2344_v47 }
 0x4f4   :  { %v1860_v36 = vpop.eup %1859  ;;  %800 = vrot.lane.b32.xlu0 %v798_v30, %s1914_s3 }
 0x4f5   :  { %v958_v37 = vadd.f32 1.0, %v1860_v36  ;;  %v1862_v40 = vpop.eup %1861 }
 0x4f7   :  { %1863 = vrcp.f32 %v958_v37 }
 0x4f8   :  { %1865 = vpow2.f32 %v1524_v1 }
 0x4f9   :  { %1867 = vpow2.f32 %v1529_v50 }
 0x501   :  { %v1864_v41 = vpop.eup %1863 }
 0x502   :  { %v969_v61 = vmul.f32 %v1864_v41, %v1862_v40  ;;  %v1866_v49 = vpop.eup %1865  ;;  %v968_v31 = vmul.f32 %v1864_v41, %v2349_v6 }
 0x503   :  { %v794_v56 = vadd.f32 1.0, %v1866_v49  ;;  %v1868_v58 = vpop.eup %1867 }
 0x504   :  { %971 = vrot.lane.b32.xlu1 %v969_v61, %s1914_s3  ;;  %v965_v13 = vadd.f32 1.0, %v1868_v58 }
 0x505   :  { %1869 = vrcp.f32 %v794_v56 }
 0x50f   :  { %v1870_v52 = vpop.eup %1869 }
 0x566   :  { %v801_v2 = vpop.permute.xlu0 %800 }
 0x567   :  { %v2403_v5 = vadd.f32 %v801_v2, %v797_v62 }
 0x569   :  { %1871 = vtanh.f32 %v2403_v5 }
 0x56a   :  { %1873 = vrcp.f32 %v965_v13 }
 0x573   :  { %v1872_v7 = vpop.eup %1871 }
 0x574   :  { %v805_v18 = vmul.f32 %v1872_v7, %v1870_v52  ;;  %v1874_v47 = vpop.eup %1873 }
 0x576   :  { %v972_v22 = vpop.permute.xlu1 %971  ;;  %978 = vrot.lane.b32.xlu0 %v805_v18, %s1914_s3 }
 0x577   :  { %v2408_v4 = vadd.f32 %v972_v22, %v968_v31 }
 0x579   :  { %1875 = vtanh.f32 %v2408_v4 }
 0x583   :  { %v1876_v23 = vpop.eup %1875 }
 0x584   :  { %v976_v8 = vmul.f32 %v1876_v23, %v1874_v47 }
 0x586   :  { %1054 = vrot.lane.b32.xlu1 %v976_v8, %s1914_s3 }
 0x5e8   :  { %v979_v51 = vpop.permute.xlu0 %978 }
 0x5e9   :  { %1530 = vmatmul.mubr.msk.f32.vlgmr.msra.gmra.mrb[4].mxu1 %vm59_vm0, %v979_v51 }
 0x5ea   :  { %1722 = vmatpush1.bf16.msra.mxu1 %v2233_v53  ;;  %1122 = vmatprep.mubr.f32.mxu1 %v1913_v3 }
 0x5eb   :  { %1724 = vmatprep.subr.bf16.mxu1 %v2236_v55 }
 0x5ee   :  { %1726 = vmatpush1.bf16.msra.mxu1 %v2252_v63 }
 0x5ef   :  { %1728 = vmatprep.subr.bf16.mxu1 %v2256_v0 }
 0x5f2   :  { %1730 = vmatpush1.bf16.msra.mxu1 %v2271_v11 }
 0x5f3   :  { %1732 = vmatprep.subr.bf16.mxu1 %v2274_v12 }
 0x5f6   :  { %1734 = vmatpush1.bf16.msra.mxu1 %v2283_v19 }
 0x5f7   :  { %1768 = vmatprep.subr.bf16.mxu1 %v2150_v10 }
 0x5f8   :  { %v1055_v6 = vpop.permute.xlu1 %1054 }
 0x5f9   :  { %1531 = vmatmul.mubr.msk.f32.vlgmr.msra.gmra.mrb[4].mxu1 %vm59_vm0, %v1055_v6  ;;  %1535 = vmatmul.mubr.msk.f32.vlgmr.msra.gmra.mrb[6].mxu0 %vm59_vm0, %v1055_v6 }
 0x5fa   :  { %1754 = vmatpush1.bf16.msra.mxu0 %v2049_v32  ;;  %1293 = vmatprep.mubr.f32.mxu0 %v1913_v3  ;;  %v1534_v32 = vld [vmem:[%s2474_s0 + $0x6] sm:$0x3] }
 0x5fb   :  { %1756 = vmatprep.subr.bf16.mxu0 %v2052_v33  ;;  %1770 = vmatpush1.bf16.msra.mxu1 %v2161_v16 }
 0x5fc   :  { %1772 = vmatprep.subr.bf16.mxu1 %v2163_v17  ;;  %1393 = vmatprep.mubr.f32.mxu1 %v1913_v3 }
 0x5fe   :  { %1758 = vmatpush1.bf16.msra.mxu0 %v2068_v38 }
 0x5ff   :  { %1760 = vmatprep.subr.bf16.mxu0 %v2072_v39  ;;  %1774 = vmatpush1.bf16.msra.mxu1 %v2179_v24 }
 0x600   :  { %1776 = vmatprep.subr.bf16.mxu1 %v2182_v25 }
 0x602   :  { %1762 = vmatpush1.bf16.msra.mxu0 %v2087_v44 }
 0x603   :  { %1764 = vmatprep.subr.bf16.mxu0 %v2090_v45  ;;  %1778 = vmatpush1.bf16.msra.mxu1 %v2197_v34 }
 0x604   :  { %1780 = vmatprep.subr.bf16.mxu1 %v2200_v35 }
 0x606   :  { %1766 = vmatpush1.bf16.msra.mxu0 %v2099_v48 }
 0x607   :  { %1782 = vmatpush1.bf16.msra.mxu1 %v2215_v42 }
 0x608   :  { %1784 = vmatprep.subr.bf16.mxu1 %v2218_v43 }
 0x609   :  { %1536 = vmatmul.mubr.msk.f32.vlgmr.msra.gmra.mrb[6].mxu0 %vm59_vm0, %v1534_v32 }
 0x6cc   :  { %v1124_v33 = vpop.f32.mrb[4].mxu1 }
 0x6cd   :  { %v1129_v38 = vadd.f32 %v1124_v33, %v2332_v46  ;;  %v1126_v39 = vpop.f32.mrb[5].mxu1 }
 0x6ce   :  { %v1130_v45 = vadd.f32 %v1126_v39, %v2337_v57 }
 0x6cf   :  { %v1532_v44 = vmul.f32 -1.442695, %v1129_v38 }
 0x6d1   :  { %1877 = vpow2.f32 %v1532_v44 }
 0x6d2   :  { %1879 = vtanh.f32 %v1130_v45 }
 0x6db   :  { %v1878_v10 = vpop.eup %1877 }
 0x6dc   :  { %v1134_v48 = vadd.f32 1.0, %v1878_v10  ;;  %v1295_v16 = vpop.f32.mrb[6].mxu0  ;;  %v1880_v34 = vpop.eup %1879 }
 0x6dd   :  { %v1300_v17 = vadd.f32 %v1295_v16, %v2125_v54  ;;  %v1297_v24 = vpop.f32.mrb[7].mxu0  ;;  %v1533_v54 = vmul.f32 -1.442695, %v1130_v45 }
 0x6de   :  { %1881 = vrcp.f32 %v1134_v48  ;;  %v1301_v42 = vadd.f32 %v1297_v24, %v2131_v60 }
 0x6df   :  { %v1537_v25 = vmul.f32 -1.442695, %v1300_v17 }
 0x6e0   :  { %v1538_v21 = vmul.f32 -1.442695, %v1301_v42 }
 0x6e1   :  { %1883 = vpow2.f32 %v1537_v25 }
 0x6e2   :  { %1885 = vtanh.f32 %v1301_v42 }
 0x6e8   :  { %v1882_v35 = vpop.eup %1881 }
 0x6e9   :  { %v1145_v43 = vmul.f32 %v1882_v35, %v1880_v34  ;;  %v1144_v27 = vmul.f32 %v1882_v35, %v2403_v5 }
 0x6eb   :  { %v1884_v9 = vpop.eup %1883  ;;  %1147 = vrot.lane.b32.xlu0 %v1145_v43, %s1914_s3 }
 0x6ec   :  { %v1305_v59 = vadd.f32 1.0, %v1884_v9  ;;  %v1886_v14 = vpop.eup %1885 }
 0x6ee   :  { %1887 = vrcp.f32 %v1305_v59 }
 0x6ef   :  { %1889 = vpow2.f32 %v1533_v54 }
 0x6f0   :  { %1891 = vpow2.f32 %v1538_v21 }
 0x6f8   :  { %v1888_v28 = vpop.eup %1887 }
 0x6f9   :  { %v1316_v15 = vmul.f32 %v1888_v28, %v1886_v14  ;;  %v1890_v20 = vpop.eup %1889  ;;  %v1315_v61 = vmul.f32 %v1888_v28, %v2408_v4 }
 0x6fa   :  { %v1141_v26 = vadd.f32 1.0, %v1890_v20  ;;  %v1892_v30 = vpop.eup %1891 }
 0x6fb   :  { %1318 = vrot.lane.b32.xlu1 %v1316_v15, %s1914_s3  ;;  %v1312_v40 = vadd.f32 1.0, %v1892_v30 }
 0x6fc   :  { %1893 = vrcp.f32 %v1141_v26 }
 0x706   :  { %v1894_v36 = vpop.eup %1893 }
 0x75d   :  { %v1148_v60 = vpop.permute.xlu0 %1147 }
 0x75e   :  { %v1150_v29 = vadd.f32 %v1148_v60, %v1144_v27 }
 0x760   :  { %1895 = vtanh.f32 %v1150_v29 }
 0x761   :  { %1897 = vrcp.f32 %v1312_v40 }
 0x76a   :  { %v1896_v37 = vpop.eup %1895 }
 0x76b   :  { %v1152_v41 = vmul.f32 %v1896_v37, %v1894_v36  ;;  %v1898_v50 = vpop.eup %1897 }
 0x76d   :  { %v1319_v1 = vpop.permute.xlu1 %1318  ;;  %1325 = vrot.lane.b32.xlu0 %v1152_v41, %s1914_s3 }
 0x76e   :  { %v1321_v49 = vadd.f32 %v1319_v1, %v1315_v61 }
 0x770   :  { %1899 = vtanh.f32 %v1321_v49 }
 0x77a   :  { %v1900_v56 = vpop.eup %1899 }
 0x77b   :  { %v1323_v62 = vmul.f32 %v1900_v56, %v1898_v50 }
 0x77d   :  { %1401 = vrot.lane.b32.xlu1 %v1323_v62, %s1914_s3 }
 0x7df   :  { %v1326_v2 = vpop.permute.xlu0 %1325 }
 0x7e0   :  { %1539 = vmatmul.mubr.msk.f32.vlgmr.msra.gmra.mrb[6].mxu1 %vm59_vm0, %v1326_v2 }
 0x7e1   :  { %1786 = vmatpush1.bf16.msra.mxu1 %v2233_v53  ;;  %1469 = vmatprep.mubr.f32.mxu1 %v1913_v3 }
 0x7e2   :  { %1788 = vmatprep.subr.bf16.mxu1 %v2236_v55 }
 0x7e5   :  { %1790 = vmatpush1.bf16.msra.mxu1 %v2252_v63 }
 0x7e6   :  { %1792 = vmatprep.subr.bf16.mxu1 %v2256_v0 }
 0x7e9   :  { %1794 = vmatpush1.bf16.msra.mxu1 %v2271_v11 }
 0x7ea   :  { %1796 = vmatprep.subr.bf16.mxu1 %v2274_v12 }
 0x7ed   :  { %1798 = vmatpush1.bf16.msra.mxu1 %v2283_v19 }
 0x7ef   :  { %v1402_v5 = vpop.permute.xlu1 %1401 }
 0x7f0   :  { %1540 = vmatmul.mubr.msk.f32.vlgmr.msra.gmra.mrb[6].mxu1 %vm59_vm0, %v1402_v5 }
 0x8c3   :  { %v1471_v58 = vpop.f32.mrb[6].mxu1 }
 0x8c4   :  { %v1476_v53 = vadd.f32 %v1471_v58, %v2332_v46  ;;  %v1473_v52 = vpop.f32.mrb[7].mxu1 }
 0x8c5   :  { %v1477_v55 = vadd.f32 %v1473_v52, %v2337_v57 }
 0x8c6   :  { %v1541_v3 = vmul.f32 -1.442695, %v1476_v53 }
 0x8c7   :  { %v1542_v19 = vmul.f32 -1.442695, %v1477_v55 }
 0x8c8   :  { %1901 = vpow2.f32 %v1541_v3 }
 0x8c9   :  { %1903 = vtanh.f32 %v1477_v55 }
 0x8d2   :  { %v1902_v63 = vpop.eup %1901 }
 0x8d3   :  { %v1481_v7 = vadd.f32 1.0, %v1902_v63  ;;  %v1904_v0 = vpop.eup %1903 }
 0x8d5   :  { %1905 = vrcp.f32 %v1481_v7 }
 0x8d6   :  { %1907 = vpow2.f32 %v1542_v19 }
 0x8df   :  { %v1906_v11 = vpop.eup %1905 }
 0x8e0   :  { %v1492_v12 = vmul.f32 %v1906_v11, %v1904_v0  ;;  %v1908_v13 = vpop.eup %1907  ;;  %v1491_v31 = vmul.f32 %v1906_v11, %v1150_v29 }
 0x8e1   :  { %v1488_v18 = vadd.f32 1.0, %v1908_v13 }
 0x8e2   :  { %1494 = vrot.lane.b32.xlu0 %v1492_v12, %s1914_s3 }
 0x8e3   :  { %1909 = vrcp.f32 %v1488_v18 }
 0x8ed   :  { %v1910_v4 = vpop.eup %1909 }
 0x954   :  { %v1495_v46 = vpop.permute.xlu0 %1494 }
 0x955   :  { %v1497_v22 = vadd.f32 %v1495_v46, %v1491_v31 }
 0x957   :  { %1911 = vtanh.f32 %v1497_v22 }
 0x961   :  { %v1912_v57 = vpop.eup %1911 }
 0x962   :  { %v1499_v47 = vmul.f32 %v1912_v57, %v1910_v4 }
 0x964   :  { %1501 = vrot.lane.b32.xlu1 %v1499_v47, %s1914_s3 }
 0x9d6   :  { %v1502_v23 = vpop.permute.xlu1 %1501 }
 0x9d7   :  { %1505 = vst.msk [vmem:[%s2479_s7] sm:$0x3] %vm1504_vm1, %v1502_v23 }

// kernel: cblane_forward.25
= control target key start
LH: loop header
LB: loop body
LE: loop exit
PB: predicated region body
PF: predicated region fallthrough
CT: control target
= control target key end

     0   :  { %s2253_s18 = smov 0   ;;  %s2255_s19 = smov 0   ;;  %s2575_s0 = inlined_call_operand.vmem [shape: bf16[8,64], index: 0, kind: input, shape index: {}]   ;;  %s2576_s1 = inlined_call_operand.vmem [shape: bf16[64,2048], index: 1, kind: input, shape index: {}]   ;;  %s2577_s2 = inlined_call_operand.vmem [shape: f32[1,2048], index: 2, kind: input, shape index: {}]   ;;  %s2578_s3 = inlined_call_operand.vmem [shape: bf16[4,2048,512], index: 3, kind: input, shape index: {}]   ;;  %s2579_s4 = inlined_call_operand.vmem [shape: f32[1,2048], index: 4, kind: input, shape index: {}]   ;;  %s2580_s5 = inlined_call_operand.vmem [shape: f32[8,2048], index: 5, kind: output, shape index: {}]  }
   0x1   :  { %s2257_s20 = smov 0   ;;  %s2259_s21 = smov 0  }
   0x2   :  { %s2261_s22 = smov 0   ;;  %s2263_s23 = smov 0  }
   0x3   :  { %s2265_s24 = smov 0  }
   0x4 LB: > { %s24_s25 = sadd.s32 1, %s2211_s22  ;;  %s27_s26 = sadd.s32 1, %s2215_s23  ;;  %s2219_s24 = sphi %s2265_s24, %s15_s24   ;;  %s2215_s23 = sphi %s2263_s23, %s2587_s23   ;;  %s2211_s22 = sphi %s2261_s22, %s2586_s22   ;;  %s2207_s21 = sphi %s2259_s21, %s2585_s21   ;;  %s2203_s20 = sphi %s2257_s20, %s2584_s20   ;;  %s2199_s19 = sphi %s2255_s19, %s2583_s19   ;;  %s2195_s18 = sphi %s2253_s18, %s2582_s18  }
   0x5   : > { %p25_p0 = scmp.ge.s32.totalorder %s24_s25, 4  ;;  %s55_s27 = sadd.s32 1, %s2199_s19 }
   0x6   : > { %p62_p1 = scmp.ne.s32.totalorder %s2199_s19, %s2195_s18  ;;  %p63_p2 = scmp.eq.s32.totalorder %s2219_s24, 0 }
   0x7   : > { %s2589_s25 = smov (%p25_p0, %s24_s25), 0  ;;  %s2591_s26 = smov (!%p25_p0, %s27_s26), %s2215_s23 }
   0x8   : > { %s52_s28 = ssub.s32 %s2211_s22, %s2589_s25  ;;  %p64_p3 = por %p63_p2, %p62_p1 }
   0x9   : > { %p29_p4 = scmp.ge.s32.totalorder %s2591_s26, 4  ;;  %p53_p5 = scmp.eq.s32.totalorder %s52_s28, 0 }
   0xa   : > { %p1706_p6 = scmp.ge.s32.totalorder %s2219_s24, 16 }
   0xb   : > { %s2593_s26 = smov (%p29_p4, %s2591_s26), 0 }
   0xc   : > { %s2302_s29 = scalar_select %p53_p5, %s2199_s19, %s55_s27  }
   0xd   : > { %197 = sbr.rel (%p1706_p6) target bundleno = 32 (0x20), region = 20 }
  0x14   : > { %200 = sbr.rel (!%p64_p3) target bundleno = 32 (0x20), region = 24  ;;  %s202_s30 = sand.u32 (%p64_p3), 1, %s2199_s19  }
  0x15   : > { %s1874_s6 = sshll.u32 (%p64_p3), %s2211_s22, 4  ;;  %s1707_s7 = sshll.u32 (%p64_p3), %s202_s30, 7 }
  0x16   : > { %s2310_s10 = scalar_lea.vmem (%p64_p3), %s2576_s1, %s1874_s6  ;;  %s204_s11 = scalar_lea.vmem (%p64_p3), [#allocation3], %s1707_s7 }
  0x17   : > { %v220_v0 = vld [vmem:[%s2310_s10] sm:$0xff] (%p64_p3)  ;;  %v222_v1 = vld [vmem:[%s2310_s10 + $0x8] sm:$0xff] (%p64_p3) }
  0x18   : > { %v224_v2 = vld [vmem:[%s2310_s10 + $0x40] sm:$0xff] (%p64_p3)  ;;  %221 = vst [vmem:[%s204_s11] sm:$0xff] (%p64_p3), %v220_v0  ;;  %223 = vst [vmem:[%s204_s11 + $0x8] sm:$0xff] (%p64_p3), %v222_v1  ;;  %v226_v3 = vld [vmem:[%s2310_s10 + $0x48] sm:$0xff] (%p64_p3) }
  0x19   : > { %225 = vst [vmem:[%s204_s11 + $0x10] sm:$0xff] (%p64_p3), %v224_v2  ;;  %v228_v4 = vld [vmem:[%s2310_s10 + $0x80] sm:$0xff] (%p64_p3)  ;;  %v230_v5 = vld [vmem:[%s2310_s10 + $0x88] sm:$0xff] (%p64_p3)  ;;  %227 = vst [vmem:[%s204_s11 + $0x18] sm:$0xff] (%p64_p3), %v226_v3 }
  0x1a   : > { %229 = vst [vmem:[%s204_s11 + $0x20] sm:$0xff] (%p64_p3), %v228_v4  ;;  %231 = vst [vmem:[%s204_s11 + $0x28] sm:$0xff] (%p64_p3), %v230_v5  ;;  %v232_v6 = vld [vmem:[%s2310_s10 + $0xc0] sm:$0xff] (%p64_p3)  ;;  %v234_v7 = vld [vmem:[%s2310_s10 + $0xc8] sm:$0xff] (%p64_p3) }
  0x1b   : > { %v236_v8 = vld [vmem:[%s2310_s10 + $0x100] sm:$0xff]  ;;  %233 = vst [vmem:[%s204_s11 + $0x30] sm:$0xff] %v232_v6  ;;  %235 = vst [vmem:[%s204_s11 + $0x38] sm:$0xff] %v234_v7  ;;  %v238_v9 = vld [vmem:[%s2310_s10 + $0x108] sm:$0xff] }
  0x1c   : > { %237 = vst [vmem:[%s204_s11 + $0x40] sm:$0xff] %v236_v8  ;;  %v240_v10 = vld [vmem:[%s2310_s10 + $0x140] sm:$0xff]  ;;  %v242_v11 = vld [vmem:[%s2310_s10 + $0x148] sm:$0xff]  ;;  %239 = vst [vmem:[%s204_s11 + $0x48] sm:$0xff] %v238_v9 }
  0x1d   : > { %241 = vst [vmem:[%s204_s11 + $0x50] sm:$0xff] %v240_v10  ;;  %243 = vst [vmem:[%s204_s11 + $0x58] sm:$0xff] %v242_v11  ;;  %v244_v12 = vld [vmem:[%s2310_s10 + $0x180] sm:$0xff]  ;;  %v246_v13 = vld [vmem:[%s2310_s10 + $0x188] sm:$0xff] }
  0x1e   : > { %v248_v14 = vld [vmem:[%s2310_s10 + $0x1c0] sm:$0xff]  ;;  %245 = vst [vmem:[%s204_s11 + $0x60] sm:$0xff] %v244_v12  ;;  %247 = vst [vmem:[%s204_s11 + $0x68] sm:$0xff] %v246_v13  ;;  %v250_v15 = vld [vmem:[%s2310_s10 + $0x1c8] sm:$0xff] }
  0x1f   : > { %249 = vst [vmem:[%s204_s11 + $0x70] sm:$0xff] %v248_v14  ;;  %251 = vst [vmem:[%s204_s11 + $0x78] sm:$0xff] %v250_v15 }
  0x20 PF: > { %p1710_p7 = scmp.ge.s32.totalorder %s2219_s24, 1  ;;  %p286_p8 = scmp.lt.s32.totalorder %s2219_s24, 17 }
  0x22   : > { %p287_p9 = pnand %p1710_p7, %p286_p8 }
  0x23   : > { %s293_s12 = sand.u32 (!%p287_p9), 1, %s2195_s18   ;;  %s1712_s13 = sshll.u32 (!%p287_p9), %s2203_s20, 2 }
  0x24   : > { %290 = sbr.rel (%p287_p9) target bundleno = 610 (0x262), region = 59  ;;  %s1711_s14 = sshll.u32 (!%p287_p9), %s293_s12, 7 }
  0x25   : > { %p340_p10 = scmp.lt.s32.totalorder (!%p287_p9), %s1712_s13, 15  ;;  %s1713_s15 = sshll.u32 (!%p287_p9), %s2203_s20, 6 }
  0x26   : > { %p345_p11 = scmp.lt.s32.totalorder (!%p287_p9), %s2207_s21, 3  ;;  %p347_p12 = scmp.lt.s32.totalorder (!%p287_p9), %s1713_s15, 255 }
  0x27   : > { %s1717_s28 = sshll.u32 (!%p287_p9), %s2207_s21, 2  ;;  %p1720_p0 = scmp.ne.s32.totalorder (!%p287_p9), %s2203_s20, 0 }
  0x28   : > { %p356_p13 = scmp.lt.s32.totalorder (!%p287_p9), %s1717_s28, 15 }
  0x2b   : > { %s2595_s13 = smov (!%p340_p10, %s1712_s13), 15  ;;  %s2597_s21 = smov (!%p345_p11, %s2207_s21), 3 }
  0x2c   : > { %s2599_s15 = smov (!%p347_p12, %s1713_s15), 255  ;;  %s1715_s30 = sshll.u32 %s2597_s21, 10  ;;  %v2221_v16 = vmov (!%p1720_p0), 0.0  }
  0x2d   : > { %s1714_s6 = sshll.u32 %s2599_s15, 2  ;;  %s2601_s28 = smov (!%p356_p13, %s1717_s28), 15  ;;  %371 = vst [vmem:[#allocation2] sm:$0xff] (!%p1720_p0), %v2221_v16  ;;  %372 = vst [vmem:[#allocation2 + $0x8] sm:$0xff] (!%p1720_p0), %v2221_v16 }
  0x2e   : > { %s351_s18 = sadd.s32 %s1715_s30, %s1714_s6  ;;  %s358_s16 = scalar_lea.vmem %s2579_s4, %s2601_s28  ;;  %373 = vst [vmem:[#allocation2 + $0x10] sm:$0xff] (!%p1720_p0), %v2221_v16  ;;  %374 = vst [vmem:[#allocation2 + $0x18] sm:$0xff] (!%p1720_p0), %v2221_v16 }
  0x2f   : > { %s1716_s7 = sshll.u32 %s351_s18, 2  ;;  %s1719_s17 = sshll.u32 %s2601_s28, 3 }
  0x30   : > { %s2345_s10 = scalar_lea.vmem %s2578_s3, %s1716_s7  ;;  %s2357_s15 = scalar_lea.vmem %s2580_s5, %s1719_s17 }
  0x31   : > { %s2359_s30 = scalar_lea.vmem [#allocation3], %s1711_s14  ;;  %370 = sbr.rel (%p1720_p0) target bundleno = 56 (0x38), region = 67 }
  0x38 PF: > { %v1933_v17 = vld [vmem:[%s2359_s30 + $0x4] ss:$16 sps:$4 sm:$0xff]   ;;  %v1935_v18 = vld [vmem:[%s2359_s30 + $0xc] ss:$16 sps:$4 sm:$0xff]   ;;  %v2222_v19 = vmov 0   ;;  %vm494_vm0 = vcmask 523264   ;;  %s2581_s7 = scalar_lea.vmem %s2577_s2, %s2595_s13 }
  0x39   : > { %530 = vmatprep.mubr.bf16.mxu0 %v2222_v19  ;;  %571 = vmatprep.mubr.bf16.mxu1 %v2222_v19  ;;  %v1937_v20 = vld [vmem:[%s2359_s30] ss:$16 sps:$4 sm:$0xff]   ;;  %v1938_v21 = vld [vmem:[%s2359_s30 + $0x8] ss:$16 sps:$4 sm:$0xff]   ;;  %v1939_v22 = vld [vmem:[%s2359_s30 + $0x24] ss:$16 sps:$4 sm:$0xff]  }
  0x3a   : > { %498 = vmatprep.subr.bf16.mxu0 %v1933_v17  ;;  %539 = vmatprep.subr.bf16.mxu1 %v1935_v18  ;;  %v1941_v23 = vld [vmem:[%s2359_s30 + $0x2c] ss:$16 sps:$4 sm:$0xff]   ;;  %v1943_v24 = vld [vmem:[%s2359_s30 + $0x20] ss:$16 sps:$4 sm:$0xff]   ;;  %v1944_v25 = vld [vmem:[%s2359_s30 + $0x28] ss:$16 sps:$4 sm:$0xff]  }
  0x3b   : > { %499 = vmatpush1.bf16.msra.mxu0 %v1937_v20  ;;  %540 = vmatpush1.bf16.msra.mxu1 %v1938_v21  ;;  %v1945_v26 = vld [vmem:[%s2359_s30 + $0x44] ss:$16 sps:$4 sm:$0xff]   ;;  %v1947_v27 = vld [vmem:[%s2359_s30 + $0x4c] ss:$16 sps:$4 sm:$0xff]   ;;  %v1949_v28 = vld [vmem:[%s2359_s30 + $0x40] ss:$16 sps:$4 sm:$0xff]  }
  0x3c   : > { %500 = vmatprep.subr.bf16.mxu0 %v1939_v22  ;;  %541 = vmatprep.subr.bf16.mxu1 %v1941_v23  ;;  %v1950_v29 = vld [vmem:[%s2359_s30 + $0x48] ss:$16 sps:$4 sm:$0xff]   ;;  %v1951_v30 = vld [vmem:[%s2359_s30 + $0x64] ss:$16 sps:$4 sm:$0xff]   ;;  %v1953_v31 = vld [vmem:[%s2359_s30 + $0x6c] ss:$16 sps:$4 sm:$0xff]  }
  0x3d   : > { %v1955_v32 = vld [vmem:[%s2359_s30 + $0x60] ss:$16 sps:$4 sm:$0xff]   ;;  %v1956_v33 = vld [vmem:[%s2359_s30 + $0x68] ss:$16 sps:$4 sm:$0xff]   ;;  %v1959_v34 = vld [vmem:[%s2345_s10 + $0x4] ss:$16 sps:$4 sm:$0xff]  }
  0x3e   : > { %v1962_v35 = vld [vmem:[%s2345_s10 + $0x204] ss:$16 sps:$4 sm:$0xff]   ;;  %v375_v36 = vld [vmem:[%s2575_s0] sm:$0xf]  ;;  %p1867_p1 = scmp.ne.s32.totalorder %s2203_s20, 3 }
  0x3f   : > { %501 = vmatpush1.bf16.msra.mxu0 %v1943_v24  ;;  %542 = vmatpush1.bf16.msra.mxu1 %v1944_v25  ;;  %v1957_v37 = vld [vmem:[%s2345_s10] ss:$16 sps:$4 sm:$0xff]   ;;  %v1965_v39 = vld [vmem:[%s2345_s10 + $0x24] ss:$16 sps:$4 sm:$0xff]  }
  0x40   : > { %502 = vmatprep.subr.bf16.mxu0 %v1945_v26  ;;  %543 = vmatprep.subr.bf16.mxu1 %v1947_v27  ;;  %v1960_v38 = vld [vmem:[%s2345_s10 + $0x200] ss:$16 sps:$4 sm:$0xff]   ;;  %v1968_v40 = vld [vmem:[%s2345_s10 + $0x224] ss:$16 sps:$4 sm:$0xff]  }
  0x41   : > { %v1963_v41 = vld [vmem:[%s2345_s10 + $0x20] ss:$16 sps:$4 sm:$0xff]   ;;  %v1971_v43 = vld [vmem:[%s2345_s10 + $0x44] ss:$16 sps:$4 sm:$0xff]  }
  0x42   : > { %v1966_v42 = vld [vmem:[%s2345_s10 + $0x220] ss:$16 sps:$4 sm:$0xff]   ;;  %v1974_v44 = vld [vmem:[%s2345_s10 + $0x244] ss:$16 sps:$4 sm:$0xff]  }
  0x43   : > { %503 = vmatpush1.bf16.msra.mxu0 %v1949_v28  ;;  %544 = vmatpush1.bf16.msra.mxu1 %v1950_v29  ;;  %v1969_v45 = vld [vmem:[%s2345_s10 + $0x40] ss:$16 sps:$4 sm:$0xff]   ;;  %v1977_v47 = vld [vmem:[%s2345_s10 + $0x64] ss:$16 sps:$4 sm:$0xff]  }
  0x44   : > { %504 = vmatprep.subr.bf16.mxu0 %v1951_v30  ;;  %545 = vmatprep.subr.bf16.mxu1 %v1953_v31  ;;  %v1972_v46 = vld [vmem:[%s2345_s10 + $0x240] ss:$16 sps:$4 sm:$0xff]   ;;  %v1980_v48 = vld [vmem:[%s2345_s10 + $0x264] ss:$16 sps:$4 sm:$0xff]  }
  0x45   : > { %v1975_v49 = vld [vmem:[%s2345_s10 + $0x60] ss:$16 sps:$4 sm:$0xff]   ;;  %v1983_v51 = vld [vmem:[%s2345_s10 + $0x84] ss:$16 sps:$4 sm:$0xff]  }
  0x46   : > { %v1978_v50 = vld [vmem:[%s2345_s10 + $0x260] ss:$16 sps:$4 sm:$0xff]   ;;  %v1986_v52 = vld [vmem:[%s2345_s10 + $0x284] ss:$16 sps:$4 sm:$0xff]  }
  0x47   : > { %505 = vmatpush1.bf16.msra.mxu0 %v1955_v32  ;;  %546 = vmatpush1.bf16.msra.mxu1 %v1956_v33  ;;  %v1981_v53 = vld [vmem:[%s2345_s10 + $0x80] ss:$16 sps:$4 sm:$0xff]   ;;  %v1989_v55 = vld [vmem:[%s2345_s10 + $0xa4] ss:$16 sps:$4 sm:$0xff]  }
  0x48   : > { %1356 = vmatprep.subr.bf16.mxu0 %v1959_v34  ;;  %1397 = vmatprep.subr.bf16.mxu1 %v1962_v35  ;;  %v1984_v54 = vld [vmem:[%s2345_s10 + $0x280] ss:$16 sps:$4 sm:$0xff]   ;;  %v1992_v56 = vld [vmem:[%s2345_s10 + $0x2a4] ss:$16 sps:$4 sm:$0xff]   ;;  %v2055_v35 = vld [vmem:[%s2345_s10 + $0xc] ss:$16 sps:$4 sm:$0xff]  }
  0x49   : > { %v1987_v57 = vld [vmem:[%s2345_s10 + $0xa0] ss:$16 sps:$4 sm:$0xff]   ;;  %v1995_v59 = vld [vmem:[%s2345_s10 + $0xc4] ss:$16 sps:$4 sm:$0xff]  }
  0x4a   : > { %1737 = vmatmul.mubr.msk.bf16.vlgmr.msra.gmra.mrb[0].mxu0 %vm494_vm0, %v375_v36  ;;  %1738 = vmatmul.mubr.msk.bf16.vlgmr.msra.gmra.mrb[0].mxu1 %vm494_vm0, %v375_v36  ;;  %v1990_v58 = vld [vmem:[%s2345_s10 + $0x2a0] ss:$16 sps:$4 sm:$0xff]   ;;  %v1998_v60 = vld [vmem:[%s2345_s10 + $0x2c4] ss:$16 sps:$4 sm:$0xff]   ;;  %v2058_v36 = vld [vmem:[%s2345_s10 + $0x20c] ss:$16 sps:$4 sm:$0xff]  }
  0x4b   : > { %1357 = vmatpush1.bf16.msra.mxu0 %v1957_v37  ;;  %1398 = vmatpush1.bf16.msra.mxu1 %v1960_v38  ;;  %v1993_v61 = vld [vmem:[%s2345_s10 + $0xc0] ss:$16 sps:$4 sm:$0xff]   ;;  %v2001_v63 = vld [vmem:[%s2345_s10 + $0xe4] ss:$16 sps:$4 sm:$0xff]   ;;  %v394_v37 = vlaneseq }
  0x4c   : > { %1358 = vmatprep.subr.bf16.mxu0 %v1965_v39  ;;  %1399 = vmatprep.subr.bf16.mxu1 %v1968_v40  ;;  %v1996_v62 = vld [vmem:[%s2345_s10 + $0x2c0] ss:$16 sps:$4 sm:$0xff]   ;;  %v2004_v0 = vld [vmem:[%s2345_s10 + $0x2e4] ss:$16 sps:$4 sm:$0xff]  }
  0x4d   : > { %v1999_v1 = vld [vmem:[%s2345_s10 + $0xe0] ss:$16 sps:$4 sm:$0xff]   ;;  %v2007_v3 = vld [vmem:[%s2345_s10 + $0x104] ss:$16 sps:$4 sm:$0xff]   ;;  %v2447_v38 = vshrl.u32 %v394_v37, 7 }
  0x4e   : > { %v2002_v2 = vld [vmem:[%s2345_s10 + $0x2e0] ss:$16 sps:$4 sm:$0xff]   ;;  %v2010_v4 = vld [vmem:[%s2345_s10 + $0x304] ss:$16 sps:$4 sm:$0xff]   ;;  %v2110_v37 = vld [vmem:[%s2345_s10 + $0x328] ss:$16 sps:$4 sm:$0xff]  }
  0x4f   : > { %1359 = vmatpush1.bf16.msra.mxu0 %v1963_v41  ;;  %1400 = vmatpush1.bf16.msra.mxu1 %v1966_v42  ;;  %v2005_v5 = vld [vmem:[%s2345_s10 + $0x100] ss:$16 sps:$4 sm:$0xff]   ;;  %v2013_v7 = vld [vmem:[%s2345_s10 + $0x124] ss:$16 sps:$4 sm:$0xff]   ;;  %v396_v39 = vsub.s32 0, %v2447_v38  ;;  %v404_v40 = vsub.s32 2, %v2447_v38 }
  0x50   : > { %1360 = vmatprep.subr.bf16.mxu0 %v1971_v43  ;;  %1401 = vmatprep.subr.bf16.mxu1 %v1974_v44  ;;  %v2008_v6 = vld [vmem:[%s2345_s10 + $0x300] ss:$16 sps:$4 sm:$0xff]   ;;  %v2016_v8 = vld [vmem:[%s2345_s10 + $0x324] ss:$16 sps:$4 sm:$0xff]   ;;  %v400_v42 = vsub.s32 1, %v2447_v38  ;;  %v408_v43 = vsub.s32 3, %v2447_v38 }
  0x51   : > { %v2011_v9 = vld [vmem:[%s2345_s10 + $0x120] ss:$16 sps:$4 sm:$0xff]   ;;  %v2019_v11 = vld [vmem:[%s2345_s10 + $0x144] ss:$16 sps:$4 sm:$0xff]  }
  0x52   : > { %v2014_v10 = vld [vmem:[%s2345_s10 + $0x320] ss:$16 sps:$4 sm:$0xff]   ;;  %v2022_v12 = vld [vmem:[%s2345_s10 + $0x344] ss:$16 sps:$4 sm:$0xff]  }
  0x53   : > { %1361 = vmatpush1.bf16.msra.mxu0 %v1969_v45  ;;  %1402 = vmatpush1.bf16.msra.mxu1 %v1972_v46  ;;  %v2017_v13 = vld [vmem:[%s2345_s10 + $0x140] ss:$16 sps:$4 sm:$0xff]   ;;  %v2025_v15 = vld [vmem:[%s2345_s10 + $0x164] ss:$16 sps:$4 sm:$0xff]  }
  0x54   : > { %1362 = vmatprep.subr.bf16.mxu0 %v1977_v47  ;;  %1403 = vmatprep.subr.bf16.mxu1 %v1980_v48  ;;  %v2020_v14 = vld [vmem:[%s2345_s10 + $0x340] ss:$16 sps:$4 sm:$0xff]   ;;  %v2028_v16 = vld [vmem:[%s2345_s10 + $0x364] ss:$16 sps:$4 sm:$0xff]  }
  0x55   : > { %v2023_v17 = vld [vmem:[%s2345_s10 + $0x160] ss:$16 sps:$4 sm:$0xff]   ;;  %v2031_v19 = vld [vmem:[%s2345_s10 + $0x184] ss:$16 sps:$4 sm:$0xff]  }
  0x56   : > { %v2026_v18 = vld [vmem:[%s2345_s10 + $0x360] ss:$16 sps:$4 sm:$0xff]   ;;  %v2034_v20 = vld [vmem:[%s2345_s10 + $0x384] ss:$16 sps:$4 sm:$0xff]  }
  0x57   : > { %1363 = vmatpush1.bf16.msra.mxu0 %v1975_v49  ;;  %1404 = vmatpush1.bf16.msra.mxu1 %v1978_v50  ;;  %v2029_v21 = vld [vmem:[%s2345_s10 + $0x180] ss:$16 sps:$4 sm:$0xff]   ;;  %v2037_v23 = vld [vmem:[%s2345_s10 + $0x1a4] ss:$16 sps:$4 sm:$0xff]  }
  0x58   : > { %1364 = vmatprep.subr.bf16.mxu0 %v1983_v51  ;;  %1405 = vmatprep.subr.bf16.mxu1 %v1986_v52  ;;  %v2032_v22 = vld [vmem:[%s2345_s10 + $0x380] ss:$16 sps:$4 sm:$0xff]   ;;  %v2040_v24 = vld [vmem:[%s2345_s10 + $0x3a4] ss:$16 sps:$4 sm:$0xff]  }
  0x59   : > { %v2035_v25 = vld [vmem:[%s2345_s10 + $0x1a0] ss:$16 sps:$4 sm:$0xff]   ;;  %v2043_v27 = vld [vmem:[%s2345_s10 + $0x1c4] ss:$16 sps:$4 sm:$0xff]  }
  0x5a   : > { %v2038_v26 = vld [vmem:[%s2345_s10 + $0x3a0] ss:$16 sps:$4 sm:$0xff]   ;;  %v2046_v28 = vld [vmem:[%s2345_s10 + $0x3c4] ss:$16 sps:$4 sm:$0xff]  }
  0x5b   : > { %1365 = vmatpush1.bf16.msra.mxu0 %v1981_v53  ;;  %1406 = vmatpush1.bf16.msra.mxu1 %v1984_v54  ;;  %v2041_v29 = vld [vmem:[%s2345_s10 + $0x1c0] ss:$16 sps:$4 sm:$0xff]   ;;  %v2049_v31 = vld [vmem:[%s2345_s10 + $0x1e4] ss:$16 sps:$4 sm:$0xff]  }
  0x5c   : > { %1366 = vmatprep.subr.bf16.mxu0 %v1989_v55  ;;  %1407 = vmatprep.subr.bf16.mxu1 %v1992_v56  ;;  %v2044_v30 = vld [vmem:[%s2345_s10 + $0x3c0] ss:$16 sps:$4 sm:$0xff]   ;;  %v2052_v32 = vld [vmem:[%s2345_s10 + $0x3e4] ss:$16 sps:$4 sm:$0xff]  }
  0x5d   : > { %v2047_v33 = vld [vmem:[%s2345_s10 + $0x1e0] ss:$16 sps:$4 sm:$0xff]  }
  0x5e   : > { %v2050_v34 = vld [vmem:[%s2345_s10 + $0x3e0] ss:$16 sps:$4 sm:$0xff]  }
  0x5f   : > { %1367 = vmatpush1.bf16.msra.mxu0 %v1987_v57  ;;  %1408 = vmatpush1.bf16.msra.mxu1 %v1990_v58  ;;  %v392_v41 = vld [vmem:[%s2581_s7] sm:$0xf] }
  0x60   : > { %1368 = vmatprep.subr.bf16.mxu0 %v1995_v59  ;;  %1409 = vmatprep.subr.bf16.mxu1 %v1998_v60  ;;  %v397_v44 = vrot.slane %v392_v41, %v396_v39  ;;  %v405_v45 = vrot.slane %v392_v41, %v404_v40  ;;  %v401_v46 = vrot.slane %v392_v41, %v400_v42 }
  0x61   : > { %v409_v47 = vrot.slane %v392_v41, %v408_v43  ;;  %v2115_v41 = vld [vmem:[%s2345_s10 + $0x14c] ss:$16 sps:$4 sm:$0xff]  }
  0x63   : > { %1369 = vmatpush1.bf16.msra.mxu0 %v1993_v61  ;;  %1410 = vmatpush1.bf16.msra.mxu1 %v1996_v62  ;;  %v2053_v62 = vld [vmem:[%s2345_s10 + $0x8] ss:$16 sps:$4 sm:$0xff]  }
  0x64   : > { %1370 = vmatprep.subr.bf16.mxu0 %v2001_v63  ;;  %1411 = vmatprep.subr.bf16.mxu1 %v2004_v0  ;;  %v2056_v63 = vld [vmem:[%s2345_s10 + $0x208] ss:$16 sps:$4 sm:$0xff]  }
  0x67   : > { %1371 = vmatpush1.bf16.msra.mxu0 %v1999_v1  ;;  %1412 = vmatpush1.bf16.msra.mxu1 %v2002_v2  ;;  %v2061_v2 = vld [vmem:[%s2345_s10 + $0x2c] ss:$16 sps:$4 sm:$0xff]  }
  0x68   : > { %1372 = vmatprep.subr.bf16.mxu0 %v2007_v3  ;;  %1413 = vmatprep.subr.bf16.mxu1 %v2010_v4  ;;  %v2064_v3 = vld [vmem:[%s2345_s10 + $0x22c] ss:$16 sps:$4 sm:$0xff]   ;;  %v2059_v4 = vld [vmem:[%s2345_s10 + $0x28] ss:$16 sps:$4 sm:$0xff]  }
  0x6b   : > { %1373 = vmatpush1.bf16.msra.mxu0 %v2005_v5  ;;  %1414 = vmatpush1.bf16.msra.mxu1 %v2008_v6  ;;  %v2062_v5 = vld [vmem:[%s2345_s10 + $0x228] ss:$16 sps:$4 sm:$0xff]   ;;  %v2067_v6 = vld [vmem:[%s2345_s10 + $0x4c] ss:$16 sps:$4 sm:$0xff]  }
  0x6c   : > { %1374 = vmatprep.subr.bf16.mxu0 %v2013_v7  ;;  %1415 = vmatprep.subr.bf16.mxu1 %v2016_v8  ;;  %v2070_v7 = vld [vmem:[%s2345_s10 + $0x24c] ss:$16 sps:$4 sm:$0xff]   ;;  %v2065_v8 = vld [vmem:[%s2345_s10 + $0x48] ss:$16 sps:$4 sm:$0xff]  }
  0x6f   : > { %1375 = vmatpush1.bf16.msra.mxu0 %v2011_v9  ;;  %1416 = vmatpush1.bf16.msra.mxu1 %v2014_v10  ;;  %v2068_v9 = vld [vmem:[%s2345_s10 + $0x248] ss:$16 sps:$4 sm:$0xff]   ;;  %v2073_v10 = vld [vmem:[%s2345_s10 + $0x6c] ss:$16 sps:$4 sm:$0xff]  }
  0x70   : > { %1376 = vmatprep.subr.bf16.mxu0 %v2019_v11  ;;  %1417 = vmatprep.subr.bf16.mxu1 %v2022_v12  ;;  %v2076_v11 = vld [vmem:[%s2345_s10 + $0x26c] ss:$16 sps:$4 sm:$0xff]   ;;  %v2071_v12 = vld [vmem:[%s2345_s10 + $0x68] ss:$16 sps:$4 sm:$0xff]  }
  0x73   : > { %1377 = vmatpush1.bf16.msra.mxu0 %v2017_v13  ;;  %1418 = vmatpush1.bf16.msra.mxu1 %v2020_v14  ;;  %v2074_v13 = vld [vmem:[%s2345_s10 + $0x268] ss:$16 sps:$4 sm:$0xff]   ;;  %v2079_v14 = vld [vmem:[%s2345_s10 + $0x8c] ss:$16 sps:$4 sm:$0xff]  }
  0x74   : > { %1378 = vmatprep.subr.bf16.mxu0 %v2025_v15  ;;  %1419 = vmatprep.subr.bf16.mxu1 %v2028_v16  ;;  %v2082_v15 = vld [vmem:[%s2345_s10 + $0x28c] ss:$16 sps:$4 sm:$0xff]   ;;  %v2077_v16 = vld [vmem:[%s2345_s10 + $0x88] ss:$16 sps:$4 sm:$0xff]  }
  0x77   : > { %1379 = vmatpush1.bf16.msra.mxu0 %v2023_v17  ;;  %1420 = vmatpush1.bf16.msra.mxu1 %v2026_v18  ;;  %v2080_v17 = vld [vmem:[%s2345_s10 + $0x288] ss:$16 sps:$4 sm:$0xff]   ;;  %v2085_v18 = vld [vmem:[%s2345_s10 + $0xac] ss:$16 sps:$4 sm:$0xff]  }
  0x78   : > { %1380 = vmatprep.subr.bf16.mxu0 %v2031_v19  ;;  %1421 = vmatprep.subr.bf16.mxu1 %v2034_v20  ;;  %v2088_v19 = vld [vmem:[%s2345_s10 + $0x2ac] ss:$16 sps:$4 sm:$0xff]   ;;  %v2083_v20 = vld [vmem:[%s2345_s10 + $0xa8] ss:$16 sps:$4 sm:$0xff]  }
  0x7b   : > { %1381 = vmatpush1.bf16.msra.mxu0 %v2029_v21  ;;  %1422 = vmatpush1.bf16.msra.mxu1 %v2032_v22  ;;  %v2086_v21 = vld [vmem:[%s2345_s10 + $0x2a8] ss:$16 sps:$4 sm:$0xff]   ;;  %v2091_v22 = vld [vmem:[%s2345_s10 + $0xcc] ss:$16 sps:$4 sm:$0xff]  }
  0x7c   : > { %1382 = vmatprep.subr.bf16.mxu0 %v2037_v23  ;;  %1423 = vmatprep.subr.bf16.mxu1 %v2040_v24  ;;  %v2094_v23 = vld [vmem:[%s2345_s10 + $0x2cc] ss:$16 sps:$4 sm:$0xff]   ;;  %v2089_v24 = vld [vmem:[%s2345_s10 + $0xc8] ss:$16 sps:$4 sm:$0xff]  }
  0x7f   : > { %1383 = vmatpush1.bf16.msra.mxu0 %v2035_v25  ;;  %1424 = vmatpush1.bf16.msra.mxu1 %v2038_v26  ;;  %v2092_v25 = vld [vmem:[%s2345_s10 + $0x2c8] ss:$16 sps:$4 sm:$0xff]   ;;  %v2097_v26 = vld [vmem:[%s2345_s10 + $0xec] ss:$16 sps:$4 sm:$0xff]  }
  0x80   : > { %1384 = vmatprep.subr.bf16.mxu0 %v2043_v27  ;;  %1425 = vmatprep.subr.bf16.mxu1 %v2046_v28  ;;  %v2100_v27 = vld [vmem:[%s2345_s10 + $0x2ec] ss:$16 sps:$4 sm:$0xff]   ;;  %v2095_v28 = vld [vmem:[%s2345_s10 + $0xe8] ss:$16 sps:$4 sm:$0xff]  }
  0x83   : > { %1385 = vmatpush1.bf16.msra.mxu0 %v2041_v29  ;;  %1426 = vmatpush1.bf16.msra.mxu1 %v2044_v30  ;;  %v2098_v29 = vld [vmem:[%s2345_s10 + $0x2e8] ss:$16 sps:$4 sm:$0xff]   ;;  %v2103_v30 = vld [vmem:[%s2345_s10 + $0x10c] ss:$16 sps:$4 sm:$0xff]  }
  0x84   : > { %1386 = vmatprep.subr.bf16.mxu0 %v2049_v31  ;;  %1427 = vmatprep.subr.bf16.mxu1 %v2052_v32  ;;  %v2106_v31 = vld [vmem:[%s2345_s10 + $0x30c] ss:$16 sps:$4 sm:$0xff]   ;;  %v2101_v32 = vld [vmem:[%s2345_s10 + $0x108] ss:$16 sps:$4 sm:$0xff]  }
  0x87   : > { %1387 = vmatpush1.bf16.msra.mxu0 %v2047_v33  ;;  %1428 = vmatpush1.bf16.msra.mxu1 %v2050_v34  ;;  %v2104_v33 = vld [vmem:[%s2345_s10 + $0x308] ss:$16 sps:$4 sm:$0xff]   ;;  %v2109_v34 = vld [vmem:[%s2345_s10 + $0x12c] ss:$16 sps:$4 sm:$0xff]  }
  0x88   : > { %1438 = vmatprep.subr.bf16.mxu0 %v2055_v35  ;;  %1479 = vmatprep.subr.bf16.mxu1 %v2058_v36  ;;  %v2112_v35 = vld [vmem:[%s2345_s10 + $0x32c] ss:$16 sps:$4 sm:$0xff]   ;;  %v2107_v36 = vld [vmem:[%s2345_s10 + $0x128] ss:$16 sps:$4 sm:$0xff]  }
 0x11d   : > { %v532_v48 = vpop.f32.mrb[0].mxu0  ;;  %v573_v49 = vpop.f32.mrb[0].mxu1 }
 0x11e   : > { %v533_v50 = vadd.f32 %v532_v48, %v397_v44  ;;  %v574_v51 = vadd.f32 %v573_v49, %v405_v45  ;;  %v534_v52 = vpop.f32.mrb[1].mxu0  ;;  %v575_v53 = vpop.f32.mrb[1].mxu1  ;;  %v2118_v44 = vld [vmem:[%s2345_s10 + $0x34c] ss:$16 sps:$4 sm:$0xff]   ;;  %v2113_v45 = vld [vmem:[%s2345_s10 + $0x148] ss:$16 sps:$4 sm:$0xff]  }
 0x11f   : > { %v535_v54 = vadd.f32 %v534_v52, %v401_v46  ;;  %v576_v55 = vadd.f32 %v575_v53, %v409_v47  ;;  %v536_v56 = vpop.f32.mrb[2].mxu0  ;;  %v577_v57 = vpop.f32.mrb[2].mxu1  ;;  %v2116_v46 = vld [vmem:[%s2345_s10 + $0x348] ss:$16 sps:$4 sm:$0xff]   ;;  %v2121_v47 = vld [vmem:[%s2345_s10 + $0x16c] ss:$16 sps:$4 sm:$0xff]  }
 0x120   : > { %v537_v58 = vpop.f32.mrb[3].mxu0  ;;  %v578_v59 = vpop.f32.mrb[3].mxu1  ;;  %v2468_v0 = vpack.c.bf16 %v533_v50, %v533_v50  ;;  %v2470_v1 = vpack.c.bf16 %v574_v51, %v574_v51  ;;  %v2124_v48 = vld [vmem:[%s2345_s10 + $0x36c] ss:$16 sps:$4 sm:$0xff]   ;;  %v2119_v49 = vld [vmem:[%s2345_s10 + $0x168] ss:$16 sps:$4 sm:$0xff]  }
 0x121   : > { %v585_v60 = vpack.c.bf16 %v535_v54, %v535_v54  ;;  %v587_v61 = vpack.c.bf16 %v576_v55, %v576_v55  ;;  %v2122_v50 = vld [vmem:[%s2345_s10 + $0x368] ss:$16 sps:$4 sm:$0xff]   ;;  %v2127_v51 = vld [vmem:[%s2345_s10 + $0x18c] ss:$16 sps:$4 sm:$0xff]  }
 0x122   : > { %v2130_v52 = vld [vmem:[%s2345_s10 + $0x38c] ss:$16 sps:$4 sm:$0xff]   ;;  %v2125_v53 = vld [vmem:[%s2345_s10 + $0x188] ss:$16 sps:$4 sm:$0xff]  }
 0x123   : > { %1388 = vmatprep.mubr.bf16.mxu0 %v585_v60  ;;  %1429 = vmatprep.mubr.bf16.mxu1 %v587_v61  ;;  %v2128_v54 = vld [vmem:[%s2345_s10 + $0x388] ss:$16 sps:$4 sm:$0xff]   ;;  %v2133_v55 = vld [vmem:[%s2345_s10 + $0x1ac] ss:$16 sps:$4 sm:$0xff]  }
 0x124   : > { %1389 = vmatmul.mubr.bf16.vlgmr.msra.gmra.mrb[4].mxu0 %v2468_v0  ;;  %1430 = vmatmul.mubr.bf16.vlgmr.msra.gmra.mrb[4].mxu1 %v2470_v1  ;;  %v2136_v56 = vld [vmem:[%s2345_s10 + $0x3ac] ss:$16 sps:$4 sm:$0xff]   ;;  %v2131_v57 = vld [vmem:[%s2345_s10 + $0x1a8] ss:$16 sps:$4 sm:$0xff]  }
 0x125   : > { %1439 = vmatpush1.bf16.msra.mxu0 %v2053_v62  ;;  %1480 = vmatpush1.bf16.msra.mxu1 %v2056_v63  ;;  %v2134_v58 = vld [vmem:[%s2345_s10 + $0x3a8] ss:$16 sps:$4 sm:$0xff]   ;;  %v2139_v59 = vld [vmem:[%s2345_s10 + $0x1cc] ss:$16 sps:$4 sm:$0xff]  }
 0x126   : > { %1470 = vmatprep.mubr.bf16.mxu0 %v585_v60  ;;  %1511 = vmatprep.mubr.bf16.mxu1 %v587_v61  ;;  %v2142_v60 = vld [vmem:[%s2345_s10 + $0x3cc] ss:$16 sps:$4 sm:$0xff]   ;;  %v2137_v61 = vld [vmem:[%s2345_s10 + $0x1c8] ss:$16 sps:$4 sm:$0xff]  }
 0x127   : > { %1440 = vmatprep.subr.bf16.mxu0 %v2061_v2  ;;  %1481 = vmatprep.subr.bf16.mxu1 %v2064_v3  ;;  %v2140_v62 = vld [vmem:[%s2345_s10 + $0x3c8] ss:$16 sps:$4 sm:$0xff]   ;;  %v2145_v63 = vld [vmem:[%s2345_s10 + $0x1ec] ss:$16 sps:$4 sm:$0xff]  }
 0x128   : > { %v2148_v2 = vld [vmem:[%s2345_s10 + $0x3ec] ss:$16 sps:$4 sm:$0xff]   ;;  %v2143_v3 = vld [vmem:[%s2345_s10 + $0x1e8] ss:$16 sps:$4 sm:$0xff]  }
 0x129   : > { %1441 = vmatpush1.bf16.msra.mxu0 %v2059_v4  ;;  %1482 = vmatpush1.bf16.msra.mxu1 %v2062_v5  ;;  %v2146_v4 = vld [vmem:[%s2345_s10 + $0x3e8] ss:$16 sps:$4 sm:$0xff]  }
 0x12a   : > { %1442 = vmatprep.subr.bf16.mxu0 %v2067_v6  ;;  %1483 = vmatprep.subr.bf16.mxu1 %v2070_v7  ;;  %v580_v6 = vld [vmem:[#allocation2] sm:$0xff] }
 0x12d   : > { %1443 = vmatpush1.bf16.msra.mxu0 %v2065_v8  ;;  %1484 = vmatpush1.bf16.msra.mxu1 %v2068_v9 }
 0x12e   : > { %1444 = vmatprep.subr.bf16.mxu0 %v2073_v10  ;;  %1485 = vmatprep.subr.bf16.mxu1 %v2076_v11  ;;  %v581_v10 = vld [vmem:[#allocation2 + $0x8] sm:$0xff] }
 0x131   : > { %1445 = vmatpush1.bf16.msra.mxu0 %v2071_v12  ;;  %1486 = vmatpush1.bf16.msra.mxu1 %v2074_v13 }
 0x132   : > { %1446 = vmatprep.subr.bf16.mxu0 %v2079_v14  ;;  %1487 = vmatprep.subr.bf16.mxu1 %v2082_v15 }
 0x135   : > { %1447 = vmatpush1.bf16.msra.mxu0 %v2077_v16  ;;  %1488 = vmatpush1.bf16.msra.mxu1 %v2080_v17 }
 0x136   : > { %1448 = vmatprep.subr.bf16.mxu0 %v2085_v18  ;;  %1489 = vmatprep.subr.bf16.mxu1 %v2088_v19 }
 0x139   : > { %1449 = vmatpush1.bf16.msra.mxu0 %v2083_v20  ;;  %1490 = vmatpush1.bf16.msra.mxu1 %v2086_v21 }
 0x13a   : > { %1450 = vmatprep.subr.bf16.mxu0 %v2091_v22  ;;  %1491 = vmatprep.subr.bf16.mxu1 %v2094_v23  ;;  %v583_v22 = vld [vmem:[#allocation2 + $0x18] sm:$0xff] }
 0x13d   : > { %1451 = vmatpush1.bf16.msra.mxu0 %v2089_v24  ;;  %1492 = vmatpush1.bf16.msra.mxu1 %v2092_v25 }
 0x13e   : > { %1452 = vmatprep.subr.bf16.mxu0 %v2097_v26  ;;  %1493 = vmatprep.subr.bf16.mxu1 %v2100_v27 }
 0x141   : > { %1453 = vmatpush1.bf16.msra.mxu0 %v2095_v28  ;;  %1494 = vmatpush1.bf16.msra.mxu1 %v2098_v29 }
 0x142   : > { %1454 = vmatprep.subr.bf16.mxu0 %v2103_v30  ;;  %1495 = vmatprep.subr.bf16.mxu1 %v2106_v31 }
 0x145   : > { %1455 = vmatpush1.bf16.msra.mxu0 %v2101_v32  ;;  %1496 = vmatpush1.bf16.msra.mxu1 %v2104_v33  ;;  %v1536_v32 = vld [vmem:[%s358_s16] sm:$0xf] (!%p1867_p1) }
 0x146   : > { %1456 = vmatprep.subr.bf16.mxu0 %v2109_v34  ;;  %1497 = vmatprep.subr.bf16.mxu1 %v2112_v35  ;;  %v1541_v34 = vrot.slane (!%p1867_p1), %v1536_v32, %v396_v39  ;;  %v1545_v35 = vrot.slane (!%p1867_p1), %v1536_v32, %v400_v42 }
 0x149   : > { %1457 = vmatpush1.bf16.msra.mxu0 %v2107_v36  ;;  %1498 = vmatpush1.bf16.msra.mxu1 %v2110_v37  ;;  %v1549_v37 = vrot.slane (!%p1867_p1), %v1536_v32, %v404_v40 }
 0x14a   : > { %1458 = vmatprep.subr.bf16.mxu0 %v2115_v41  ;;  %1499 = vmatprep.subr.bf16.mxu1 %v2118_v44  ;;  %v1553_v44 = vrot.slane (!%p1867_p1), %v1536_v32, %v408_v43 }
 0x14d   : > { %1459 = vmatpush1.bf16.msra.mxu0 %v2113_v45  ;;  %1500 = vmatpush1.bf16.msra.mxu1 %v2116_v46 }
 0x14e   : > { %1460 = vmatprep.subr.bf16.mxu0 %v2121_v47  ;;  %1501 = vmatprep.subr.bf16.mxu1 %v2124_v48 }
 0x151   : > { %1461 = vmatpush1.bf16.msra.mxu0 %v2119_v49  ;;  %1502 = vmatpush1.bf16.msra.mxu1 %v2122_v50 }
 0x152   : > { %1462 = vmatprep.subr.bf16.mxu0 %v2127_v51  ;;  %1503 = vmatprep.subr.bf16.mxu1 %v2130_v52 }
 0x155   : > { %1463 = vmatpush1.bf16.msra.mxu0 %v2125_v53  ;;  %1504 = vmatpush1.bf16.msra.mxu1 %v2128_v54 }
 0x156   : > { %1464 = vmatprep.subr.bf16.mxu0 %v2133_v55  ;;  %1505 = vmatprep.subr.bf16.mxu1 %v2136_v56 }
 0x159   : > { %1465 = vmatpush1.bf16.msra.mxu0 %v2131_v57  ;;  %1506 = vmatpush1.bf16.msra.mxu1 %v2134_v58 }
 0x15a   : > { %1466 = vmatprep.subr.bf16.mxu0 %v2139_v59  ;;  %1507 = vmatprep.subr.bf16.mxu1 %v2142_v60 }
 0x15d   : > { %1467 = vmatpush1.bf16.msra.mxu0 %v2137_v61  ;;  %1508 = vmatpush1.bf16.msra.mxu1 %v2140_v62 }
 0x15e   : > { %1468 = vmatprep.subr.bf16.mxu0 %v2145_v63  ;;  %1509 = vmatprep.subr.bf16.mxu1 %v2148_v2 }
 0x161   : > { %1469 = vmatpush1.bf16.msra.mxu0 %v2143_v3  ;;  %1510 = vmatpush1.bf16.msra.mxu1 %v2146_v4 }
 0x164   : > { %1471 = vmatmul.mubr.bf16.vlgmr.msra.gmra.mrb[8].mxu0 %v2468_v0  ;;  %1512 = vmatmul.mubr.bf16.vlgmr.msra.gmra.mrb[8].mxu1 %v2470_v1  ;;  %v582_v0 = vld [vmem:[#allocation2 + $0x10] sm:$0xff] }
 0x1f7   : > { %v1390_v5 = vpop.f32.mrb[4].mxu0  ;;  %v1431_v7 = vpop.f32.mrb[4].mxu1 }
 0x1f8   : > { %v1432_v8 = vadd.f32 %v1431_v7, %v1390_v5  ;;  %v1392_v9 = vpop.f32.mrb[5].mxu0  ;;  %v1433_v11 = vpop.f32.mrb[5].mxu1 }
 0x1f9   : > { %v1434_v12 = vadd.f32 %v1433_v11, %v1392_v9  ;;  %v1394_v13 = vpop.f32.mrb[6].mxu0  ;;  %v1435_v14 = vpop.f32.mrb[6].mxu1 }
 0x1fa   : > { %v1520_v15 = vadd.f32 %v1432_v8, %v580_v6  ;;  %v1395_v16 = vpop.f32.mrb[7].mxu0  ;;  %v1436_v17 = vpop.f32.mrb[7].mxu1 }
 0x1fb   : > { %v1521_v18 = vadd.f32 %v1434_v12, %v581_v10 }
 0x1fc   : > { %1524 = vst [vmem:[#allocation2] sm:$0xff] %v1520_v15 }
 0x1fd   : > { %1525 = vst [vmem:[#allocation2 + $0x8] sm:$0xff] %v1521_v18 }
 0x203   : > { %v1532_v31 = vld [vmem:[#allocation2] sm:$0xff] (!%p1867_p1) }
 0x204   : > { %v1533_v33 = vld [vmem:[#allocation2 + $0x8] sm:$0xff] (!%p1867_p1)  ;;  %v1558_v45 = vadd.f32 (!%p1867_p1), %v1541_v34, %v1532_v31 }
 0x205   : > { %v1559_v46 = vadd.f32 (!%p1867_p1), %v1545_v35, %v1533_v33 }
 0x206   : > { %v1868_v49 = vmul.f32 (!%p1867_p1), -1.442695, %v1558_v45 }
 0x207   : > { %v1869_v50 = vmul.f32 (!%p1867_p1), -1.442695, %v1559_v46 }
 0x208   : > { %2149 = vpow2.f32 (!%p1867_p1), %v1868_v49 }
 0x209   : > { %2151 = vpow2.f32 (!%p1867_p1), %v1869_v50 }
 0x212   : > { %v2150_v39 = vpop.eup (!%p1867_p1), %2149 }
 0x213   : > { %v2152_v40 = vpop.eup (!%p1867_p1), %2151  ;;  %v1574_v42 = vadd.f32 (!%p1867_p1), 1.0, %v2150_v39 }
 0x214   : > { %v1575_v43 = vadd.f32 (!%p1867_p1), 1.0, %v2152_v40 }
 0x237   : > { %v1472_v19 = vpop.f32.mrb[8].mxu0  ;;  %v1513_v20 = vpop.f32.mrb[8].mxu1  ;;  %1531 = sbr.rel (%p1867_p1) target bundleno = 610 (0x262), region = 71 }
 0x238   : > { %v1514_v1 = vadd.f32 %v1513_v20, %v1472_v19  ;;  %v1474_v21 = vpop.f32.mrb[9].mxu0  ;;  %v1515_v23 = vpop.f32.mrb[9].mxu1 }
 0x239   : > { %v1516_v24 = vadd.f32 %v1515_v23, %v1474_v21  ;;  %v1476_v25 = vpop.f32.mrb[10].mxu0  ;;  %v1517_v26 = vpop.f32.mrb[10].mxu1 }
 0x23a   : > { %v1522_v27 = vadd.f32 %v1514_v1, %v582_v0  ;;  %v1477_v28 = vpop.f32.mrb[11].mxu0  ;;  %v1518_v29 = vpop.f32.mrb[11].mxu1 }
 0x23b   : > { %v1523_v30 = vadd.f32 %v1516_v24, %v583_v22 }
 0x23c   : > { %1526 = vst [vmem:[#allocation2 + $0x10] sm:$0xff] %v1522_v27 }
 0x23d   : > { %1527 = vst [vmem:[#allocation2 + $0x18] sm:$0xff] %v1523_v30 }
 0x243   : > { %v1534_v36 = vld [vmem:[#allocation2 + $0x10] sm:$0xff] }
 0x244   : > { %v1535_v41 = vld [vmem:[#allocation2 + $0x18] sm:$0xff]  ;;  %v1560_v47 = vadd.f32 %v1549_v37, %v1534_v36 }
 0x245   : > { %v1561_v48 = vadd.f32 %v1553_v44, %v1535_v41 }
 0x246   : > { %v1870_v51 = vmul.f32 -1.442695, %v1560_v47 }
 0x247   : > { %v1871_v52 = vmul.f32 -1.442695, %v1561_v48 }
 0x248   : > { %2153 = vpow2.f32 %v1870_v51 }
 0x249   : > { %2155 = vpow2.f32 %v1871_v52 }
 0x24a   : > { %2157 = vrcp.f32 %v1574_v42 }
 0x24b   : > { %2159 = vrcp.f32 %v1575_v43 }
 0x252   : > { %v2154_v38 = vpop.eup %2153 }
 0x253   : > { %v2156_v53 = vpop.eup %2155  ;;  %v1576_v54 = vadd.f32 1.0, %v2154_v38 }
 0x254   : > { %v1577_v55 = vadd.f32 1.0, %v2156_v53  ;;  %v2158_v56 = vpop.eup %2157 }
 0x255   : > { %2161 = vrcp.f32 %v1576_v54  ;;  %v2160_v57 = vpop.eup %2159  ;;  %1586 = vst [vmem:[%s2357_s15] sm:$0xff] %v2158_v56 }
 0x256   : > { %2163 = vrcp.f32 %v1577_v55  ;;  %1587 = vst [vmem:[%s2357_s15 + $0x8] sm:$0xff] %v2160_v57 }
 0x25f   : > { %v2162_v58 = vpop.eup %2161 }
 0x260   : > { %v2164_v59 = vpop.eup %2163  ;;  %1588 = vst [vmem:[%s2357_s15 + $0x10] sm:$0xff] %v2162_v58 }
 0x261   : > { %1589 = vst [vmem:[%s2357_s15 + $0x18] sm:$0xff] %v2164_v59 }
 0x262 PF: > { %s15_s24 = sadd.s32 1, %s2219_s24   ;;  %s2582_s18 = smov %s2199_s19 }
 0x263   : > { %p12_p2 = scmp.ge.s32.totalorder %s15_s24, 18   ;;  %s2583_s19 = smov %s2302_s29 }
 0x264   : > { %s2584_s20 = smov %s2211_s22  ;;  %s2585_s21 = smov %s2215_s23 }
 0x265   : > { %s2586_s22 = smov %s2589_s25  ;;  %s2587_s23 = smov %s2593_s26 }
 0x266   :  { %14 = sbr.rel (!%p12_p2) target bundleno = 4 (0x4), region = 115 }

</bundles_post_ra>
